<compile_context>
chip_gen: v5e
topology: v5e:2x2
jax: 0.10.0
libtpu: 0.0.40
codegen_flags: <defaults>
</compile_context>

<pallas_src>
import jax
import jax.numpy as jnp
from jax.experimental import pallas as pl
from jax.experimental.pallas import tpu as pltpu

# Logical sizes of the PyTorch model.
IN_FEATURES = 11
H1, H2, H3, OUT_FEATURES = 1000, 500, 250, 4

# MXU / layout friendly padded sizes.  Zero-padded weight columns + zero bias
# => ReLU(0) = 0, so padding never changes the result.  The softmax dim is NOT
# padded (padded logits would corrupt the denominator).
D_IN = 16
D1, D2, D3 = 1024, 512, 256
D_OUT = OUT_FEATURES


def mlp_kernel(x_ref,
               w1_ref, b1_ref,
               w2_ref, b2_ref,
               w3_ref, b3_ref,
               w4_ref, b4_ref,
               out_ref):
    """One batch tile: 3x (matmul + bias + ReLU) + matmul + softmax.

    bf16 feeds the MXU, f32 accumulation; bf16 bias/ReLU epilogues.  The output
    is stored transposed (D_OUT, block_b) so the store is lane-dense.
    """
    x = x_ref[...].astype(jnp.bfloat16)                                    # (Bt, 16)

    h1 = jnp.dot(x, w1_ref[...], preferred_element_type=jnp.float32)
    h1 = jnp.maximum(h1.astype(jnp.bfloat16) + b1_ref[...], 0)            # (Bt, 1024)

    h2 = jnp.dot(h1, w2_ref[...], preferred_element_type=jnp.float32)
    h2 = jnp.maximum(h2.astype(jnp.bfloat16) + b2_ref[...], 0)            # (Bt, 512)

    h3 = jnp.dot(h2, w3_ref[...], preferred_element_type=jnp.float32)
    h3 = jnp.maximum(h3.astype(jnp.bfloat16) + b3_ref[...], 0)            # (Bt, 256)

    logits = jnp.dot(h3, w4_ref[...], preferred_element_type=jnp.float32) + b4_ref[...]

    # Lane-dense, numerically stable softmax: transpose the tiny (Bt, 4) logits
    # to (4, Bt) so exp / reductions / the store all run on full 128-lane vregs.
    logits_t = logits.T                                                    # (4, Bt) f32
    m = jnp.max(logits_t, axis=0, keepdims=True)
    e = jnp.exp(logits_t - m)
    out_ref[...] = e / jnp.sum(e, axis=0, keepdims=True)                   # exact probs


def mlp_forward(x, params, *, block_b=512):
    """x: (B, 11) float32.  params: dict name -> (W_t (in,out) bf16, bias)."""
    w1, b1 = params["fc1"]
    w2, b2 = params["fc2"]
    w3, b3 = params["fc3"]
    w4, b4 = params["output"]

    B = x.shape[0]
    # Pad features 11 -> 16 once in the wrapper.
    if x.shape[1] != D_IN:
        x = jnp.pad(x, ((0, 0), (0, D_IN - x.shape[1])))
    # Batch tile: 512 rows, or the whole (sublane-padded) batch when smaller.
    if B < block_b:
        block_b = max(8, ((B + 7) // 8) * 8)
    Bp = pl.cdiv(B, block_b) * block_b
    if Bp != B:
        x = jnp.pad(x, ((0, Bp - B), (0, 0)))
    n_tiles = Bp // block_b

    # Megacore sharding duplicates the (dominant) weight DMA per TensorCore on
    # v7x -- only shard the batch axis when there is enough work to pay for it.
    dim_sem = ("parallel",) if n_tiles >= 4 else ("arbitrary",)

    flops = 2 * Bp * (D_IN * D1 + D1 * D2 + D2 * D3 + D3 * D_OUT)
    bytes_accessed = (
        x.size * x.dtype.itemsize
        + sum(a.size * a.dtype.itemsize for a in (w1, b1, w2, b2, w3, b3, w4, b4))
        + Bp * D_OUT * 4)
    cost = pl.CostEstimate(flops=flops, transcendentals=Bp * D_OUT,
                           bytes_accessed=bytes_accessed)

    def build(single_buffer_weights):
        def resident(a):
            # Constant index_map => DMA'd once, stays VMEM-resident while the
            # activation tiles pipeline.  Buffered(1) drops the useless second
            # buffer (VMEM headroom on v7x's 64 MiB part).
            if single_buffer_weights:
                return pl.BlockSpec(a.shape, lambda i: (0, 0),
                                    pipeline_mode=pl.Buffered(buffer_count=1))
            return pl.BlockSpec(a.shape, lambda i: (0, 0))

        return pl.pallas_call(
            mlp_kernel,
            # Output is (D_OUT, Bp): last dim = batch (lane-dense).
            out_shape=jax.ShapeDtypeStruct((D_OUT, Bp), jnp.float32),
            grid=(n_tiles,),
            in_specs=[pl.BlockSpec((block_b, D_IN), lambda i: (i, 0)),
                      resident(w1), resident(b1),
                      resident(w2), resident(b2),
                      resident(w3), resident(b3),
                      resident(w4), resident(b4)],
            out_specs=pl.BlockSpec((D_OUT, block_b), lambda i: (0, i)),
            compiler_params=pltpu.CompilerParams(
                dimension_semantics=dim_sem,
                vmem_limit_bytes=32 << 20),
            cost_estimate=cost,
        )

    args = (x, w1, b1, w2, b2, w3, b3, w4, b4)
    try:
        out_t = build(single_buffer_weights=True)(*args)
    except Exception:
        # pipeline_mode / Buffered(1) unsupported on this jax version: fall back
        # to default double-buffered (still correct, ~1.3 MB more VMEM).
        out_t = build(single_buffer_weights=False)(*args)

    return out_t.T[:B]


def init_params(key,
                input_features=IN_FEATURES,
                hidden_layer1=H1,
                hidden_layer2=H2,
                output_inputs=H3,
                output_features=OUT_FEATURES):
    """nn.Linear-style U(-1/sqrt(fan_in), +1/sqrt(fan_in)) init on the logical
    (unpadded) shapes, zero-padded to MXU/layout-friendly widths.  Weights are
    stored transposed (in, out) in bf16; fc1..fc3 biases bf16 (bf16 epilogue),
    output bias f32 (softmax logits stay f32)."""
    logical = [(input_features, hidden_layer1),
               (hidden_layer1, hidden_layer2),
               (hidden_layer2, output_inputs),
               (output_inputs, output_features)]
    padded = [(D_IN, D1), (D1, D2), (D2, D3), (D3, D_OUT)]
    names = ["fc1", "fc2", "fc3", "output"]
    bias_dtypes = [jnp.bfloat16, jnp.bfloat16, jnp.bfloat16, jnp.float32]
    params = {}
    for name, (fi, fo), (pi, po), bdt in zip(names, logical, padded, bias_dtypes):
        key, kw, kb = jax.random.split(key, 3)
        bound = 1.0 / (fi ** 0.5)
        w_t = jax.random.uniform(kw, (fi, fo), jnp.float32, -bound, bound)
        b = jax.random.uniform(kb, (1, fo), jnp.float32, -bound, bound)
        w_pad = jnp.zeros((pi, po), jnp.float32).at[:fi, :fo].set(w_t)
        b_pad = jnp.zeros((1, po), jnp.float32).at[:, :fo].set(b)
        params[name] = (w_pad.astype(jnp.bfloat16), b_pad.astype(bdt))
    return params


def mlp_reference(x, params):
    """Pure-JAX mirror of the kernel math on the same padded/bf16 parameters."""
    if x.shape[1] != D_IN:
        x = jnp.pad(x, ((0, 0), (0, D_IN - x.shape[1])))
    h = x.astype(jnp.bfloat16)
    for name in ("fc1", "fc2", "fc3"):
        w, b = params[name]
        h = jnp.maximum(
            jnp.dot(h, w, preferred_element_type=jnp.float32).astype(jnp.bfloat16) + b,
            0)
    w, b = params["output"]
    logits = jnp.dot(h, w, preferred_element_type=jnp.float32) + b
    return jax.nn.softmax(logits, axis=1)


if __name__ == "__main__":
    key = jax.random.PRNGKey(0)
    key, kx = jax.random.split(key)

    batch = 8
    x = jax.random.normal(kx, (batch, IN_FEATURES), dtype=jnp.float32)

    params = init_params(key)

    out = jax.block_until_ready(mlp_forward(x, params))
    assert out.shape == (batch, OUT_FEATURES)

    # Exact divide in the softmax -> rows sum to ~1.
    row_sums = jnp.sum(out, axis=1)
    assert bool(jnp.all(jnp.abs(row_sums - 1.0) < 1e-3))

    # Match the pure-JAX reference on identical (padded, bf16) parameters.
    ref = mlp_reference(x, params)
    assert bool(jnp.all(jnp.abs(out - ref) < 2e-2))

    print("KERNEL_OK")
</pallas_src>

<mosaic_0001>
module attributes {stable_mosaic.version = 11 : i64} {
  func.func @mlp_kernel(%arg0: i32, %arg1: memref<8x16xf32, #tpu.memory_space<vmem>>, %arg2: memref<16x1024xbf16, #tpu.memory_space<vmem>>, %arg3: memref<1x1024xbf16, #tpu.memory_space<vmem>>, %arg4: memref<1024x512xbf16, #tpu.memory_space<vmem>>, %arg5: memref<1x512xbf16, #tpu.memory_space<vmem>>, %arg6: memref<512x256xbf16, #tpu.memory_space<vmem>>, %arg7: memref<1x256xbf16, #tpu.memory_space<vmem>>, %arg8: memref<256x4xbf16, #tpu.memory_space<vmem>>, %arg9: memref<1x4xf32, #tpu.memory_space<vmem>>, %arg10: memref<4x8xf32, #tpu.memory_space<vmem>>) attributes {dimension_semantics = [#tpu.dimension_semantics<arbitrary>], iteration_bounds = array<i64: 1>, scalar_prefetch = 0 : i64, scratch_operands = 0 : i64, tpu.core_type = #tpu.core_type<tc>, window_params = [{transform_indices = @transform_0, window_bounds = array<i64: 8, 16>}, {pipeline_mode = #tpu.pipeline_mode<synchronous>, transform_indices = @transform_1, window_bounds = array<i64: 16, 1024>}, {pipeline_mode = #tpu.pipeline_mode<synchronous>, transform_indices = @transform_2, window_bounds = array<i64: 1, 1024>}, {pipeline_mode = #tpu.pipeline_mode<synchronous>, transform_indices = @transform_3, window_bounds = array<i64: 1024, 512>}, {pipeline_mode = #tpu.pipeline_mode<synchronous>, transform_indices = @transform_4, window_bounds = array<i64: 1, 512>}, {pipeline_mode = #tpu.pipeline_mode<synchronous>, transform_indices = @transform_5, window_bounds = array<i64: 512, 256>}, {pipeline_mode = #tpu.pipeline_mode<synchronous>, transform_indices = @transform_6, window_bounds = array<i64: 1, 256>}, {pipeline_mode = #tpu.pipeline_mode<synchronous>, transform_indices = @transform_7, window_bounds = array<i64: 256, 4>}, {pipeline_mode = #tpu.pipeline_mode<synchronous>, transform_indices = @transform_8, window_bounds = array<i64: 1, 4>}, {transform_indices = @transform_9, window_bounds = array<i64: 4, 8>}]} {
    %c0 = arith.constant 0 : index
    %c0_0 = arith.constant 0 : index
    %0 = vector.load %arg1[%c0, %c0_0] : memref<8x16xf32, #tpu.memory_space<vmem>>, vector<8x16xf32>
    %1 = arith.truncf %0 : vector<8x16xf32> to vector<8x16xbf16>
    %c0_1 = arith.constant 0 : index
    %c0_2 = arith.constant 0 : index
    %2 = vector.load %arg2[%c0_1, %c0_2] : memref<16x1024xbf16, #tpu.memory_space<vmem>>, vector<16x1024xbf16>
    %cst = arith.constant dense<0.000000e+00> : vector<8x1024xf32>
    %3 = tpu.matmul %1, %2, %cst {dimension_numbers = #tpu.dot_dimension_numbers<[1], [0], [0], [1], [0, 0, 1, 1], [], []>} : vector<8x16xbf16>, vector<16x1024xbf16>, vector<8x1024xf32> -> vector<8x1024xf32>
    %4 = arith.truncf %3 : vector<8x1024xf32> to vector<8x1024xbf16>
    %c0_3 = arith.constant 0 : index
    %c0_4 = arith.constant 0 : index
    %5 = vector.load %arg3[%c0_3, %c0_4] : memref<1x1024xbf16, #tpu.memory_space<vmem>>, vector<1x1024xbf16>
    %6 = vector.broadcast %5 : vector<1x1024xbf16> to vector<8x1024xbf16>
    %7 = arith.addf %4, %6 : vector<8x1024xbf16>
    %cst_5 = arith.constant 0.000000e+00 : bf16
    %8 = vector.broadcast %cst_5 : bf16 to vector<8x1024xbf16>
    %9 = arith.maximumf %7, %8 : vector<8x1024xbf16>
    %c0_6 = arith.constant 0 : index
    %c0_7 = arith.constant 0 : index
    %10 = vector.load %arg4[%c0_6, %c0_7] : memref<1024x512xbf16, #tpu.memory_space<vmem>>, vector<1024x512xbf16>
    %cst_8 = arith.constant dense<0.000000e+00> : vector<8x512xf32>
    %11 = tpu.matmul %9, %10, %cst_8 {dimension_numbers = #tpu.dot_dimension_numbers<[1], [0], [0], [1], [0, 0, 1, 1], [], []>} : vector<8x1024xbf16>, vector<1024x512xbf16>, vector<8x512xf32> -> vector<8x512xf32>
    %12 = arith.truncf %11 : vector<8x512xf32> to vector<8x512xbf16>
    %c0_9 = arith.constant 0 : index
    %c0_10 = arith.constant 0 : index
    %13 = vector.load %arg5[%c0_9, %c0_10] : memref<1x512xbf16, #tpu.memory_space<vmem>>, vector<1x512xbf16>
    %14 = vector.broadcast %13 : vector<1x512xbf16> to vector<8x512xbf16>
    %15 = arith.addf %12, %14 : vector<8x512xbf16>
    %cst_11 = arith.constant 0.000000e+00 : bf16
    %16 = vector.broadcast %cst_11 : bf16 to vector<8x512xbf16>
    %17 = arith.maximumf %15, %16 : vector<8x512xbf16>
    %c0_12 = arith.constant 0 : index
    %c0_13 = arith.constant 0 : index
    %18 = vector.load %arg6[%c0_12, %c0_13] : memref<512x256xbf16, #tpu.memory_space<vmem>>, vector<512x256xbf16>
    %cst_14 = arith.constant dense<0.000000e+00> : vector<8x256xf32>
    %19 = tpu.matmul %17, %18, %cst_14 {dimension_numbers = #tpu.dot_dimension_numbers<[1], [0], [0], [1], [0, 0, 1, 1], [], []>} : vector<8x512xbf16>, vector<512x256xbf16>, vector<8x256xf32> -> vector<8x256xf32>
    %20 = arith.truncf %19 : vector<8x256xf32> to vector<8x256xbf16>
    %c0_15 = arith.constant 0 : index
    %c0_16 = arith.constant 0 : index
    %21 = vector.load %arg7[%c0_15, %c0_16] : memref<1x256xbf16, #tpu.memory_space<vmem>>, vector<1x256xbf16>
    %22 = vector.broadcast %21 : vector<1x256xbf16> to vector<8x256xbf16>
    %23 = arith.addf %20, %22 : vector<8x256xbf16>
    %cst_17 = arith.constant 0.000000e+00 : bf16
    %24 = vector.broadcast %cst_17 : bf16 to vector<8x256xbf16>
    %25 = arith.maximumf %23, %24 : vector<8x256xbf16>
    %c0_18 = arith.constant 0 : index
    %c0_19 = arith.constant 0 : index
    %26 = vector.load %arg8[%c0_18, %c0_19] : memref<256x4xbf16, #tpu.memory_space<vmem>>, vector<256x4xbf16>
    %cst_20 = arith.constant dense<0.000000e+00> : vector<8x4xf32>
    %27 = tpu.matmul %25, %26, %cst_20 {dimension_numbers = #tpu.dot_dimension_numbers<[1], [0], [0], [1], [0, 0, 1, 1], [], []>} : vector<8x256xbf16>, vector<256x4xbf16>, vector<8x4xf32> -> vector<8x4xf32>
    %c0_21 = arith.constant 0 : index
    %c0_22 = arith.constant 0 : index
    %28 = vector.load %arg9[%c0_21, %c0_22] : memref<1x4xf32, #tpu.memory_space<vmem>>, vector<1x4xf32>
    %29 = vector.broadcast %28 : vector<1x4xf32> to vector<8x4xf32>
    %30 = arith.addf %27, %29 : vector<8x4xf32>
    %31 = tpu.transpose %30, [1, 0] : vector<8x4xf32> -> vector<4x8xf32>
    %cst_23 = arith.constant dense<0xFF800000> : vector<8xf32>
    %32 = vector.multi_reduction <maximumf>, %31, %cst_23 [0] : vector<4x8xf32> to vector<8xf32>
    %33 = vector.shape_cast %32 : vector<8xf32> to vector<1x8xf32>
    %34 = vector.broadcast %33 : vector<1x8xf32> to vector<4x8xf32>
    %35 = arith.subf %31, %34 : vector<4x8xf32>
    %36 = math.exp %35 : vector<4x8xf32>
    %cst_24 = arith.constant dense<0.000000e+00> : vector<8xf32>
    %37 = vector.multi_reduction <add>, %36, %cst_24 [0] : vector<4x8xf32> to vector<8xf32>
    %38 = vector.shape_cast %37 : vector<8xf32> to vector<1x8xf32>
    %39 = vector.broadcast %38 : vector<1x8xf32> to vector<4x8xf32>
    %40 = arith.divf %36, %39 : vector<4x8xf32>
    %c0_25 = arith.constant 0 : index
    %c0_26 = arith.constant 0 : index
    %41 = vector.load %arg10[%c0_25, %c0_26] : memref<4x8xf32, #tpu.memory_space<vmem>>, vector<4x8xf32>
    tpu.vector_store %arg10[%c0_25, %c0_26], %40 {strides = array<i32>} : memref<4x8xf32, #tpu.memory_space<vmem>>, vector<4x8xf32>,
    return
  }
  func.func @transform_0(%arg0: i32) -> (i32, i32) {
    %c0_i32 = arith.constant 0 : i32
    %c0_i32_0 = arith.constant 0 : i32
    return %arg0, %c0_i32 : i32, i32
  }
  func.func @transform_1(%arg0: i32) -> (i32, i32) {
    %c0_i32 = arith.constant 0 : i32
    %c0_i32_0 = arith.constant 0 : i32
    %c0_i32_1 = arith.constant 0 : i32
    return %c0_i32, %c0_i32_0 : i32, i32
  }
  func.func @transform_2(%arg0: i32) -> (i32, i32) {
    %c0_i32 = arith.constant 0 : i32
    %c0_i32_0 = arith.constant 0 : i32
    %c0_i32_1 = arith.constant 0 : i32
    return %c0_i32, %c0_i32_0 : i32, i32
  }
  func.func @transform_3(%arg0: i32) -> (i32, i32) {
    %c0_i32 = arith.constant 0 : i32
    %c0_i32_0 = arith.constant 0 : i32
    %c0_i32_1 = arith.constant 0 : i32
    return %c0_i32, %c0_i32_0 : i32, i32
  }
  func.func @transform_4(%arg0: i32) -> (i32, i32) {
    %c0_i32 = arith.constant 0 : i32
    %c0_i32_0 = arith.constant 0 : i32
    %c0_i32_1 = arith.constant 0 : i32
    return %c0_i32, %c0_i32_0 : i32, i32
  }
  func.func @transform_5(%arg0: i32) -> (i32, i32) {
    %c0_i32 = arith.constant 0 : i32
    %c0_i32_0 = arith.constant 0 : i32
    %c0_i32_1 = arith.constant 0 : i32
    return %c0_i32, %c0_i32_0 : i32, i32
  }
  func.func @transform_6(%arg0: i32) -> (i32, i32) {
    %c0_i32 = arith.constant 0 : i32
    %c0_i32_0 = arith.constant 0 : i32
    %c0_i32_1 = arith.constant 0 : i32
    return %c0_i32, %c0_i32_0 : i32, i32
  }
  func.func @transform_7(%arg0: i32) -> (i32, i32) {
    %c0_i32 = arith.constant 0 : i32
    %c0_i32_0 = arith.constant 0 : i32
    %c0_i32_1 = arith.constant 0 : i32
    return %c0_i32, %c0_i32_0 : i32, i32
  }
  func.func @transform_8(%arg0: i32) -> (i32, i32) {
    %c0_i32 = arith.constant 0 : i32
    %c0_i32_0 = arith.constant 0 : i32
    %c0_i32_1 = arith.constant 0 : i32
    return %c0_i32, %c0_i32_0 : i32, i32
  }
  func.func @transform_9(%arg0: i32) -> (i32, i32) {
    %c0_i32 = arith.constant 0 : i32
    %c0_i32_0 = arith.constant 0 : i32
    return %c0_i32, %arg0 : i32, i32
  }
}

module attributes {stable_mosaic.version = 11 : i64} {
  func.func @mlp_kernel(%arg0: i32, %arg1: memref<8x16xf32, #tpu.memory_space<vmem>>, %arg2: memref<16x1024xbf16, #tpu.memory_space<vmem>>, %arg3: memref<1x1024xbf16, #tpu.memory_space<vmem>>, %arg4: memref<1024x512xbf16, #tpu.memory_space<vmem>>, %arg5: memref<1x512xbf16, #tpu.memory_space<vmem>>, %arg6: memref<512x256xbf16, #tpu.memory_space<vmem>>, %arg7: memref<1x256xbf16, #tpu.memory_space<vmem>>, %arg8: memref<256x4xbf16, #tpu.memory_space<vmem>>, %arg9: memref<1x4xf32, #tpu.memory_space<vmem>>, %arg10: memref<4x8xf32, #tpu.memory_space<vmem>>) attributes {dimension_semantics = [#tpu.dimension_semantics<arbitrary>], iteration_bounds = array<i64: 1>, scalar_prefetch = 0 : i64, scratch_operands = 0 : i64, tpu.core_type = #tpu.core_type<tc>, window_params = [{transform_indices = @transform_0, window_bounds = array<i64: 8, 16>}, {pipeline_mode = #tpu.pipeline_mode<synchronous>, transform_indices = @transform_1, window_bounds = array<i64: 16, 1024>}, {pipeline_mode = #tpu.pipeline_mode<synchronous>, transform_indices = @transform_2, window_bounds = array<i64: 1, 1024>}, {pipeline_mode = #tpu.pipeline_mode<synchronous>, transform_indices = @transform_3, window_bounds = array<i64: 1024, 512>}, {pipeline_mode = #tpu.pipeline_mode<synchronous>, transform_indices = @transform_4, window_bounds = array<i64: 1, 512>}, {pipeline_mode = #tpu.pipeline_mode<synchronous>, transform_indices = @transform_5, window_bounds = array<i64: 512, 256>}, {pipeline_mode = #tpu.pipeline_mode<synchronous>, transform_indices = @transform_6, window_bounds = array<i64: 1, 256>}, {pipeline_mode = #tpu.pipeline_mode<synchronous>, transform_indices = @transform_7, window_bounds = array<i64: 256, 4>}, {pipeline_mode = #tpu.pipeline_mode<synchronous>, transform_indices = @transform_8, window_bounds = array<i64: 1, 4>}, {transform_indices = @transform_9, window_bounds = array<i64: 4, 8>}]} {
    %c0 = arith.constant 0 : index
    %c0_0 = arith.constant 0 : index
    %0 = vector.load %arg1[%c0, %c0_0] : memref<8x16xf32, #tpu.memory_space<vmem>>, vector<8x16xf32>
    %1 = arith.truncf %0 : vector<8x16xf32> to vector<8x16xbf16>
    %c0_1 = arith.constant 0 : index
    %c0_2 = arith.constant 0 : index
    %2 = vector.load %arg2[%c0_1, %c0_2] : memref<16x1024xbf16, #tpu.memory_space<vmem>>, vector<16x1024xbf16>
    %cst = arith.constant dense<0.000000e+00> : vector<8x1024xf32>
    %3 = tpu.matmul %1, %2, %cst {dimension_numbers = #tpu.dot_dimension_numbers<[1], [0], [0], [1], [0, 0, 1, 1], [], []>} : vector<8x16xbf16>, vector<16x1024xbf16>, vector<8x1024xf32> -> vector<8x1024xf32>
    %4 = arith.truncf %3 : vector<8x1024xf32> to vector<8x1024xbf16>
    %c0_3 = arith.constant 0 : index
    %c0_4 = arith.constant 0 : index
    %5 = vector.load %arg3[%c0_3, %c0_4] : memref<1x1024xbf16, #tpu.memory_space<vmem>>, vector<1x1024xbf16>
    %6 = vector.broadcast %5 : vector<1x1024xbf16> to vector<8x1024xbf16>
    %7 = arith.addf %4, %6 : vector<8x1024xbf16>
    %cst_5 = arith.constant 0.000000e+00 : bf16
    %8 = vector.broadcast %cst_5 : bf16 to vector<8x1024xbf16>
    %9 = arith.maximumf %7, %8 : vector<8x1024xbf16>
    %c0_6 = arith.constant 0 : index
    %c0_7 = arith.constant 0 : index
    %10 = vector.load %arg4[%c0_6, %c0_7] : memref<1024x512xbf16, #tpu.memory_space<vmem>>, vector<1024x512xbf16>
    %cst_8 = arith.constant dense<0.000000e+00> : vector<8x512xf32>
    %11 = tpu.matmul %9, %10, %cst_8 {dimension_numbers = #tpu.dot_dimension_numbers<[1], [0], [0], [1], [0, 0, 1, 1], [], []>} : vector<8x1024xbf16>, vector<1024x512xbf16>, vector<8x512xf32> -> vector<8x512xf32>
    %12 = arith.truncf %11 : vector<8x512xf32> to vector<8x512xbf16>
    %c0_9 = arith.constant 0 : index
    %c0_10 = arith.constant 0 : index
    %13 = vector.load %arg5[%c0_9, %c0_10] : memref<1x512xbf16, #tpu.memory_space<vmem>>, vector<1x512xbf16>
    %14 = vector.broadcast %13 : vector<1x512xbf16> to vector<8x512xbf16>
    %15 = arith.addf %12, %14 : vector<8x512xbf16>
    %cst_11 = arith.constant 0.000000e+00 : bf16
    %16 = vector.broadcast %cst_11 : bf16 to vector<8x512xbf16>
    %17 = arith.maximumf %15, %16 : vector<8x512xbf16>
    %c0_12 = arith.constant 0 : index
    %c0_13 = arith.constant 0 : index
    %18 = vector.load %arg6[%c0_12, %c0_13] : memref<512x256xbf16, #tpu.memory_space<vmem>>, vector<512x256xbf16>
    %cst_14 = arith.constant dense<0.000000e+00> : vector<8x256xf32>
    %19 = tpu.matmul %17, %18, %cst_14 {dimension_numbers = #tpu.dot_dimension_numbers<[1], [0], [0], [1], [0, 0, 1, 1], [], []>} : vector<8x512xbf16>, vector<512x256xbf16>, vector<8x256xf32> -> vector<8x256xf32>
    %20 = arith.truncf %19 : vector<8x256xf32> to vector<8x256xbf16>
    %c0_15 = arith.constant 0 : index
    %c0_16 = arith.constant 0 : index
    %21 = vector.load %arg7[%c0_15, %c0_16] : memref<1x256xbf16, #tpu.memory_space<vmem>>, vector<1x256xbf16>
    %22 = vector.broadcast %21 : vector<1x256xbf16> to vector<8x256xbf16>
    %23 = arith.addf %20, %22 : vector<8x256xbf16>
    %cst_17 = arith.constant 0.000000e+00 : bf16
    %24 = vector.broadcast %cst_17 : bf16 to vector<8x256xbf16>
    %25 = arith.maximumf %23, %24 : vector<8x256xbf16>
    %c0_18 = arith.constant 0 : index
    %c0_19 = arith.constant 0 : index
    %26 = vector.load %arg8[%c0_18, %c0_19] : memref<256x4xbf16, #tpu.memory_space<vmem>>, vector<256x4xbf16>
    %cst_20 = arith.constant dense<0.000000e+00> : vector<8x4xf32>
    %27 = tpu.matmul %25, %26, %cst_20 {dimension_numbers = #tpu.dot_dimension_numbers<[1], [0], [0], [1], [0, 0, 1, 1], [], []>} : vector<8x256xbf16>, vector<256x4xbf16>, vector<8x4xf32> -> vector<8x4xf32>
    %c0_21 = arith.constant 0 : index
    %c0_22 = arith.constant 0 : index
    %28 = vector.load %arg9[%c0_21, %c0_22] : memref<1x4xf32, #tpu.memory_space<vmem>>, vector<1x4xf32>
    %29 = vector.broadcast %28 : vector<1x4xf32> to vector<8x4xf32>
    %30 = arith.addf %27, %29 : vector<8x4xf32>
    %31 = tpu.transpose %30, [1, 0] : vector<8x4xf32> -> vector<4x8xf32>
    %cst_23 = arith.constant dense<0xFF800000> : vector<8xf32>
    %32 = vector.multi_reduction <maximumf>, %31, %cst_23 [0] : vector<4x8xf32> to vector<8xf32>
    %33 = vector.shape_cast %32 : vector<8xf32> to vector<1x8xf32>
    %34 = vector.broadcast %33 : vector<1x8xf32> to vector<4x8xf32>
    %35 = arith.subf %31, %34 : vector<4x8xf32>
    %36 = math.exp %35 : vector<4x8xf32>
    %cst_24 = arith.constant dense<0.000000e+00> : vector<8xf32>
    %37 = vector.multi_reduction <add>, %36, %cst_24 [0] : vector<4x8xf32> to vector<8xf32>
    %38 = vector.shape_cast %37 : vector<8xf32> to vector<1x8xf32>
    %39 = vector.broadcast %38 : vector<1x8xf32> to vector<4x8xf32>
    %40 = arith.divf %36, %39 : vector<4x8xf32>
    %c0_25 = arith.constant 0 : index
    %c0_26 = arith.constant 0 : index
    %41 = vector.load %arg10[%c0_25, %c0_26] : memref<4x8xf32, #tpu.memory_space<vmem>>, vector<4x8xf32>
    tpu.vector_store %arg10[%c0_25, %c0_26], %40 {strides = array<i32>} : memref<4x8xf32, #tpu.memory_space<vmem>>, vector<4x8xf32>,
    return
  }
  func.func @transform_0(%arg0: i32) -> (i32, i32) {
    %c0_i32 = arith.constant 0 : i32
    %c0_i32_0 = arith.constant 0 : i32
    return %arg0, %c0_i32 : i32, i32
  }
  func.func @transform_1(%arg0: i32) -> (i32, i32) {
    %c0_i32 = arith.constant 0 : i32
    %c0_i32_0 = arith.constant 0 : i32
    %c0_i32_1 = arith.constant 0 : i32
    return %c0_i32, %c0_i32_0 : i32, i32
  }
  func.func @transform_2(%arg0: i32) -> (i32, i32) {
    %c0_i32 = arith.constant 0 : i32
    %c0_i32_0 = arith.constant 0 : i32
    %c0_i32_1 = arith.constant 0 : i32
    return %c0_i32, %c0_i32_0 : i32, i32
  }
  func.func @transform_3(%arg0: i32) -> (i32, i32) {
    %c0_i32 = arith.constant 0 : i32
    %c0_i32_0 = arith.constant 0 : i32
    %c0_i32_1 = arith.constant 0 : i32
    return %c0_i32, %c0_i32_0 : i32, i32
  }
  func.func @transform_4(%arg0: i32) -> (i32, i32) {
    %c0_i32 = arith.constant 0 : i32
    %c0_i32_0 = arith.constant 0 : i32
    %c0_i32_1 = arith.constant 0 : i32
    return %c0_i32, %c0_i32_0 : i32, i32
  }
  func.func @transform_5(%arg0: i32) -> (i32, i32) {
    %c0_i32 = arith.constant 0 : i32
    %c0_i32_0 = arith.constant 0 : i32
    %c0_i32_1 = arith.constant 0 : i32
    return %c0_i32, %c0_i32_0 : i32, i32
  }
  func.func @transform_6(%arg0: i32) -> (i32, i32) {
    %c0_i32 = arith.constant 0 : i32
    %c0_i32_0 = arith.constant 0 : i32
    %c0_i32_1 = arith.constant 0 : i32
    return %c0_i32, %c0_i32_0 : i32, i32
  }
  func.func @transform_7(%arg0: i32) -> (i32, i32) {
    %c0_i32 = arith.constant 0 : i32
    %c0_i32_0 = arith.constant 0 : i32
    %c0_i32_1 = arith.constant 0 : i32
    return %c0_i32, %c0_i32_0 : i32, i32
  }
  func.func @transform_8(%arg0: i32) -> (i32, i32) {
    %c0_i32 = arith.constant 0 : i32
    %c0_i32_0 = arith.constant 0 : i32
    %c0_i32_1 = arith.constant 0 : i32
    return %c0_i32, %c0_i32_0 : i32, i32
  }
  func.func @transform_9(%arg0: i32) -> (i32, i32) {
    %c0_i32 = arith.constant 0 : i32
    %c0_i32_0 = arith.constant 0 : i32
    return %c0_i32, %arg0 : i32, i32
  }
}

</mosaic_0001>

<bundles_post_ra>
// kernel: tpu_custom_call.1
= control target key start
LH: loop header
LB: loop body
LE: loop exit
PB: predicated region body
PF: predicated region fallthrough
CT: control target
= control target key end

     0   :  { %14 = vsyncpa [#allocation3], 0  ;;  %s5187_s0 = inlined_call_operand.vmem [shape: f32[8,16], index: 0, kind: input, shape index: {}]   ;;  %s5188_s1 = inlined_call_operand.vmem [shape: bf16[16,1024], index: 1, kind: input, shape index: {}]   ;;  %s5189_s2 = inlined_call_operand.vmem [shape: bf16[1,1024], index: 2, kind: input, shape index: {}]   ;;  %s5190_s3 = inlined_call_operand.hbm [shape: bf16[1024,512], index: 3, kind: input, shape index: {}]   ;;  %s5191_s4 = inlined_call_operand.vmem [shape: bf16[1,512], index: 4, kind: input, shape index: {}]   ;;  %s5192_s5 = inlined_call_operand.hbm [shape: bf16[512,256], index: 5, kind: input, shape index: {}]   ;;  %s5193_s6 = inlined_call_operand.vmem [shape: bf16[1,256], index: 6, kind: input, shape index: {}]   ;;  %s5194_s7 = inlined_call_operand.vmem [shape: bf16[256,4], index: 7, kind: input, shape index: {}]   ;;  %s5195_s8 = inlined_call_operand.vmem [shape: f32[1,4], index: 8, kind: input, shape index: {}]   ;;  %s5196_s9 = inlined_call_operand.hbm [shape: f32[4,8], index: 9, kind: output, shape index: {}]  }
   0x1   :  { %15 = vsyncpa [#allocation6], 0 }
   0x2   :  { %16 = vsyncpa [#allocation4], 0  ;;  %s27_s11 = sshll.u32 %s5190_s3, 4  ;;  %s4888_s12 = smov [#allocation2]   ;;  %s28_s11 = int_to_ptr.hbm [resolvable:$true] %s27_s11 }
   0x3   :  { %s29_s13 = sshll.u32 %s4888_s12, 4  ;;  %s42_s16 = sshll.u32 %s5192_s5, 4  ;;  %s30_s13 = int_to_ptr.vmem [resolvable:$true] %s29_s13  ;;  %s43_s16 = int_to_ptr.hbm [resolvable:$true] %s42_s16 }
   0x4   :  { %s4889_s17 = smov 256   ;;  %s4890_s18 = smov 16  }
   0x5   :  { %35 = dma.hbm_to_vmem [thread:$0]  %s28_s11, 32768, %s30_s13, [#allocation3], %s4889_s17, %s4889_s17, %s4890_s18  }
   0x6   :  { %s4891_s19 = smov [#allocation5]   ;;  %s4892_s21 = smov 128  }
   0x7   :  { %s44_s20 = sshll.u32 %s4891_s19, 4  ;;  %s4893_s22 = smov 8   ;;  %s45_s20 = int_to_ptr.vmem [resolvable:$true] %s44_s20 }
   0x8   :  { %50 = dma.hbm_to_vmem [thread:$0]  %s43_s16, 8192, %s45_s20, [#allocation6], %s4892_s21, %s4892_s21, %s4893_s22  }
   0x9   :  { %4882 = dma.done.wait [#allocation3], 32768  }
   0xa   :  { %4883 = vsyncadd [#allocation3], 4294934528 }
   0xb   :  { %4884 = dma.done.wait [#allocation6], 8192  }
   0xc   :  { %4885 = vsyncadd [#allocation6], 4294959104  ;;  %v3071_v0 = vld [vmem:[%s5188_s1] sm:$0xf]  ;;  %v4453_v2 = vld [vmem:[%s5188_s1 + $0x4] sm:$0xf] }
   0xd   :  { %v4457_v1 = vld [vmem:[%s5188_s1 + $0x1c] sm:$0xf0]  ;;  %v3073_v4 = vld [vmem:[%s5188_s1 + $0x20] sm:$0xf0]  ;;  %vm116_vm0 = vcmask 130048   ;;  %vm3017_vm1 = vcmask 60416  }
   0xe   :  { %v3072_v3 = vor.u32 %v4457_v1, %v3071_v0  ;;  %v66_v5 = vld [vmem:[%s5187_s0] sm:$0xff]  ;;  %v3079_v6 = vld [vmem:[%s5188_s1 + $0x8] sm:$0xf]  ;;  %v3076_v7 = vor.u32 %v4453_v2, %v3073_v4  ;;  %v4454_v10 = vld [vmem:[%s5188_s1 + $0xc] sm:$0xf]  ;;  %s3058_s20 = sshll.u32 %s5196_s9, 4  ;;  %s3059_s20 = int_to_ptr.hbm [resolvable:$true] %s3058_s20 }
   0xf   :  { %v4969_v8 = vpack.c.bf16 %v66_v5, %v66_v5  ;;  %v4458_v9 = vld [vmem:[%s5188_s1 + $0x24] sm:$0xf0]  ;;  %v3081_v11 = vld [vmem:[%s5188_s1 + $0x28] sm:$0xf0]  ;;  %v3087_v14 = vld [vmem:[%s5188_s1 + $0x10] sm:$0xf] }
  0x10   :  { %127 = vmatpush.bf16.msra.mxu2 %v3072_v3  ;;  %v3080_v12 = vor.u32 %v4458_v9, %v3079_v6  ;;  %v3084_v13 = vor.u32 %v4454_v10, %v3081_v11  ;;  %v4459_v15 = vld [vmem:[%s5188_s1 + $0x2c] sm:$0xf0]  ;;  %v4455_v16 = vld [vmem:[%s5188_s1 + $0x14] sm:$0xf]  ;;  %140 = vmatpush.bf16.msra.mxu3 %v3076_v7  ;;  %v3095_v19 = vld [vmem:[%s5188_s1 + $0x18] sm:$0xf] }
  0x11   :  { %v3088_v17 = vor.u32 %v4459_v15, %v3087_v14  ;;  %v3089_v18 = vld [vmem:[%s5188_s1 + $0x30] sm:$0xf0]  ;;  %v4460_v20 = vld [vmem:[%s5188_s1 + $0x34] sm:$0xf0]  ;;  %v4456_v23 = vld [vmem:[%s5188_s1 + $0x1c] sm:$0xf] }
  0x12   :  { %v3092_v21 = vor.u32 %v4455_v16, %v3089_v18  ;;  %v3096_v22 = vor.u32 %v4460_v20, %v3095_v19  ;;  %v3097_v24 = vld [vmem:[%s5188_s1 + $0x38] sm:$0xf0]  ;;  %v3223_v26 = vld [vmem:[#allocation2 + $0xe0] sm:$0xf]  ;;  %v4491_v27 = vld [vmem:[#allocation2 + $0xec] sm:$0xf0] }
  0x13   :  { %3101 = vmatmul.msk.bf16.vlgmr.msra.gmra.mxu2 %vm116_vm0, %v4969_v8  ;;  %179 = vmatpush.bf16.msra.mxu0 %v3088_v17  ;;  %v3100_v25 = vor.u32 %v4456_v23, %v3097_v24  ;;  %v3351_v28 = vld [vmem:[#allocation2 + $0x1e0] sm:$0xf]  ;;  %v3224_v29 = vor.u32 %v4491_v27, %v3223_v26  ;;  %v4523_v30 = vld [vmem:[#allocation2 + $0x1ec] sm:$0xf0] }
  0x14   :  { %153 = vmatpush.bf16.msrb.mxu2 %v3080_v12  ;;  %166 = vmatpush.bf16.msrb.mxu3 %v3084_v13  ;;  %v3207_v31 = vld [vmem:[#allocation2 + $0xc0] sm:$0xf]  ;;  %v4487_v32 = vld [vmem:[#allocation2 + $0xcc] sm:$0xf0]  ;;  %v3352_v33 = vor.u32 %v4523_v30, %v3351_v28 }
  0x15   :  { %3102 = vmatmul.msk.bf16.vlgmr.msra.gmra.mxu3 %vm116_vm0, %v4969_v8  ;;  %192 = vmatpush.bf16.msra.mxu1 %v3092_v21  ;;  %v3335_v34 = vld [vmem:[#allocation2 + $0x1c0] sm:$0xf]  ;;  %v4519_v35 = vld [vmem:[#allocation2 + $0x1cc] sm:$0xf0]  ;;  %v3208_v36 = vor.u32 %v4487_v32, %v3207_v31 }
  0x16   :  { %3105 = vmatmul.msk.bf16.vlgmr.msra.gmra.mxu0 %vm116_vm0, %v4969_v8  ;;  %v3336_v37 = vor.u32 %v4519_v35, %v3335_v34  ;;  %v3191_v38 = vld [vmem:[#allocation2 + $0xa0] sm:$0xf]  ;;  %v4483_v39 = vld [vmem:[#allocation2 + $0xac] sm:$0xf0] }
  0x17   :  { %1851 = vmatpush.bf16.msrb.mxu0 %v3224_v29  ;;  %v3319_v40 = vld [vmem:[#allocation2 + $0x1a0] sm:$0xf]  ;;  %v4515_v41 = vld [vmem:[#allocation2 + $0x1ac] sm:$0xf0]  ;;  %v3192_v42 = vor.u32 %v4483_v39, %v3191_v38 }
  0x18   :  { %205 = vmatpush.bf16.msra.mxu2 %v3096_v22  ;;  %218 = vmatpush.bf16.msra.mxu3 %v3100_v25  ;;  %v3320_v43 = vor.u32 %v4515_v41, %v3319_v40  ;;  %v3175_v44 = vld [vmem:[#allocation2 + $0x80] sm:$0xf]  ;;  %v4479_v45 = vld [vmem:[#allocation2 + $0x8c] sm:$0xf0] }
  0x19   :  { %3106 = vmatmul.msk.bf16.vlgmr.msra.gmra.mxu1 %vm116_vm0, %v4969_v8  ;;  %v3303_v46 = vld [vmem:[#allocation2 + $0x180] sm:$0xf]  ;;  %v4511_v47 = vld [vmem:[#allocation2 + $0x18c] sm:$0xf0]  ;;  %v3176_v52 = vor.u32 %v4479_v45, %v3175_v44 }
  0x1a   :  { %1864 = vmatpush.bf16.msrb.mxu1 %v3352_v33  ;;  %v3479_v48 = vld [vmem:[#allocation2 + $0x2e0] sm:$0xf]  ;;  %v4555_v49 = vld [vmem:[#allocation2 + $0x2ec] sm:$0xf0]  ;;  %v3304_v53 = vor.u32 %v4511_v47, %v3303_v46 }
  0x1b   :  { %1852 = vmatpush.bf16.msrb.mxu0 %v3208_v36  ;;  %v3607_v50 = vld [vmem:[#allocation2 + $0x3e0] sm:$0xf]  ;;  %v4587_v51 = vld [vmem:[#allocation2 + $0x3ec] sm:$0xf0]  ;;  %v3480_v58 = vor.u32 %v4555_v49, %v3479_v48 }
  0x1c   :  { %v3159_v54 = vld [vmem:[#allocation2 + $0x60] sm:$0xf]  ;;  %v4475_v55 = vld [vmem:[#allocation2 + $0x6c] sm:$0xf0]  ;;  %v3608_v59 = vor.u32 %v4587_v51, %v3607_v50 }
  0x1d   :  { %v3287_v56 = vld [vmem:[#allocation2 + $0x160] sm:$0xf]  ;;  %v4507_v57 = vld [vmem:[#allocation2 + $0x16c] sm:$0xf0]  ;;  %v3160_v0 = vor.u32 %v4475_v55, %v3159_v54 }
  0x1e   :  { %1865 = vmatpush.bf16.msrb.mxu1 %v3336_v37  ;;  %v3463_v60 = vld [vmem:[#allocation2 + $0x2c0] sm:$0xf]  ;;  %v4551_v61 = vld [vmem:[#allocation2 + $0x2cc] sm:$0xf0]  ;;  %v3288_v1 = vor.u32 %v4507_v57, %v3287_v56 }
  0x1f   :  { %1853 = vmatpush.bf16.msrb.mxu0 %v3192_v42  ;;  %v3591_v62 = vld [vmem:[#allocation2 + $0x3c0] sm:$0xf]  ;;  %v4583_v63 = vld [vmem:[#allocation2 + $0x3cc] sm:$0xf0]  ;;  %v3464_v6 = vor.u32 %v4551_v61, %v3463_v60 }
  0x20   :  { %v3143_v2 = vld [vmem:[#allocation2 + $0x40] sm:$0xf]  ;;  %v4471_v3 = vld [vmem:[#allocation2 + $0x4c] sm:$0xf0]  ;;  %v3592_v7 = vor.u32 %v4583_v63, %v3591_v62 }
  0x21   :  { %v3271_v4 = vld [vmem:[#allocation2 + $0x140] sm:$0xf]  ;;  %v4503_v5 = vld [vmem:[#allocation2 + $0x14c] sm:$0xf0]  ;;  %v3144_v13 = vor.u32 %v4471_v3, %v3143_v2 }
  0x22   :  { %1866 = vmatpush.bf16.msrb.mxu1 %v3320_v43  ;;  %v3447_v9 = vld [vmem:[#allocation2 + $0x2a0] sm:$0xf]  ;;  %v4547_v10 = vld [vmem:[#allocation2 + $0x2ac] sm:$0xf0]  ;;  %v3272_v14 = vor.u32 %v4503_v5, %v3271_v4 }
  0x23   :  { %3103 = vmatmul.msk.bf16.vlgmr.msrb.gmra.mxu2 %vm116_vm0, %v4969_v8  ;;  %1854 = vmatpush.bf16.msrb.mxu0 %v3176_v52  ;;  %v3575_v11 = vld [vmem:[#allocation2 + $0x3a0] sm:$0xf]  ;;  %v4579_v12 = vld [vmem:[#allocation2 + $0x3ac] sm:$0xf0]  ;;  %v3448_v19 = vor.u32 %v4547_v10, %v3447_v9 }
  0x24   :  { %1877 = vmatpush.bf16.msrb.mxu2 %v3480_v58  ;;  %v3127_v15 = vld [vmem:[#allocation2 + $0x20] sm:$0xf]  ;;  %v4467_v16 = vld [vmem:[#allocation2 + $0x2c] sm:$0xf0]  ;;  %v3576_v20 = vor.u32 %v4579_v12, %v3575_v11 }
  0x25   :  { %3104 = vmatmul.msk.bf16.vlgmr.msrb.gmra.mxu3 %vm116_vm0, %v4969_v8  ;;  %v3255_v17 = vld [vmem:[#allocation2 + $0x120] sm:$0xf]  ;;  %v4499_v18 = vld [vmem:[#allocation2 + $0x12c] sm:$0xf0]  ;;  %v3128_v25 = vor.u32 %v4467_v16, %v3127_v15 }
  0x26   :  { %1867 = vmatpush.bf16.msrb.mxu1 %v3304_v53  ;;  %1890 = vmatpush.bf16.msrb.mxu3 %v3608_v59  ;;  %v3431_v21 = vld [vmem:[#allocation2 + $0x280] sm:$0xf]  ;;  %v4543_v22 = vld [vmem:[#allocation2 + $0x28c] sm:$0xf0]  ;;  %v3256_v26 = vor.u32 %v4499_v18, %v3255_v17 }
  0x27   :  { %1855 = vmatpush.bf16.msrb.mxu0 %v3160_v0  ;;  %v3559_v23 = vld [vmem:[#allocation2 + $0x380] sm:$0xf]  ;;  %v4575_v24 = vld [vmem:[#allocation2 + $0x38c] sm:$0xf0]  ;;  %v3432_v31 = vor.u32 %v4543_v22, %v3431_v21 }
  0x28   :  { %1878 = vmatpush.bf16.msrb.mxu2 %v3464_v6  ;;  %v3111_v27 = vld [vmem:[#allocation2] sm:$0xf]  ;;  %v4463_v28 = vld [vmem:[#allocation2 + $0xc] sm:$0xf0]  ;;  %v3560_v32 = vor.u32 %v4575_v24, %v3559_v23 }
  0x29   :  { %v3239_v29 = vld [vmem:[#allocation2 + $0x100] sm:$0xf]  ;;  %v4495_v30 = vld [vmem:[#allocation2 + $0x10c] sm:$0xf0]  ;;  %v3112_v38 = vor.u32 %v4463_v28, %v3111_v27 }
  0x2a   :  { %1868 = vmatpush.bf16.msrb.mxu1 %v3288_v1  ;;  %1891 = vmatpush.bf16.msrb.mxu3 %v3592_v7  ;;  %v3735_v33 = vld [vmem:[#allocation2 + $0x4e0] sm:$0xf]  ;;  %v4619_v34 = vld [vmem:[#allocation2 + $0x4ec] sm:$0xf0]  ;;  %v3240_v42 = vor.u32 %v4495_v30, %v3239_v29 }
  0x2b   :  { %1856 = vmatpush.bf16.msrb.mxu0 %v3144_v13  ;;  %v3863_v35 = vld [vmem:[#allocation2 + $0x5e0] sm:$0xf]  ;;  %v4651_v36 = vld [vmem:[#allocation2 + $0x5ec] sm:$0xf0]  ;;  %v3736_v43 = vor.u32 %v4619_v34, %v3735_v33 }
  0x2c   :  { %1879 = vmatpush.bf16.msrb.mxu2 %v3448_v19  ;;  %v3415_v37 = vld [vmem:[#allocation2 + $0x260] sm:$0xf]  ;;  %v4539_v39 = vld [vmem:[#allocation2 + $0x26c] sm:$0xf0]  ;;  %v3864_v44 = vor.u32 %v4651_v36, %v3863_v35 }
  0x2d   :  { %v3543_v40 = vld [vmem:[#allocation2 + $0x360] sm:$0xf]  ;;  %v4571_v41 = vld [vmem:[#allocation2 + $0x36c] sm:$0xf0]  ;;  %v3416_v47 = vor.u32 %v4539_v39, %v3415_v37 }
  0x2e   :  { %1869 = vmatpush.bf16.msrb.mxu1 %v3272_v14  ;;  %1892 = vmatpush.bf16.msrb.mxu3 %v3576_v20  ;;  %v3719_v45 = vld [vmem:[#allocation2 + $0x4c0] sm:$0xf]  ;;  %v4615_v46 = vld [vmem:[#allocation2 + $0x4cc] sm:$0xf0]  ;;  %v3544_v48 = vor.u32 %v4571_v41, %v3543_v40 }
  0x2f   :  { %1857 = vmatpush.bf16.msrb.mxu0 %v3128_v25  ;;  %v3847_v49 = vld [vmem:[#allocation2 + $0x5c0] sm:$0xf]  ;;  %v4647_v50 = vld [vmem:[#allocation2 + $0x5cc] sm:$0xf0]  ;;  %v3720_v55 = vor.u32 %v4615_v46, %v3719_v45 }
  0x30   :  { %1880 = vmatpush.bf16.msrb.mxu2 %v3432_v31  ;;  %v3399_v51 = vld [vmem:[#allocation2 + $0x240] sm:$0xf]  ;;  %v4535_v52 = vld [vmem:[#allocation2 + $0x24c] sm:$0xf0]  ;;  %v3848_v56 = vor.u32 %v4647_v50, %v3847_v49  ;;  %v228_v31 = vld [vmem:[%s5189_s2] sm:$0xff] }
  0x31   :  { %v3527_v53 = vld [vmem:[#allocation2 + $0x340] sm:$0xf]  ;;  %v4567_v54 = vld [vmem:[#allocation2 + $0x34c] sm:$0xf0]  ;;  %v3400_v59 = vor.u32 %v4535_v52, %v3399_v51  ;;  %230 = vst [vmem:[#allocation1] ss:$9 sm:$0xff] %v228_v31 }
  0x32   :  { %1870 = vmatpush.bf16.msrb.mxu1 %v3256_v26  ;;  %1893 = vmatpush.bf16.msrb.mxu3 %v3560_v32  ;;  %v3703_v57 = vld [vmem:[#allocation2 + $0x4a0] sm:$0xf]  ;;  %v4611_v58 = vld [vmem:[#allocation2 + $0x4ac] sm:$0xf0]  ;;  %v3528_v60 = vor.u32 %v4567_v54, %v3527_v53 }
  0x33   :  { %3107 = vmatmul.msk.bf16.vlgmr.msra.gmra.mxu2 %vm116_vm0, %v4969_v8  ;;  %1858 = vmatpush.bf16.msrb.mxu0 %v3112_v38  ;;  %v3831_v61 = vld [vmem:[#allocation2 + $0x5a0] sm:$0xf]  ;;  %v4643_v62 = vld [vmem:[#allocation2 + $0x5ac] sm:$0xf0] }
  0x34   :  { %1881 = vmatpush.bf16.msrb.mxu2 %v3416_v47  ;;  %v3383_v63 = vld [vmem:[#allocation2 + $0x220] sm:$0xf]  ;;  %v4531_v0 = vld [vmem:[#allocation2 + $0x22c] sm:$0xf0]  ;;  %v3832_v3 = vor.u32 %v4643_v62, %v3831_v61 }
  0x35   :  { %3108 = vmatmul.msk.bf16.vlgmr.msra.gmra.mxu3 %vm116_vm0, %v4969_v8  ;;  %v3511_v1 = vld [vmem:[#allocation2 + $0x320] sm:$0xf]  ;;  %v4563_v2 = vld [vmem:[#allocation2 + $0x32c] sm:$0xf0]  ;;  %v3704_v8 = vor.u32 %v4611_v58, %v3703_v57  ;;  %v3384_v7 = vor.u32 %v4531_v0, %v3383_v63 }
  0x36   :  { %1871 = vmatpush.bf16.msrb.mxu1 %v3240_v42  ;;  %1894 = vmatpush.bf16.msrb.mxu3 %v3544_v48  ;;  %v3687_v4 = vld [vmem:[#allocation2 + $0x480] sm:$0xf]  ;;  %v4607_v5 = vld [vmem:[#allocation2 + $0x48c] sm:$0xf0]  ;;  %v3512_v9 = vor.u32 %v4563_v2, %v3511_v1 }
  0x37   :  { %1903 = vmatpush.bf16.msra.mxu0 %v3736_v43  ;;  %v3815_v6 = vld [vmem:[#allocation2 + $0x580] sm:$0xf]  ;;  %v4639_v10 = vld [vmem:[#allocation2 + $0x58c] sm:$0xf0]  ;;  %v3688_v19 = vor.u32 %v4607_v5, %v3687_v4 }
  0x38   :  { %1882 = vmatpush.bf16.msrb.mxu2 %v3400_v59  ;;  %v3367_v11 = vld [vmem:[#allocation2 + $0x200] sm:$0xf]  ;;  %v4527_v12 = vld [vmem:[#allocation2 + $0x20c] sm:$0xf0]  ;;  %v3816_v20 = vor.u32 %v4639_v10, %v3815_v6 }
  0x39   :  { %v3495_v13 = vld [vmem:[#allocation2 + $0x300] sm:$0xf]  ;;  %v4559_v14 = vld [vmem:[#allocation2 + $0x30c] sm:$0xf0]  ;;  %v3368_v22 = vor.u32 %v4527_v12, %v3367_v11 }
  0x3a   :  { %1916 = vmatpush.bf16.msra.mxu1 %v3864_v44  ;;  %1895 = vmatpush.bf16.msrb.mxu3 %v3528_v60  ;;  %v3991_v15 = vld [vmem:[#allocation2 + $0x6e0] sm:$0xf]  ;;  %v4683_v16 = vld [vmem:[#allocation2 + $0x6ec] sm:$0xf0]  ;;  %v3496_v23 = vor.u32 %v4559_v14, %v3495_v13 }
  0x3b   :  { %1904 = vmatpush.bf16.msra.mxu0 %v3720_v55  ;;  %v4119_v17 = vld [vmem:[#allocation2 + $0x7e0] sm:$0xf]  ;;  %v4715_v18 = vld [vmem:[#allocation2 + $0x7ec] sm:$0xf0]  ;;  %v3992_v27 = vor.u32 %v4683_v16, %v3991_v15 }
  0x3c   :  { %v3671_v21 = vld [vmem:[#allocation2 + $0x460] sm:$0xf]  ;;  %1883 = vmatpush.bf16.msrb.mxu2 %v3384_v7  ;;  %v4603_v24 = vld [vmem:[#allocation2 + $0x46c] sm:$0xf0]  ;;  %v4120_v28 = vor.u32 %v4715_v18, %v4119_v17 }
  0x3d   :  { %v3799_v25 = vld [vmem:[#allocation2 + $0x560] sm:$0xf]  ;;  %v4635_v26 = vld [vmem:[#allocation2 + $0x56c] sm:$0xf0]  ;;  %v3672_v29 = vor.u32 %v4603_v24, %v3671_v21  ;;  %v231_v21 = vld [vmem:[#allocation1] sm:$0xff] }
  0x3e   :  { %1917 = vmatpush.bf16.msra.mxu1 %v3848_v56  ;;  %1896 = vmatpush.bf16.msrb.mxu3 %v3512_v9  ;;  %v3800_v30 = vor.u32 %v4635_v26, %v3799_v25  ;;  %v3655_v32 = vld [vmem:[#allocation2 + $0x440] sm:$0xf]  ;;  %v4599_v33 = vld [vmem:[#allocation2 + $0x44c] sm:$0xf0] }
  0x3f   :  { %1905 = vmatpush.bf16.msra.mxu0 %v3704_v8  ;;  %v3783_v34 = vld [vmem:[#allocation2 + $0x540] sm:$0xf]  ;;  %v3656_v35 = vor.u32 %v4599_v33, %v3655_v32  ;;  %v4631_v36 = vld [vmem:[#allocation2 + $0x54c] sm:$0xf0] }
  0x40   :  { %1884 = vmatpush.bf16.msrb.mxu2 %v3368_v22  ;;  %v3975_v37 = vld [vmem:[#allocation2 + $0x6c0] sm:$0xf]  ;;  %v4679_v38 = vld [vmem:[#allocation2 + $0x6cc] sm:$0xf0]  ;;  %v3784_v39 = vor.u32 %v4631_v36, %v3783_v34 }
  0x41   :  { %v3976_v40 = vor.u32 %v4679_v38, %v3975_v37  ;;  %v4103_v41 = vld [vmem:[#allocation2 + $0x7c0] sm:$0xf]  ;;  %v4711_v42 = vld [vmem:[#allocation2 + $0x7cc] sm:$0xf0] }
  0x42   :  { %1918 = vmatpush.bf16.msra.mxu1 %v3832_v3  ;;  %1897 = vmatpush.bf16.msrb.mxu3 %v3496_v23  ;;  %v4104_v43 = vor.u32 %v4711_v42, %v4103_v41  ;;  %v3639_v44 = vld [vmem:[#allocation2 + $0x420] sm:$0xf]  ;;  %v4595_v45 = vld [vmem:[#allocation2 + $0x42c] sm:$0xf0]  ;;  %v236_v42 = vld [vmem:[#allocation1 + $0x2d] sm:$0xff] }
  0x43   :  { %1906 = vmatpush.bf16.msra.mxu0 %v3688_v19  ;;  %v3767_v46 = vld [vmem:[#allocation2 + $0x520] sm:$0xf]  ;;  %v3640_v47 = vor.u32 %v4595_v45, %v3639_v44  ;;  %v4627_v48 = vld [vmem:[#allocation2 + $0x52c] sm:$0xf0]  ;;  %v4489_v45 = vld [vmem:[#allocation2 + $0xe4] sm:$0xf] }
  0x44   :  { %1929 = vmatpush.bf16.msra.mxu2 %v3992_v27  ;;  %v3959_v49 = vld [vmem:[#allocation2 + $0x6a0] sm:$0xf]  ;;  %v4675_v50 = vld [vmem:[#allocation2 + $0x6ac] sm:$0xf0]  ;;  %v3768_v51 = vor.u32 %v4627_v48, %v3767_v46  ;;  %v239_v27 = vpack.i.b16 %v231_v21, %v231_v21  ;;  %v3225_v46 = vld [vmem:[#allocation2 + $0xf0] sm:$0xf0]  ;;  %v254_v48 = vpack.i.b16 %v236_v42, %v236_v42 }
  0x45   :  { %v3960_v52 = vor.u32 %v4675_v50, %v3959_v49  ;;  %v4087_v53 = vld [vmem:[#allocation2 + $0x7a0] sm:$0xf]  ;;  %v4707_v54 = vld [vmem:[#allocation2 + $0x7ac] sm:$0xf0] }
  0x46   :  { %1919 = vmatpush.bf16.msra.mxu1 %v3816_v20  ;;  %1942 = vmatpush.bf16.msra.mxu3 %v4120_v28  ;;  %v4088_v55 = vor.u32 %v4707_v54, %v4087_v53  ;;  %v3623_v56 = vld [vmem:[#allocation2 + $0x400] sm:$0xf]  ;;  %v4591_v57 = vld [vmem:[#allocation2 + $0x40c] sm:$0xf0]  ;;  %v241_v33 = vperm.slane %v239_v27, 0 }
  0x47   :  { %1907 = vmatpush.bf16.msra.mxu0 %v3672_v29  ;;  %v3751_v58 = vld [vmem:[#allocation2 + $0x500] sm:$0xf]  ;;  %v3624_v59 = vor.u32 %v4591_v57, %v3623_v56  ;;  %v4623_v60 = vld [vmem:[#allocation2 + $0x50c] sm:$0xf0]  ;;  %v3353_v53 = vld [vmem:[#allocation2 + $0x1f0] sm:$0xf0] }
  0x48   :  { %1930 = vmatpush.bf16.msra.mxu2 %v3976_v40  ;;  %v3943_v61 = vld [vmem:[#allocation2 + $0x680] sm:$0xf]  ;;  %v4671_v62 = vld [vmem:[#allocation2 + $0x68c] sm:$0xf0]  ;;  %v3752_v63 = vor.u32 %v4623_v60, %v3751_v58  ;;  %v3228_v60 = vor.u32 %v4489_v45, %v3225_v46  ;;  %v3161_v45 = vld [vmem:[#allocation2 + $0x70] sm:$0xf0] }
  0x49   :  { %v3944_v0 = vor.u32 %v4671_v62, %v3943_v61  ;;  %v4071_v1 = vld [vmem:[#allocation2 + $0x780] sm:$0xf]  ;;  %v4703_v2 = vld [vmem:[#allocation2 + $0x78c] sm:$0xf0]  ;;  %v4485_v61 = vld [vmem:[#allocation2 + $0xc4] sm:$0xf] }
  0x4a   :  { %1920 = vmatpush.bf16.msra.mxu1 %v3800_v30  ;;  %1943 = vmatpush.bf16.msra.mxu3 %v4104_v43  ;;  %v4072_v8 = vor.u32 %v4703_v2, %v4071_v1  ;;  %v3927_v3 = vld [vmem:[#allocation2 + $0x660] sm:$0xf]  ;;  %v4667_v4 = vld [vmem:[#allocation2 + $0x66c] sm:$0xf0]  ;;  %v3209_v62 = vld [vmem:[#allocation2 + $0xd0] sm:$0xf0] }
  0x4b   :  { %1908 = vmatpush.bf16.msra.mxu0 %v3656_v35  ;;  %v4055_v5 = vld [vmem:[#allocation2 + $0x760] sm:$0xf]  ;;  %v3928_v6 = vor.u32 %v4667_v4, %v3927_v3  ;;  %v4699_v7 = vld [vmem:[#allocation2 + $0x76c] sm:$0xf0]  ;;  %v4517_v1 = vld [vmem:[#allocation2 + $0x1c4] sm:$0xf] }
  0x4c   :  { %1931 = vmatpush.bf16.msra.mxu2 %v3960_v52  ;;  %v4056_v9 = vor.u32 %v4699_v7, %v4055_v5  ;;  %v3911_v10 = vld [vmem:[#allocation2 + $0x640] sm:$0xf]  ;;  %v4663_v11 = vld [vmem:[#allocation2 + $0x64c] sm:$0xf0]  ;;  %v4521_v52 = vld [vmem:[#allocation2 + $0x1e4] sm:$0xf] }
  0x4d   :  { %v3912_v12 = vor.u32 %v4663_v11, %v3911_v10  ;;  %v4039_v13 = vld [vmem:[#allocation2 + $0x740] sm:$0xf]  ;;  %v4695_v14 = vld [vmem:[#allocation2 + $0x74c] sm:$0xf0]  ;;  %v3337_v2 = vld [vmem:[#allocation2 + $0x1d0] sm:$0xf0] }
  0x4e   :  { %1921 = vmatpush.bf16.msra.mxu1 %v3784_v39  ;;  %1944 = vmatpush.bf16.msra.mxu3 %v4088_v55  ;;  %v4040_v15 = vor.u32 %v4695_v14, %v4039_v13  ;;  %v3895_v16 = vld [vmem:[#allocation2 + $0x620] sm:$0xf]  ;;  %v4659_v17 = vld [vmem:[#allocation2 + $0x62c] sm:$0xf0]  ;;  %v271_v39 = vunpack.c.l.bf16 %v241_v33  ;;  %v256_v4 = vperm.slane %v254_v48, 0  ;;  %v5029_v11 = vld [vmem:[#allocation1 + $0x3f] sm:$0xff]  ;;  %v3212_v13 = vor.u32 %v4485_v61, %v3209_v62 }
  0x4f   :  { %1909 = vmatpush.bf16.msra.mxu0 %v3640_v47  ;;  %v4023_v18 = vld [vmem:[#allocation2 + $0x720] sm:$0xf]  ;;  %v3896_v19 = vor.u32 %v4659_v17, %v3895_v16  ;;  %v4691_v20 = vld [vmem:[#allocation2 + $0x72c] sm:$0xf0]  ;;  %v3340_v14 = vor.u32 %v4517_v1, %v3337_v2  ;;  %v4505_v48 = vld [vmem:[#allocation2 + $0x164] sm:$0xf] }
  0x50   :  { %1932 = vmatpush.bf16.msra.mxu2 %v3944_v0  ;;  %v232_v22 = vld [vmem:[#allocation1 + $0x9] sm:$0xff]  ;;  %v4024_v23 = vor.u32 %v4691_v20, %v4023_v18  ;;  %v4655_v25 = vld [vmem:[#allocation2 + $0x60c] sm:$0xf0]  ;;  %v3356_v0 = vor.u32 %v4521_v52, %v3353_v53  ;;  %v276_v18 = vunpack.c.l.bf16 %v256_v4  ;;  %v3193_v20 = vld [vmem:[#allocation2 + $0xb0] sm:$0xf0] }
  0x51   :  { %v3879_v24 = vld [vmem:[#allocation2 + $0x600] sm:$0xf]  ;;  %v242_v28 = vpack.i.b16 %v232_v22, %v232_v22  ;;  %v4687_v30 = vld [vmem:[#allocation2 + $0x70c] sm:$0xf0]  ;;  %v3145_v1 = vld [vmem:[#allocation2 + $0x50] sm:$0xf0] }
  0x52   :  { %1922 = vmatpush.bf16.msra.mxu1 %v3768_v51  ;;  %1945 = vmatpush.bf16.msra.mxu3 %v4072_v8  ;;  %v4007_v26 = vld [vmem:[#allocation2 + $0x700] sm:$0xf]  ;;  %v3880_v29 = vor.u32 %v4655_v25, %v3879_v24  ;;  %v233_v55 = vld [vmem:[#allocation1 + $0x12] sm:$0xff]  ;;  %v234_v56 = vld [vmem:[#allocation1 + $0x1b] sm:$0xff] }
  0x53   :  { %1910 = vmatpush.bf16.msra.mxu0 %v3624_v59  ;;  %v4008_v31 = vor.u32 %v4687_v30, %v4007_v26  ;;  %v244_v34 = vperm.slane %v242_v28, 0  ;;  %v235_v41 = vld [vmem:[#allocation1 + $0x24] sm:$0xff]  ;;  %v245_v7 = vpack.i.b16 %v233_v55, %v233_v55  ;;  %v5027_v10 = vld [vmem:[#allocation1 + $0x36] sm:$0xff] }
  0x54   :  { %1933 = vmatpush.bf16.msra.mxu2 %v3928_v6  ;;  %v251_v47 = vpack.i.b16 %v235_v41, %v235_v41  ;;  %v3321_v24 = vld [vmem:[#allocation2 + $0x1b0] sm:$0xf0]  ;;  %v257_v2 = vpack.i.b16 %v5027_v10, %v5027_v10 }
  0x55   :  { %v272_v40 = vunpack.c.l.bf16 %v244_v34  ;;  %v247_v21 = vperm.slane %v245_v7, 0  ;;  %v4501_v7 = vld [vmem:[#allocation2 + $0x144] sm:$0xf] }
  0x56   :  { %1923 = vmatpush.bf16.msra.mxu1 %v3752_v63  ;;  %1946 = vmatpush.bf16.msra.mxu3 %v4056_v9  ;;  %v253_v3 = vperm.slane %v251_v47, 0  ;;  %v248_v9 = vpack.i.b16 %v234_v56, %v234_v56  ;;  %v4585_v56 = vld [vmem:[#allocation2 + $0x3e4] sm:$0xf] }
  0x57   :  { %v273_v33 = vunpack.c.l.bf16 %v247_v21 }
  0x58   :  { %1934 = vmatpush.bf16.msra.mxu2 %v3912_v12  ;;  %v2269_v12 = vld [vmem:[%s5191_s4] sm:$0xf]  ;;  %v275_v17 = vunpack.c.l.bf16 %v253_v3  ;;  %v250_v22 = vperm.slane %v248_v9, 0  ;;  %v3273_v9 = vld [vmem:[#allocation2 + $0x150] sm:$0xf0] }
  0x59   :  { %2271 = vst [vmem:[#allocation1] ss:$9 sm:$0xff] %v2269_v12  ;;  %v4549_v12 = vld [vmem:[#allocation2 + $0x2c4] sm:$0xf] }
  0x5a   :  { %1947 = vmatpush.bf16.msra.mxu3 %v4040_v15  ;;  %v274_v34 = vunpack.c.l.bf16 %v250_v22  ;;  %v4497_v22 = vld [vmem:[#allocation2 + $0x124] sm:$0xf] }
  0x5c   :  { %1935 = vmatpush.bf16.msra.mxu2 %v3896_v19  ;;  %v4481_v19 = vld [vmem:[#allocation2 + $0xa4] sm:$0xf] }
  0x5d   :  { %v3196_v26 = vor.u32 %v4481_v19, %v3193_v20  ;;  %v3129_v19 = vld [vmem:[#allocation2 + $0x30] sm:$0xf0] }
  0x5e   :  { %1948 = vmatpush.bf16.msra.mxu3 %v4024_v23  ;;  %v4513_v23 = vld [vmem:[#allocation2 + $0x1a4] sm:$0xf] }
  0x5f   :  { %v3324_v30 = vor.u32 %v4513_v23, %v3321_v24  ;;  %v3257_v23 = vld [vmem:[#allocation2 + $0x130] sm:$0xf0]  ;;  %v4545_v24 = vld [vmem:[#allocation2 + $0x2a4] sm:$0xf] }
  0x60   :  { %1936 = vmatpush.bf16.msra.mxu2 %v3880_v29 }
  0x62   :  { %1949 = vmatpush.bf16.msra.mxu3 %v4008_v31  ;;  %v4477_v31 = vld [vmem:[#allocation2 + $0x84] sm:$0xf] }
  0x93   :  { %v181_v32 = vpop.f32.mrf.mxu0 }
  0x96   :  { %v194_v35 = vpop.f32.mrf.mxu1  ;;  %v129_v36 = vpop.f32.mrf.mxu2 }
  0x97   :  { %v226_v8 = vpack.c.bf16 %v194_v35, %v181_v32  ;;  %v3177_v35 = vld [vmem:[#allocation2 + $0x90] sm:$0xf0] }
  0x98   :  { %v142_v37 = vpop.f32.mrf.mxu3  ;;  %v3180_v42 = vor.u32 %v4477_v31, %v3177_v35  ;;  %v4461_v35 = vld [vmem:[#allocation2 + $0x4] sm:$0xf] }
  0x99   :  { %v224_v38 = vpack.c.bf16 %v142_v37, %v129_v36  ;;  %v267_v15 = vunpack.c.l.bf16 %v226_v8  ;;  %v268_v16 = vunpack.c.h.bf16 %v226_v8  ;;  %v4509_v36 = vld [vmem:[#allocation2 + $0x184] sm:$0xf]  ;;  %v3305_v37 = vld [vmem:[#allocation2 + $0x190] sm:$0xf0]  ;;  %v260_v8 = vpack.i.b16 %v5029_v11, %v5029_v11 }
  0x9a   :  { %v3276_v11 = vor.u32 %v4501_v7, %v3273_v9  ;;  %v3721_v9 = vld [vmem:[#allocation2 + $0x4d0] sm:$0xf0] }
  0x9b   :  { %v263_v43 = vunpack.c.l.bf16 %v224_v38  ;;  %v264_v44 = vunpack.c.h.bf16 %v224_v38  ;;  %v183_v49 = vpop.f32.mrf.mxu0  ;;  %v283_v28 = vadd.f32 %v275_v17, %v267_v15  ;;  %v284_v29 = vadd.f32 %v276_v18, %v268_v16  ;;  %v3593_v15 = vld [vmem:[#allocation2 + $0x3d0] sm:$0xf0]  ;;  %v4465_v18 = vld [vmem:[#allocation2 + $0x24] sm:$0xf] }
  0x9c   :  { %v3289_v49 = vld [vmem:[#allocation2 + $0x170] sm:$0xf0]  ;;  %v259_v16 = vperm.slane %v257_v2, 0  ;;  %v262_v17 = vperm.slane %v260_v8, 0 }
  0x9d   :  { %v279_v50 = vadd.f32 %v271_v39, %v263_v43  ;;  %v280_v51 = vadd.f32 %v272_v40, %v264_v44  ;;  %v303_v40 = vmax.f32 %v283_v28, 0.0  ;;  %v304_v41 = vmax.f32 %v284_v29, 0.0  ;;  %v4473_v44 = vld [vmem:[#allocation2 + $0x64] sm:$0xf]  ;;  %v3577_v28 = vld [vmem:[#allocation2 + $0x3b0] sm:$0xf0] }
  0x9e   :  { %v196_v54 = vpop.f32.mrf.mxu1  ;;  %v131_v59 = vpop.f32.mrf.mxu2  ;;  %v3308_v43 = vor.u32 %v4509_v36, %v3305_v37  ;;  %v3164_v55 = vor.u32 %v4473_v44, %v3161_v45  ;;  %v3292_v61 = vor.u32 %v4505_v48, %v3289_v49  ;;  %v3113_v36 = vld [vmem:[#allocation2 + $0x10] sm:$0xf0]  ;;  %v4493_v37 = vld [vmem:[#allocation2 + $0x104] sm:$0xf] }
  0x9f   :  { %v299_v57 = vmax.f32 %v279_v50, 0.0  ;;  %v300_v58 = vmax.f32 %v280_v51, 0.0  ;;  %v4553_v50 = vld [vmem:[#allocation2 + $0x2e4] sm:$0xf]  ;;  %v3481_v51 = vld [vmem:[#allocation2 + $0x2f0] sm:$0xf0]  ;;  %v5038_v59 = vpack.c.bf16 %v304_v41, %v304_v41  ;;  %v3116_v48 = vor.u32 %v4461_v35, %v3113_v36 }
  0xa0   :  { %v144_v63 = vpop.f32.mrf.mxu3  ;;  %v3484_v3 = vor.u32 %v4553_v50, %v3481_v51  ;;  %v4541_v41 = vld [vmem:[#allocation2 + $0x284] sm:$0xf]  ;;  %v3737_v49 = vld [vmem:[#allocation2 + $0x4f0] sm:$0xf0] }
  0xa1   :  { %v5023_v5 = vpack.c.bf16 %v299_v57, %v299_v57  ;;  %v5025_v6 = vpack.c.bf16 %v300_v58, %v300_v58  ;;  %v3609_v57 = vld [vmem:[#allocation2 + $0x3f0] sm:$0xf0]  ;;  %v5036_v58 = vpack.c.bf16 %v303_v40, %v303_v40  ;;  %v4573_v45 = vld [vmem:[#allocation2 + $0x384] sm:$0xf] }
  0xa2   :  { %v3612_v4 = vor.u32 %v4585_v56, %v3609_v57  ;;  %v3241_v40 = vld [vmem:[#allocation2 + $0x110] sm:$0xf0]  ;;  %v4649_v50 = vld [vmem:[#allocation2 + $0x5e4] sm:$0xf] }
  0xa3   :  { %1859 = vmatmul.bf16.vlgmr.msrb.gmra.mxu0 %v5023_v5  ;;  %1872 = vmatmul.bf16.vlgmr.msrb.gmra.mxu1 %v5025_v6  ;;  %v3865_v51 = vld [vmem:[#allocation2 + $0x5f0] sm:$0xf0]  ;;  %v4537_v57 = vld [vmem:[#allocation2 + $0x264] sm:$0xf] }
  0xa4   :  { %1955 = vmatpush.bf16.msrb.mxu0 %v3228_v60  ;;  %1968 = vmatpush.bf16.msrb.mxu1 %v3356_v0  ;;  %v4469_v0 = vld [vmem:[#allocation2 + $0x44] sm:$0xf]  ;;  %v3868_v8 = vor.u32 %v4649_v50, %v3865_v51  ;;  %v3689_v36 = vld [vmem:[#allocation2 + $0x490] sm:$0xf0] }
  0xa5   :  { %v3148_v10 = vor.u32 %v4469_v0, %v3145_v1  ;;  %v4605_v35 = vld [vmem:[#allocation2 + $0x484] sm:$0xf]  ;;  %v3801_v50 = vld [vmem:[#allocation2 + $0x570] sm:$0xf0] }
  0xa6   :  { %v155_v25 = vpop.f32.mrf.mxu2  ;;  %v4681_v51 = vld [vmem:[#allocation2 + $0x6e4] sm:$0xf] }
  0xa8   :  { %1956 = vmatpush.bf16.msrb.mxu0 %v3212_v13  ;;  %1969 = vmatpush.bf16.msrb.mxu1 %v3340_v14  ;;  %v168_v27 = vpop.f32.mrf.mxu3  ;;  %v3465_v13 = vld [vmem:[#allocation2 + $0x2d0] sm:$0xf0]  ;;  %v4581_v14 = vld [vmem:[#allocation2 + $0x3c4] sm:$0xf] }
  0xa9   :  { %v225_v32 = vpack.c.bf16 %v168_v27, %v155_v25  ;;  %v3468_v20 = vor.u32 %v4549_v12, %v3465_v13  ;;  %v3596_v21 = vor.u32 %v4581_v14, %v3593_v15  ;;  %v4577_v27 = vld [vmem:[#allocation2 + $0x3a4] sm:$0xf]  ;;  %v3849_v13 = vld [vmem:[#allocation2 + $0x5d0] sm:$0xf0] }
  0xaa   :  { %v4645_v12 = vld [vmem:[#allocation2 + $0x5c4] sm:$0xf] }
  0xab   :  { %v265_v38 = vunpack.c.l.bf16 %v225_v32  ;;  %v266_v39 = vunpack.c.h.bf16 %v225_v32  ;;  %v277_v32 = vunpack.c.l.bf16 %v259_v16 }
  0xac   :  { %1957 = vmatpush.bf16.msrb.mxu0 %v3196_v26  ;;  %1970 = vmatpush.bf16.msrb.mxu1 %v3324_v30  ;;  %v3449_v26 = vld [vmem:[#allocation2 + $0x2b0] sm:$0xf0]  ;;  %v3132_v30 = vor.u32 %v4465_v18, %v3129_v19 }
  0xad   :  { %v281_v46 = vadd.f32 %v273_v33, %v265_v38  ;;  %v282_v47 = vadd.f32 %v274_v34, %v266_v39  ;;  %v278_v33 = vunpack.c.l.bf16 %v262_v17  ;;  %v3260_v34 = vor.u32 %v4497_v22, %v3257_v23  ;;  %v4533_v17 = vld [vmem:[#allocation2 + $0x244] sm:$0xf]  ;;  %v3401_v18 = vld [vmem:[#allocation2 + $0x250] sm:$0xf0] }
  0xae   :  { %v157_v54 = vpop.f32.mrf.mxu2  ;;  %v3452_v38 = vor.u32 %v4545_v24, %v3449_v26  ;;  %v3580_v39 = vor.u32 %v4577_v27, %v3577_v28  ;;  %v3529_v22 = vld [vmem:[#allocation2 + $0x350] sm:$0xf0]  ;;  %v4609_v23 = vld [vmem:[#allocation2 + $0x4a4] sm:$0xf]  ;;  %v3404_v27 = vor.u32 %v4533_v17, %v3401_v18 }
  0xaf   :  { %v301_v52 = vmax.f32 %v281_v46, 0.0  ;;  %v302_v53 = vmax.f32 %v282_v47, 0.0  ;;  %v3561_v46 = vld [vmem:[#allocation2 + $0x390] sm:$0xf0]  ;;  %v4617_v47 = vld [vmem:[#allocation2 + $0x4e4] sm:$0xf]  ;;  %v3244_v54 = vor.u32 %v4493_v37, %v3241_v40 }
  0xb0   :  { %1958 = vmatpush.bf16.msrb.mxu0 %v3180_v42  ;;  %1971 = vmatpush.bf16.msrb.mxu1 %v3308_v43  ;;  %v170_v60 = vpop.f32.mrf.mxu3  ;;  %v3433_v42 = vld [vmem:[#allocation2 + $0x290] sm:$0xf0]  ;;  %v3564_v56 = vor.u32 %v4573_v45, %v3561_v46  ;;  %v3740_v2 = vor.u32 %v4617_v47, %v3737_v49  ;;  %v4637_v37 = vld [vmem:[#allocation2 + $0x584] sm:$0xf] }
  0xb1   :  { %v5040_v62 = vpack.c.bf16 %v301_v52, %v301_v52  ;;  %v5042_v63 = vpack.c.bf16 %v302_v53, %v302_v53  ;;  %v3417_v60 = vld [vmem:[#allocation2 + $0x270] sm:$0xf0]  ;;  %v4601_v47 = vld [vmem:[#allocation2 + $0x464] sm:$0xf] }
  0xb2   :  { %v3705_v24 = vld [vmem:[#allocation2 + $0x4b0] sm:$0xf0]  ;;  %v4633_v49 = vld [vmem:[#allocation2 + $0x564] sm:$0xf] }
  0xb3   :  { %1885 = vmatmul.bf16.vlgmr.msrb.gmra.mxu2 %v5040_v62  ;;  %1898 = vmatmul.bf16.vlgmr.msrb.gmra.mxu3 %v5042_v63  ;;  %v3833_v26 = vld [vmem:[#allocation2 + $0x5b0] sm:$0xf0] }
  0xb4   :  { %1911 = vmatmul.bf16.vlgmr.msra.gmra.mxu0 %v5036_v58  ;;  %1924 = vmatmul.bf16.vlgmr.msra.gmra.mxu1 %v5038_v59  ;;  %v3497_v46 = vld [vmem:[#allocation2 + $0x310] sm:$0xf0] }
  0xb5   :  { %1959 = vmatpush.bf16.msrb.mxu0 %v3164_v55  ;;  %1972 = vmatpush.bf16.msrb.mxu1 %v3292_v61  ;;  %v3436_v55 = vor.u32 %v4541_v41, %v3433_v42  ;;  %v4569_v61 = vld [vmem:[#allocation2 + $0x364] sm:$0xf]  ;;  %v3369_v42 = vld [vmem:[#allocation2 + $0x210] sm:$0xf0] }
  0xb6   :  { %1981 = vmatpush.bf16.msrb.mxu2 %v3484_v3  ;;  %1994 = vmatpush.bf16.msrb.mxu3 %v3612_v4  ;;  %v207_v25 = vpop.f32.mrf.mxu2  ;;  %v3545_v3 = vld [vmem:[#allocation2 + $0x370] sm:$0xf0]  ;;  %v4613_v4 = vld [vmem:[#allocation2 + $0x4c4] sm:$0xf] }
  0xb7   :  { %v3548_v16 = vor.u32 %v4569_v61, %v3545_v3  ;;  %v3724_v19 = vor.u32 %v4613_v4, %v3721_v9  ;;  %v4525_v41 = vld [vmem:[#allocation2 + $0x204] sm:$0xf]  ;;  %v3785_v3 = vld [vmem:[#allocation2 + $0x550] sm:$0xf0] }
  0xb8   :  { %v220_v29 = vpop.f32.mrf.mxu3  ;;  %v4597_v61 = vld [vmem:[#allocation2 + $0x444] sm:$0xf] }
  0xb9   :  { %1960 = vmatpush.bf16.msrb.mxu0 %v3148_v10  ;;  %1973 = vmatpush.bf16.msrb.mxu1 %v3276_v11  ;;  %v227_v31 = vpack.c.bf16 %v220_v29, %v207_v25  ;;  %v3420_v11 = vor.u32 %v4537_v57, %v3417_v60  ;;  %v4641_v25 = vld [vmem:[#allocation2 + $0x5a4] sm:$0xf]  ;;  %v3804_v60 = vor.u32 %v4633_v49, %v3801_v50  ;;  %v4057_v50 = vld [vmem:[#allocation2 + $0x770] sm:$0xf0] }
  0xba   :  { %1982 = vmatpush.bf16.msrb.mxu2 %v3468_v20  ;;  %1995 = vmatpush.bf16.msrb.mxu3 %v3596_v21  ;;  %v3852_v20 = vor.u32 %v4645_v12, %v3849_v13  ;;  %v4565_v21 = vld [vmem:[#allocation2 + $0x344] sm:$0xf]  ;;  %v4105_v12 = vld [vmem:[#allocation2 + $0x7d0] sm:$0xf0] }
  0xbb   :  { %v269_v43 = vunpack.c.l.bf16 %v227_v31  ;;  %v270_v44 = vunpack.c.h.bf16 %v227_v31  ;;  %v3532_v28 = vor.u32 %v4565_v21, %v3529_v22  ;;  %v4529_v29 = vld [vmem:[#allocation2 + $0x224] sm:$0xf]  ;;  %v3708_v31 = vor.u32 %v4609_v23, %v3705_v24  ;;  %v3961_v22 = vld [vmem:[#allocation2 + $0x6b0] sm:$0xf0] }
  0xbc   :  { %v4677_v4 = vld [vmem:[#allocation2 + $0x6c4] sm:$0xf]  ;;  %v4089_v24 = vld [vmem:[#allocation2 + $0x7b0] sm:$0xf0] }
  0xbd   :  { %v285_v52 = vadd.f32 %v277_v32, %v269_v43  ;;  %v286_v53 = vadd.f32 %v278_v33, %v270_v44  ;;  %1961 = vmatpush.bf16.msrb.mxu0 %v3132_v30  ;;  %1974 = vmatpush.bf16.msrb.mxu1 %v3260_v34  ;;  %v3385_v30 = vld [vmem:[#allocation2 + $0x230] sm:$0xf0]  ;;  %v3836_v32 = vor.u32 %v4641_v25, %v3833_v26  ;;  %v4561_v33 = vld [vmem:[#allocation2 + $0x324] sm:$0xf] }
  0xbe   :  { %1983 = vmatpush.bf16.msrb.mxu2 %v3452_v38  ;;  %1996 = vmatpush.bf16.msrb.mxu3 %v3580_v39  ;;  %v209_v7 = vpop.f32.mrf.mxu2  ;;  %v3513_v34 = vld [vmem:[#allocation2 + $0x330] sm:$0xf0]  ;;  %v3388_v39 = vor.u32 %v4529_v29, %v3385_v30  ;;  %v4557_v43 = vld [vmem:[#allocation2 + $0x304] sm:$0xf]  ;;  %v3692_v44 = vor.u32 %v4605_v35, %v3689_v36 }
  0xbf   :  { %v305_v0 = vmax.f32 %v285_v52, 0.0  ;;  %v306_v1 = vmax.f32 %v286_v53, 0.0  ;;  %v3817_v38 = vld [vmem:[#allocation2 + $0x590] sm:$0xf0]  ;;  %v3516_v40 = vor.u32 %v4561_v33, %v3513_v34  ;;  %v4713_v53 = vld [vmem:[#allocation2 + $0x7e4] sm:$0xf] }
  0xc0   :  { %v222_v14 = vpop.f32.mrf.mxu3  ;;  %v3820_v45 = vor.u32 %v4637_v37, %v3817_v38  ;;  %v3993_v52 = vld [vmem:[#allocation2 + $0x6f0] sm:$0xf0]  ;;  %v4709_v9 = vld [vmem:[#allocation2 + $0x7c4] sm:$0xf]  ;;  %v3231_v37 = vld [vmem:[#allocation2 + $0xe8] sm:$0xf] }
  0xc1   :  { %v5052_v15 = vpack.c.bf16 %v305_v0, %v305_v0  ;;  %v5054_v10 = vpack.c.bf16 %v306_v1, %v306_v1  ;;  %1962 = vmatpush.bf16.msrb.mxu0 %v3116_v48  ;;  %1975 = vmatpush.bf16.msrb.mxu1 %v3244_v54  ;;  %v3673_v48 = vld [vmem:[#allocation2 + $0x470] sm:$0xf0]  ;;  %v3996_v1 = vor.u32 %v4681_v51, %v3993_v52  ;;  %v4673_v21 = vld [vmem:[#allocation2 + $0x6a4] sm:$0xf]  ;;  %v4492_v38 = vld [vmem:[#allocation2 + $0xf4] sm:$0xf0] }
  0xc2   :  { %1984 = vmatpush.bf16.msrb.mxu2 %v3436_v55  ;;  %1997 = vmatpush.bf16.msrb.mxu3 %v3564_v56  ;;  %v4121_v54 = vld [vmem:[#allocation2 + $0x7f0] sm:$0xf0]  ;;  %v3372_v55 = vor.u32 %v4525_v41, %v3369_v42  ;;  %v3500_v56 = vor.u32 %v4557_v43, %v3497_v46  ;;  %v3676_v57 = vor.u32 %v4601_v47, %v3673_v48  ;;  %v4705_v23 = vld [vmem:[#allocation2 + $0x7a4] sm:$0xf]  ;;  %v3215_v51 = vld [vmem:[#allocation2 + $0xc8] sm:$0xf] }
  0xc3   :  { %1937 = vmatmul.bf16.vlgmr.msra.gmra.mxu2 %v5052_v15  ;;  %1950 = vmatmul.bf16.vlgmr.msra.gmra.mxu3 %v5054_v10  ;;  %v3657_v0 = vld [vmem:[#allocation2 + $0x450] sm:$0xf0]  ;;  %v4108_v18 = vor.u32 %v4709_v9, %v4105_v12  ;;  %v4621_v29 = vld [vmem:[#allocation2 + $0x504] sm:$0xf]  ;;  %v3964_v30 = vor.u32 %v4673_v21, %v3961_v22  ;;  %v3232_v47 = vor.u32 %v4492_v38, %v3231_v37  ;;  %v4488_v52 = vld [vmem:[#allocation2 + $0xd4] sm:$0xf0] }
  0xc4   :  { %1963 = vmatmul.bf16.vlgmr.msrb.gmra.mxu0 %v5023_v5  ;;  %1976 = vmatmul.bf16.vlgmr.msrb.gmra.mxu1 %v5025_v6  ;;  %v3977_v7 = vld [vmem:[#allocation2 + $0x6d0] sm:$0xf0]  ;;  %v3660_v13 = vor.u32 %v4597_v61, %v3657_v0  ;;  %v4669_v33 = vld [vmem:[#allocation2 + $0x684] sm:$0xf]  ;;  %v3216_v61 = vor.u32 %v4488_v52, %v3215_v51  ;;  %v3311_v21 = vld [vmem:[#allocation2 + $0x188] sm:$0xf] }
  0xc5   :  { %2007 = vmatpush.bf16.msra.mxu0 %v3740_v2  ;;  %2020 = vmatpush.bf16.msra.mxu1 %v3868_v8  ;;  %v4124_v2 = vor.u32 %v4713_v53, %v4121_v54  ;;  %v4629_v8 = vld [vmem:[#allocation2 + $0x544] sm:$0xf]  ;;  %v3980_v17 = vor.u32 %v4677_v4, %v3977_v7  ;;  %v3945_v34 = vld [vmem:[#allocation2 + $0x690] sm:$0xf0]  ;;  %v3343_v53 = vld [vmem:[#allocation2 + $0x1c8] sm:$0xf] }
  0xc6   :  { %1985 = vmatpush.bf16.msrb.mxu2 %v3420_v11  ;;  %1998 = vmatpush.bf16.msrb.mxu3 %v3548_v16  ;;  %v3788_v14 = vor.u32 %v4629_v8, %v3785_v3  ;;  %v4593_v11 = vld [vmem:[#allocation2 + $0x424] sm:$0xf]  ;;  %v3641_v16 = vld [vmem:[#allocation2 + $0x430] sm:$0xf0]  ;;  %v3948_v43 = vor.u32 %v4669_v33, %v3945_v34  ;;  %v4520_v54 = vld [vmem:[#allocation2 + $0x1d4] sm:$0xf0] }
  0xc7   :  { %v3644_v25 = vor.u32 %v4593_v11, %v3641_v16  ;;  %v4701_v35 = vld [vmem:[#allocation2 + $0x784] sm:$0xf]  ;;  %v4073_v36 = vld [vmem:[#allocation2 + $0x790] sm:$0xf0]  ;;  %v3344_v0 = vor.u32 %v4520_v54, %v3343_v53  ;;  %v3199_v8 = vld [vmem:[#allocation2 + $0xa8] sm:$0xf] }
  0xc8   :  { %v3929_v46 = vld [vmem:[#allocation2 + $0x670] sm:$0xf0]  ;;  %v4697_v49 = vld [vmem:[#allocation2 + $0x764] sm:$0xf]  ;;  %v4484_v3 = vld [vmem:[#allocation2 + $0xb4] sm:$0xf0] }
  0xc9   :  { %2008 = vmatpush.bf16.msra.mxu0 %v3724_v19  ;;  %2021 = vmatpush.bf16.msra.mxu1 %v3852_v20  ;;  %v4625_v19 = vld [vmem:[#allocation2 + $0x524] sm:$0xf]  ;;  %v3769_v20 = vld [vmem:[#allocation2 + $0x530] sm:$0xf0]  ;;  %v3327_v4 = vld [vmem:[#allocation2 + $0x1a8] sm:$0xf]  ;;  %v3200_v11 = vor.u32 %v4484_v3, %v3199_v8 }
  0xca   :  { %1986 = vmatpush.bf16.msrb.mxu2 %v3404_v27  ;;  %1999 = vmatpush.bf16.msrb.mxu3 %v3532_v28  ;;  %v3772_v26 = vor.u32 %v4625_v19, %v3769_v20  ;;  %v4589_v27 = vld [vmem:[#allocation2 + $0x404] sm:$0xf]  ;;  %v3625_v28 = vld [vmem:[#allocation2 + $0x410] sm:$0xf0]  ;;  %v4516_v7 = vld [vmem:[#allocation2 + $0x1b4] sm:$0xf0] }
  0xcb   :  { %v3628_v41 = vor.u32 %v4589_v27, %v3625_v28  ;;  %v3328_v16 = vor.u32 %v4516_v7, %v3327_v4  ;;  %v3183_v19 = vld [vmem:[#allocation2 + $0x88] sm:$0xf]  ;;  %v4480_v20 = vld [vmem:[#allocation2 + $0x94] sm:$0xf0]  ;;  %v4685_v27 = vld [vmem:[#allocation2 + $0x704] sm:$0xf] }
  0xcc   :  { %v4512_v22 = vld [vmem:[#allocation2 + $0x194] sm:$0xf0]  ;;  %v3184_v28 = vor.u32 %v4480_v20, %v3183_v19  ;;  %v3295_v33 = vld [vmem:[#allocation2 + $0x168] sm:$0xf] }
  0xcd   :  { %2009 = vmatpush.bf16.msra.mxu0 %v3708_v31  ;;  %2022 = vmatpush.bf16.msra.mxu1 %v3836_v32  ;;  %v4092_v31 = vor.u32 %v4705_v23, %v4089_v24  ;;  %v3753_v32 = vld [vmem:[#allocation2 + $0x510] sm:$0xf0]  ;;  %v4508_v34 = vld [vmem:[#allocation2 + $0x174] sm:$0xf0]  ;;  %v3615_v37 = vld [vmem:[#allocation2 + $0x3e8] sm:$0xf] }
  0xce   :  { %1987 = vmatpush.bf16.msrb.mxu2 %v3388_v39  ;;  %2000 = vmatpush.bf16.msrb.mxu3 %v3516_v40  ;;  %v3359_v39 = vld [vmem:[#allocation2 + $0x1e8] sm:$0xf]  ;;  %v4524_v40 = vld [vmem:[#allocation2 + $0x1f4] sm:$0xf0]  ;;  %v3756_v42 = vor.u32 %v4621_v29, %v3753_v32  ;;  %v3312_v29 = vor.u32 %v4512_v22, %v3311_v21 }
  0xcf   :  { %v3360_v48 = vor.u32 %v4524_v40, %v3359_v39  ;;  %v4476_v32 = vld [vmem:[#allocation2 + $0x74] sm:$0xf0]  ;;  %v3599_v51 = vld [vmem:[#allocation2 + $0x3c8] sm:$0xf] }
  0xd0   :  { %v4588_v38 = vld [vmem:[#allocation2 + $0x3f4] sm:$0xf0]  ;;  %v3583_v8 = vld [vmem:[#allocation2 + $0x3a8] sm:$0xf] }
  0xd1   :  { %2010 = vmatpush.bf16.msra.mxu0 %v3692_v44  ;;  %2023 = vmatpush.bf16.msra.mxu1 %v3820_v45  ;;  %v4076_v44 = vor.u32 %v4701_v35, %v4073_v36  ;;  %v4665_v45 = vld [vmem:[#allocation2 + $0x664] sm:$0xf]  ;;  %v3487_v35 = vld [vmem:[#allocation2 + $0x2e8] sm:$0xf]  ;;  %v4556_v36 = vld [vmem:[#allocation2 + $0x2f4] sm:$0xf0] }
  0xd2   :  { %1988 = vmatpush.bf16.msrb.mxu2 %v3372_v55  ;;  %2001 = vmatpush.bf16.msrb.mxu3 %v3500_v56  ;;  %v3932_v55 = vor.u32 %v4665_v45, %v3929_v46  ;;  %v4060_v56 = vor.u32 %v4697_v49, %v4057_v50  ;;  %v3488_v45 = vor.u32 %v4556_v36, %v3487_v35  ;;  %v3471_v49 = vld [vmem:[#allocation2 + $0x2c8] sm:$0xf]  ;;  %v4552_v50 = vld [vmem:[#allocation2 + $0x2d4] sm:$0xf0] }
  0xd3   :  { %v3616_v46 = vor.u32 %v4588_v38, %v3615_v37  ;;  %v4584_v52 = vld [vmem:[#allocation2 + $0x3d4] sm:$0xf0]  ;;  %v3567_v19 = vld [vmem:[#allocation2 + $0x388] sm:$0xf] }
  0xd4   :  { %v4580_v3 = vld [vmem:[#allocation2 + $0x3b4] sm:$0xf0]  ;;  %v3743_v21 = vld [vmem:[#allocation2 + $0x4e8] sm:$0xf] }
  0xd5   :  { %2011 = vmatpush.bf16.msra.mxu0 %v3676_v57  ;;  %2024 = vmatpush.bf16.msra.mxu1 %v3804_v60  ;;  %v4661_v57 = vld [vmem:[#allocation2 + $0x644] sm:$0xf]  ;;  %v3913_v60 = vld [vmem:[#allocation2 + $0x650] sm:$0xf0]  ;;  %v4576_v20 = vld [vmem:[#allocation2 + $0x394] sm:$0xf0] }
  0xd6   :  { %2033 = vmatpush.bf16.msra.mxu2 %v3996_v1  ;;  %2046 = vmatpush.bf16.msra.mxu3 %v4124_v2  ;;  %v4693_v1 = vld [vmem:[#allocation2 + $0x744] sm:$0xf]  ;;  %v4041_v2 = vld [vmem:[#allocation2 + $0x750] sm:$0xf0]  ;;  %v3916_v9 = vor.u32 %v4661_v57, %v3913_v60  ;;  %v3472_v57 = vor.u32 %v4552_v50, %v3471_v49  ;;  %v3600_v60 = vor.u32 %v4584_v52, %v3599_v51  ;;  %v4620_v22 = vld [vmem:[#allocation2 + $0x4f4] sm:$0xf0] }
  0xd7   :  { %1989 = vmatmul.bf16.vlgmr.msrb.gmra.mxu2 %v5040_v62  ;;  %2002 = vmatmul.bf16.vlgmr.msrb.gmra.mxu3 %v5042_v63  ;;  %v4044_v12 = vor.u32 %v4693_v1, %v4041_v2  ;;  %v3455_v1 = vld [vmem:[#allocation2 + $0x2a8] sm:$0xf]  ;;  %v4548_v2 = vld [vmem:[#allocation2 + $0x2b4] sm:$0xf0] }
  0xd8   :  { %v3727_v35 = vld [vmem:[#allocation2 + $0x4c8] sm:$0xf]  ;;  %v4616_v36 = vld [vmem:[#allocation2 + $0x4d4] sm:$0xf0] }
  0xd9   :  { %2012 = vmatpush.bf16.msra.mxu0 %v3660_v13  ;;  %2025 = vmatpush.bf16.msra.mxu1 %v3788_v14  ;;  %v4657_v13 = vld [vmem:[#allocation2 + $0x624] sm:$0xf]  ;;  %v3897_v14 = vld [vmem:[#allocation2 + $0x630] sm:$0xf0]  ;;  %v3855_v37 = vld [vmem:[#allocation2 + $0x5c8] sm:$0xf] }
  0xda   :  { %2034 = vmatpush.bf16.msra.mxu2 %v3980_v17  ;;  %2047 = vmatpush.bf16.msra.mxu3 %v4108_v18  ;;  %v4689_v17 = vld [vmem:[#allocation2 + $0x724] sm:$0xf]  ;;  %v4025_v18 = vld [vmem:[#allocation2 + $0x730] sm:$0xf0]  ;;  %v3900_v23 = vor.u32 %v4657_v13, %v3897_v14  ;;  %v3247_v13 = vld [vmem:[#allocation2 + $0x108] sm:$0xf]  ;;  %v3456_v14 = vor.u32 %v4548_v2, %v3455_v1 }
  0xdb   :  { %v4028_v24 = vor.u32 %v4689_v17, %v4025_v18  ;;  %v3439_v17 = vld [vmem:[#allocation2 + $0x288] sm:$0xf]  ;;  %v4544_v18 = vld [vmem:[#allocation2 + $0x294] sm:$0xf0] }
  0xdc   :  { %v4648_v38 = vld [vmem:[#allocation2 + $0x5d4] sm:$0xf0]  ;;  %v3839_v49 = vld [vmem:[#allocation2 + $0x5a8] sm:$0xf] }
  0xdd   :  { %2013 = vmatpush.bf16.msra.mxu0 %v3644_v25  ;;  %2026 = vmatpush.bf16.msra.mxu1 %v3772_v26  ;;  %v4653_v25 = vld [vmem:[#allocation2 + $0x604] sm:$0xf]  ;;  %v3881_v26 = vld [vmem:[#allocation2 + $0x610] sm:$0xf0]  ;;  %v4644_v50 = vld [vmem:[#allocation2 + $0x5b4] sm:$0xf0] }
  0xde   :  { %2035 = vmatpush.bf16.msra.mxu2 %v3964_v30  ;;  %2048 = vmatpush.bf16.msra.mxu3 %v4092_v31  ;;  %v4009_v30 = vld [vmem:[#allocation2 + $0x710] sm:$0xf0]  ;;  %v3167_v31 = vld [vmem:[#allocation2 + $0x68] sm:$0xf]  ;;  %v3884_v39 = vor.u32 %v4653_v25, %v3881_v26  ;;  %v4640_v2 = vld [vmem:[#allocation2 + $0x594] sm:$0xf0] }
  0xdf   :  { %v4012_v40 = vor.u32 %v4685_v27, %v4009_v30  ;;  %v3440_v27 = vor.u32 %v4544_v18, %v3439_v17  ;;  %v4540_v30 = vld [vmem:[#allocation2 + $0x274] sm:$0xf0]  ;;  %v3823_v1 = vld [vmem:[#allocation2 + $0x588] sm:$0xf] }
  0xe0   :  { %v3807_v17 = vld [vmem:[#allocation2 + $0x568] sm:$0xf]  ;;  %v4636_v18 = vld [vmem:[#allocation2 + $0x574] sm:$0xf0] }
  0xe1   :  { %2014 = vmatpush.bf16.msra.mxu0 %v3628_v41  ;;  %2027 = vmatpush.bf16.msra.mxu1 %v3756_v42  ;;  %v3168_v41 = vor.u32 %v4476_v32, %v3167_v31  ;;  %v3296_v42 = vor.u32 %v4508_v34, %v3295_v33  ;;  %v3744_v31 = vor.u32 %v4620_v22, %v3743_v21  ;;  %v3551_v33 = vld [vmem:[#allocation2 + $0x368] sm:$0xf]  ;;  %v4572_v34 = vld [vmem:[#allocation2 + $0x374] sm:$0xf0] }
  0xe2   :  { %2036 = vmatpush.bf16.msra.mxu2 %v3948_v43  ;;  %2049 = vmatpush.bf16.msra.mxu3 %v4076_v44  ;;  %v3151_v43 = vld [vmem:[#allocation2 + $0x48] sm:$0xf]  ;;  %v4472_v44 = vld [vmem:[#allocation2 + $0x54] sm:$0xf0] }
  0xe3   :  { %v3152_v53 = vor.u32 %v4472_v44, %v3151_v43  ;;  %v3728_v43 = vor.u32 %v4616_v36, %v3727_v35  ;;  %v3856_v44 = vor.u32 %v4648_v38, %v3855_v37  ;;  %v4127_v21 = vld [vmem:[#allocation2 + $0x7e8] sm:$0xf]  ;;  %v4716_v22 = vld [vmem:[#allocation2 + $0x7f4] sm:$0xf0] }
  0xe4   :  { %2015 = vmatmul.bf16.vlgmr.msra.gmra.mxu0 %v5036_v58  ;;  %2028 = vmatmul.bf16.vlgmr.msra.gmra.mxu1 %v5038_v59  ;;  %v4111_v35 = vld [vmem:[#allocation2 + $0x7c8] sm:$0xf]  ;;  %v4712_v36 = vld [vmem:[#allocation2 + $0x7d4] sm:$0xf0] }
  0xe5   :  { %2059 = vmatpush.bf16.msrb.mxu0 %v3232_v47  ;;  %2072 = vmatpush.bf16.msrb.mxu1 %v3360_v48  ;;  %v3279_v47 = vld [vmem:[#allocation2 + $0x148] sm:$0xf]  ;;  %v4504_v48 = vld [vmem:[#allocation2 + $0x154] sm:$0xf0] }
  0xe6   :  { %2037 = vmatpush.bf16.msra.mxu2 %v3932_v55  ;;  %2050 = vmatpush.bf16.msra.mxu3 %v4060_v56  ;;  %v3280_v54 = vor.u32 %v4504_v48, %v3279_v47  ;;  %v3135_v55 = vld [vmem:[#allocation2 + $0x28] sm:$0xf]  ;;  %v4468_v56 = vld [vmem:[#allocation2 + $0x34] sm:$0xf0] }
  0xe7   :  { %v3136_v4 = vor.u32 %v4468_v56, %v3135_v55  ;;  %v3711_v47 = vld [vmem:[#allocation2 + $0x4a8] sm:$0xf]  ;;  %v4612_v48 = vld [vmem:[#allocation2 + $0x4b4] sm:$0xf0]  ;;  %v3840_v56 = vor.u32 %v4644_v50, %v3839_v49 }
  0xe8   :  { %v3712_v55 = vor.u32 %v4612_v48, %v3711_v47  ;;  %v4095_v47 = vld [vmem:[#allocation2 + $0x7a8] sm:$0xf]  ;;  %v4708_v48 = vld [vmem:[#allocation2 + $0x7b4] sm:$0xf0] }
  0xe9   :  { %2060 = vmatpush.bf16.msrb.mxu0 %v3216_v61  ;;  %2073 = vmatpush.bf16.msrb.mxu1 %v3344_v0  ;;  %v3263_v61 = vld [vmem:[#allocation2 + $0x128] sm:$0xf]  ;;  %v4500_v0 = vld [vmem:[#allocation2 + $0x134] sm:$0xf0] }
  0xea   :  { %2038 = vmatpush.bf16.msra.mxu2 %v3916_v9  ;;  %2051 = vmatpush.bf16.msra.mxu3 %v4044_v12  ;;  %v3264_v7 = vor.u32 %v4500_v0, %v3263_v61  ;;  %v3119_v9 = vld [vmem:[#allocation2 + $0x8] sm:$0xf]  ;;  %v4464_v12 = vld [vmem:[#allocation2 + $0x14] sm:$0xf0] }
  0xeb   :  { %v3120_v25 = vor.u32 %v4464_v12, %v3119_v9  ;;  %v3695_v61 = vld [vmem:[#allocation2 + $0x488] sm:$0xf]  ;;  %v4608_v0 = vld [vmem:[#allocation2 + $0x494] sm:$0xf0] }
  0xec   :  { %v3503_v9 = vld [vmem:[#allocation2 + $0x308] sm:$0xf]  ;;  %v3696_v12 = vor.u32 %v4608_v0, %v3695_v61  ;;  %v4704_v0 = vld [vmem:[#allocation2 + $0x794] sm:$0xf0] }
  0xed   :  { %2061 = vmatpush.bf16.msrb.mxu0 %v3200_v11  ;;  %2074 = vmatpush.bf16.msrb.mxu1 %v3328_v16  ;;  %v3584_v11 = vor.u32 %v4580_v3, %v3583_v8  ;;  %v4496_v16 = vld [vmem:[#allocation2 + $0x114] sm:$0xf0]  ;;  %v4079_v61 = vld [vmem:[#allocation2 + $0x788] sm:$0xf] }
  0xee   :  { %2039 = vmatpush.bf16.msra.mxu2 %v3900_v23  ;;  %2052 = vmatpush.bf16.msra.mxu3 %v4028_v24  ;;  %v3871_v23 = vld [vmem:[#allocation2 + $0x5e8] sm:$0xf]  ;;  %v4652_v24 = vld [vmem:[#allocation2 + $0x5f4] sm:$0xf0]  ;;  %v3248_v26 = vor.u32 %v4496_v16, %v3247_v13  ;;  %v3824_v13 = vor.u32 %v4640_v2, %v3823_v1  ;;  %v4490_v1 = vld [vmem:[#allocation2 + $0xec] sm:$0xf] }
  0xef   :  { %v3872_v32 = vor.u32 %v4652_v24, %v3871_v23  ;;  %v4604_v16 = vld [vmem:[#allocation2 + $0x474] sm:$0xf0]  ;;  %v3233_v2 = vld [vmem:[#allocation2 + $0xf8] sm:$0xf0] }
  0xf1   :  { %2062 = vmatpush.bf16.msrb.mxu0 %v3184_v28  ;;  %2075 = vmatpush.bf16.msrb.mxu1 %v3312_v29  ;;  %v3568_v28 = vor.u32 %v4576_v20, %v3567_v19  ;;  %v3423_v29 = vld [vmem:[#allocation2 + $0x268] sm:$0xf]  ;;  %v4684_v20 = vld [vmem:[#allocation2 + $0x6f4] sm:$0xf0] }
  0xf2   :  { %2040 = vmatpush.bf16.msra.mxu2 %v3884_v39  ;;  %2053 = vmatpush.bf16.msra.mxu3 %v4012_v40  ;;  %v3424_v39 = vor.u32 %v4540_v30, %v3423_v29  ;;  %v3552_v40 = vor.u32 %v4572_v34, %v3551_v33  ;;  %v3999_v19 = vld [vmem:[#allocation2 + $0x6e8] sm:$0xf]  ;;  %v4128_v30 = vor.u32 %v4716_v22, %v4127_v21  ;;  %v4680_v34 = vld [vmem:[#allocation2 + $0x6d4] sm:$0xf0]  ;;  %v4518_v21 = vld [vmem:[#allocation2 + $0x1cc] sm:$0xf] }
  0xf3   :  { %v4000_v29 = vor.u32 %v4684_v20, %v3999_v19  ;;  %v3983_v33 = vld [vmem:[#allocation2 + $0x6c8] sm:$0xf]  ;;  %v4486_v19 = vld [vmem:[#allocation2 + $0xcc] sm:$0xf]  ;;  %v3217_v20 = vld [vmem:[#allocation2 + $0xd8] sm:$0xf0] }
  0xf4   :  { %v3345_v22 = vld [vmem:[#allocation2 + $0x1d8] sm:$0xf0] }
  0xf5   :  { %2063 = vmatpush.bf16.msrb.mxu0 %v3168_v41  ;;  %2076 = vmatpush.bf16.msrb.mxu1 %v3296_v42  ;;  %v3407_v41 = vld [vmem:[#allocation2 + $0x248] sm:$0xf]  ;;  %v4536_v42 = vld [vmem:[#allocation2 + $0x254] sm:$0xf0] }
  0xf6   :  { %2085 = vmatpush.bf16.msrb.mxu2 %v3488_v45  ;;  %2098 = vmatpush.bf16.msrb.mxu3 %v3616_v46  ;;  %v3535_v45 = vld [vmem:[#allocation2 + $0x348] sm:$0xf]  ;;  %v4568_v46 = vld [vmem:[#allocation2 + $0x354] sm:$0xf0]  ;;  %v3408_v51 = vor.u32 %v4536_v42, %v3407_v41  ;;  %v3984_v41 = vor.u32 %v4680_v34, %v3983_v33  ;;  %v4112_v42 = vor.u32 %v4712_v36, %v4111_v35  ;;  %v4514_v33 = vld [vmem:[#allocation2 + $0x1ac] sm:$0xf] }
  0xf7   :  { %2041 = vmatmul.bf16.vlgmr.msra.gmra.mxu2 %v5052_v15  ;;  %2054 = vmatmul.bf16.vlgmr.msra.gmra.mxu3 %v5054_v10  ;;  %v3536_v52 = vor.u32 %v4568_v46, %v3535_v45  ;;  %v3967_v45 = vld [vmem:[#allocation2 + $0x6a8] sm:$0xf]  ;;  %v4676_v46 = vld [vmem:[#allocation2 + $0x6b4] sm:$0xf0]  ;;  %v3329_v34 = vld [vmem:[#allocation2 + $0x1b8] sm:$0xf0] }
  0xf9   :  { %2064 = vmatpush.bf16.msrb.mxu0 %v3152_v53  ;;  %2077 = vmatpush.bf16.msrb.mxu1 %v3280_v54  ;;  %v3391_v53 = vld [vmem:[#allocation2 + $0x228] sm:$0xf]  ;;  %v4532_v54 = vld [vmem:[#allocation2 + $0x234] sm:$0xf0] }
  0xfa   :  { %2086 = vmatpush.bf16.msrb.mxu2 %v3472_v57  ;;  %2099 = vmatpush.bf16.msrb.mxu3 %v3600_v60  ;;  %v3519_v57 = vld [vmem:[#allocation2 + $0x328] sm:$0xf]  ;;  %v4564_v60 = vld [vmem:[#allocation2 + $0x334] sm:$0xf0]  ;;  %v3392_v8 = vor.u32 %v4532_v54, %v3391_v53  ;;  %v3968_v54 = vor.u32 %v4676_v46, %v3967_v45  ;;  %v4478_v46 = vld [vmem:[#allocation2 + $0x8c] sm:$0xf] }
  0xfb   :  { %v3520_v3 = vor.u32 %v4564_v60, %v3519_v57  ;;  %v3759_v53 = vld [vmem:[#allocation2 + $0x508] sm:$0xf]  ;;  %v4672_v60 = vld [vmem:[#allocation2 + $0x694] sm:$0xf0] }
  0xfc   :  { %v3951_v57 = vld [vmem:[#allocation2 + $0x688] sm:$0xf]  ;;  %v4692_v45 = vld [vmem:[#allocation2 + $0x734] sm:$0xf0] }
  0xfd   :  { %2065 = vmatpush.bf16.msrb.mxu0 %v3136_v4  ;;  %2078 = vmatpush.bf16.msrb.mxu1 %v3264_v7  ;;  %v3375_v4 = vld [vmem:[#allocation2 + $0x208] sm:$0xf]  ;;  %v4528_v7 = vld [vmem:[#allocation2 + $0x214] sm:$0xf0] }
  0xfe   :  { %2087 = vmatpush.bf16.msrb.mxu2 %v3456_v14  ;;  %2100 = vmatpush.bf16.msrb.mxu3 %v3584_v11  ;;  %v4560_v14 = vld [vmem:[#allocation2 + $0x314] sm:$0xf0]  ;;  %v3679_v11 = vld [vmem:[#allocation2 + $0x468] sm:$0xf]  ;;  %v3376_v23 = vor.u32 %v4528_v7, %v3375_v4 }
  0xff   :  { %v3504_v24 = vor.u32 %v4560_v14, %v3503_v9  ;;  %v3952_v9 = vor.u32 %v4672_v60, %v3951_v57  ;;  %v4668_v14 = vld [vmem:[#allocation2 + $0x674] sm:$0xf0]  ;;  %v4474_v60 = vld [vmem:[#allocation2 + $0x6c] sm:$0xf] }
 0x100   :  { %v4688_v57 = vld [vmem:[#allocation2 + $0x714] sm:$0xf0] }
 0x101   :  { %2066 = vmatpush.bf16.msrb.mxu0 %v3120_v25  ;;  %2079 = vmatpush.bf16.msrb.mxu1 %v3248_v26  ;;  %v3680_v25 = vor.u32 %v4604_v16, %v3679_v11  ;;  %v3808_v26 = vor.u32 %v4636_v18, %v3807_v17  ;;  %v3236_v11 = vor.u32 %v4490_v1, %v3233_v2  ;;  %v4063_v17 = vld [vmem:[#allocation2 + $0x768] sm:$0xf]  ;;  %v4700_v18 = vld [vmem:[#allocation2 + $0x774] sm:$0xf0]  ;;  %v3297_v1 = vld [vmem:[#allocation2 + $0x178] sm:$0xf0] }
 0x102   :  { %2088 = vmatpush.bf16.msrb.mxu2 %v3440_v27  ;;  %2101 = vmatpush.bf16.msrb.mxu3 %v3568_v28  ;;  %v3663_v27 = vld [vmem:[#allocation2 + $0x448] sm:$0xf]  ;;  %v4600_v28 = vld [vmem:[#allocation2 + $0x454] sm:$0xf0]  ;;  %v4554_v2 = vld [vmem:[#allocation2 + $0x2ec] sm:$0xf] }
 0x103   :  { %v3664_v37 = vor.u32 %v4600_v28, %v3663_v27  ;;  %v3220_v27 = vor.u32 %v4486_v19, %v3217_v20  ;;  %v3348_v28 = vor.u32 %v4518_v21, %v3345_v22  ;;  %v4502_v20 = vld [vmem:[#allocation2 + $0x14c] sm:$0xf]  ;;  %v3281_v21 = vld [vmem:[#allocation2 + $0x158] sm:$0xf0] }
 0x104   :  { %2067 = vmatmul.bf16.vlgmr.msrb.gmra.mxu0 %v5023_v5  ;;  %2080 = vmatmul.bf16.vlgmr.msrb.gmra.mxu1 %v5025_v6  ;;  %v4550_v22 = vld [vmem:[#allocation2 + $0x2cc] sm:$0xf] }
 0x105   :  { %2111 = vmatpush.bf16.msra.mxu0 %v3744_v31  ;;  %2124 = vmatpush.bf16.msra.mxu1 %v3872_v32  ;;  %v3791_v31 = vld [vmem:[#allocation2 + $0x548] sm:$0xf]  ;;  %v4632_v32 = vld [vmem:[#allocation2 + $0x554] sm:$0xf0] }
 0x106   :  { %2089 = vmatpush.bf16.msrb.mxu2 %v3424_v39  ;;  %2102 = vmatpush.bf16.msrb.mxu3 %v3552_v40  ;;  %v3792_v38 = vor.u32 %v4632_v32, %v3791_v31  ;;  %v3647_v39 = vld [vmem:[#allocation2 + $0x428] sm:$0xf]  ;;  %v4596_v40 = vld [vmem:[#allocation2 + $0x434] sm:$0xf0]  ;;  %v4482_v31 = vld [vmem:[#allocation2 + $0xac] sm:$0xf] }
 0x107   :  { %v3648_v49 = vor.u32 %v4596_v40, %v3647_v39  ;;  %v3201_v32 = vld [vmem:[#allocation2 + $0xb8] sm:$0xf0]  ;;  %v3903_v39 = vld [vmem:[#allocation2 + $0x628] sm:$0xf]  ;;  %v4660_v40 = vld [vmem:[#allocation2 + $0x634] sm:$0xf0] }
 0x109   :  { %2112 = vmatpush.bf16.msra.mxu0 %v3728_v43  ;;  %2125 = vmatpush.bf16.msra.mxu1 %v3856_v44  ;;  %v3775_v43 = vld [vmem:[#allocation2 + $0x528] sm:$0xf]  ;;  %v4628_v44 = vld [vmem:[#allocation2 + $0x534] sm:$0xf0] }
 0x10a   :  { %2090 = vmatpush.bf16.msrb.mxu2 %v3408_v51  ;;  %2103 = vmatpush.bf16.msrb.mxu3 %v3536_v52  ;;  %v3776_v50 = vor.u32 %v4628_v44, %v3775_v43  ;;  %v3631_v51 = vld [vmem:[#allocation2 + $0x408] sm:$0xf]  ;;  %v4592_v52 = vld [vmem:[#allocation2 + $0x414] sm:$0xf0] }
 0x10b   :  { %v3632_v4 = vor.u32 %v4592_v52, %v3631_v51  ;;  %v4031_v44 = vld [vmem:[#allocation2 + $0x728] sm:$0xf] }
 0x10c   :  { %v4032_v51 = vor.u32 %v4692_v45, %v4031_v44  ;;  %v3887_v52 = vld [vmem:[#allocation2 + $0x608] sm:$0xf]  ;;  %v3121_v44 = vld [vmem:[#allocation2 + $0x18] sm:$0xf0]  ;;  %v4494_v45 = vld [vmem:[#allocation2 + $0x10c] sm:$0xf] }
 0x10d   :  { %2113 = vmatpush.bf16.msra.mxu0 %v3712_v55  ;;  %2126 = vmatpush.bf16.msra.mxu1 %v3840_v56  ;;  %v4096_v55 = vor.u32 %v4708_v48, %v4095_v47  ;;  %v4624_v56 = vld [vmem:[#allocation2 + $0x514] sm:$0xf0]  ;;  %v3185_v47 = vld [vmem:[#allocation2 + $0x98] sm:$0xf0]  ;;  %v4510_v48 = vld [vmem:[#allocation2 + $0x18c] sm:$0xf] }
 0x10e   :  { %2091 = vmatpush.bf16.msrb.mxu2 %v3392_v8  ;;  %2104 = vmatpush.bf16.msrb.mxu3 %v3520_v3  ;;  %v4522_v8 = vld [vmem:[#allocation2 + $0x1ec] sm:$0xf]  ;;  %v3361_v3 = vld [vmem:[#allocation2 + $0x1f8] sm:$0xf0]  ;;  %v3760_v7 = vor.u32 %v4624_v56, %v3759_v53  ;;  %v4656_v53 = vld [vmem:[#allocation2 + $0x614] sm:$0xf0] }
 0x10f   :  { %v3364_v16 = vor.u32 %v4522_v8, %v3361_v3  ;;  %v3489_v8 = vld [vmem:[#allocation2 + $0x2f8] sm:$0xf0]  ;;  %v4586_v3 = vld [vmem:[#allocation2 + $0x3ec] sm:$0xf] }
 0x111   :  { %2114 = vmatpush.bf16.msra.mxu0 %v3696_v12  ;;  %2127 = vmatpush.bf16.msra.mxu1 %v3824_v13  ;;  %v4080_v12 = vor.u32 %v4704_v0, %v4079_v61  ;;  %v3935_v13 = vld [vmem:[#allocation2 + $0x668] sm:$0xf]  ;;  %v3169_v61 = vld [vmem:[#allocation2 + $0x78] sm:$0xf0]  ;;  %v4506_v0 = vld [vmem:[#allocation2 + $0x16c] sm:$0xf] }
 0x112   :  { %2092 = vmatpush.bf16.msrb.mxu2 %v3376_v23  ;;  %2105 = vmatpush.bf16.msrb.mxu3 %v3504_v24  ;;  %v3936_v23 = vor.u32 %v4668_v14, %v3935_v13  ;;  %v4064_v24 = vor.u32 %v4700_v18, %v4063_v17  ;;  %v3172_v14 = vor.u32 %v4474_v60, %v3169_v61  ;;  %v3153_v17 = vld [vmem:[#allocation2 + $0x58] sm:$0xf0] }
 0x113   :  { %v3492_v18 = vor.u32 %v4554_v2, %v3489_v8  ;;  %v4538_v8 = vld [vmem:[#allocation2 + $0x26c] sm:$0xf] }
 0x115   :  { %2115 = vmatpush.bf16.msra.mxu0 %v3680_v25  ;;  %2128 = vmatpush.bf16.msra.mxu1 %v3808_v26  ;;  %v3919_v25 = vld [vmem:[#allocation2 + $0x648] sm:$0xf]  ;;  %v4664_v26 = vld [vmem:[#allocation2 + $0x654] sm:$0xf0] }
 0x116   :  { %2137 = vmatpush.bf16.msra.mxu2 %v4000_v29  ;;  %2150 = vmatpush.bf16.msra.mxu3 %v4128_v30  ;;  %v4047_v29 = vld [vmem:[#allocation2 + $0x748] sm:$0xf]  ;;  %v4696_v30 = vld [vmem:[#allocation2 + $0x754] sm:$0xf0]  ;;  %v3920_v35 = vor.u32 %v4664_v26, %v3919_v25  ;;  %v3601_v25 = vld [vmem:[#allocation2 + $0x3d8] sm:$0xf0] }
 0x117   :  { %2093 = vmatmul.bf16.vlgmr.msrb.gmra.mxu2 %v5040_v62  ;;  %2106 = vmatmul.bf16.vlgmr.msrb.gmra.mxu3 %v5042_v63  ;;  %v4048_v36 = vor.u32 %v4696_v30, %v4047_v29  ;;  %v3137_v29 = vld [vmem:[#allocation2 + $0x38] sm:$0xf0] }
 0x119   :  { %2116 = vmatpush.bf16.msra.mxu0 %v3664_v37  ;;  %2129 = vmatpush.bf16.msra.mxu1 %v3792_v38 }
 0x11a   :  { %2138 = vmatpush.bf16.msra.mxu2 %v3984_v41  ;;  %2151 = vmatpush.bf16.msra.mxu3 %v4112_v42  ;;  %v3204_v41 = vor.u32 %v4482_v31, %v3201_v32  ;;  %v3332_v42 = vor.u32 %v4514_v33, %v3329_v34  ;;  %v4498_v32 = vld [vmem:[#allocation2 + $0x12c] sm:$0xf]  ;;  %v3265_v33 = vld [vmem:[#allocation2 + $0x138] sm:$0xf0] }
 0x11b   :  { %v4546_v34 = vld [vmem:[#allocation2 + $0x2ac] sm:$0xf] }
 0x11d   :  { %2117 = vmatpush.bf16.msra.mxu0 %v3648_v49  ;;  %2130 = vmatpush.bf16.msra.mxu1 %v3776_v50  ;;  %v3313_v49 = vld [vmem:[#allocation2 + $0x198] sm:$0xf0]  ;;  %v3904_v50 = vor.u32 %v4660_v40, %v3903_v39  ;;  %v3268_v39 = vor.u32 %v4498_v32, %v3265_v33 }
 0x11e   :  { %2139 = vmatpush.bf16.msra.mxu2 %v3968_v54  ;;  %2152 = vmatpush.bf16.msra.mxu3 %v4096_v55  ;;  %v4015_v54 = vld [vmem:[#allocation2 + $0x708] sm:$0xf]  ;;  %v3188_v55 = vor.u32 %v4478_v46, %v3185_v47  ;;  %v3316_v56 = vor.u32 %v4510_v48, %v3313_v49  ;;  %v3249_v48 = vld [vmem:[#allocation2 + $0x118] sm:$0xf0]  ;;  %v4542_v49 = vld [vmem:[#allocation2 + $0x28c] sm:$0xf] }
 0x11f   :  { %v3252_v60 = vor.u32 %v4494_v45, %v3249_v48  ;;  %v3841_v32 = vld [vmem:[#allocation2 + $0x5b8] sm:$0xf0] }
 0x120   :  { %v1860_v37 = vpop.f32.mrf.mxu0  ;;  %v1873_v38 = vpop.f32.mrf.mxu1  ;;  %v3697_v45 = vld [vmem:[#allocation2 + $0x498] sm:$0xf0] }
 0x121   :  { %2118 = vmatpush.bf16.msra.mxu0 %v3632_v4  ;;  %2131 = vmatpush.bf16.msra.mxu1 %v3760_v7  ;;  %v5072_v43 = vadd.f32 %v1873_v38, %v1860_v37  ;;  %v3617_v4 = vld [vmem:[#allocation2 + $0x3f8] sm:$0xf0]  ;;  %v3888_v7 = vor.u32 %v4656_v53, %v3887_v52  ;;  %v4618_v53 = vld [vmem:[#allocation2 + $0x4ec] sm:$0xf] }
 0x122   :  { %2140 = vmatpush.bf16.msra.mxu2 %v3952_v9  ;;  %2153 = vmatpush.bf16.msra.mxu3 %v4080_v12  ;;  %v4016_v9 = vor.u32 %v4688_v57, %v4015_v54  ;;  %v3620_v19 = vor.u32 %v4586_v3, %v3617_v4  ;;  %v3585_v37 = vld [vmem:[#allocation2 + $0x3b8] sm:$0xf0] }
 0x123   :  { %v3569_v52 = vld [vmem:[#allocation2 + $0x398] sm:$0xf0] }
 0x124   :  { %2119 = vmatmul.bf16.vlgmr.msra.gmra.mxu0 %v5036_v58  ;;  %2132 = vmatmul.bf16.vlgmr.msra.gmra.mxu1 %v5038_v59  ;;  %v3745_v54 = vld [vmem:[#allocation2 + $0x4f8] sm:$0xf0] }
 0x125   :  { %2163 = vmatpush.bf16.msrb.mxu0 %v3236_v11  ;;  %2176 = vmatpush.bf16.msrb.mxu1 %v3364_v16  ;;  %v3300_v11 = vor.u32 %v4506_v0, %v3297_v1  ;;  %v4470_v16 = vld [vmem:[#allocation2 + $0x4c] sm:$0xf]  ;;  %v3425_v3 = vld [vmem:[#allocation2 + $0x278] sm:$0xf0]  ;;  %v3748_v4 = vor.u32 %v4618_v53, %v3745_v54 }
 0x126   :  { %2141 = vmatpush.bf16.msra.mxu2 %v3936_v23  ;;  %2154 = vmatpush.bf16.msra.mxu3 %v4064_v24  ;;  %v3473_v23 = vld [vmem:[#allocation2 + $0x2d8] sm:$0xf0]  ;;  %v4582_v24 = vld [vmem:[#allocation2 + $0x3cc] sm:$0xf]  ;;  %v3156_v26 = vor.u32 %v4470_v16, %v3153_v17 }
 0x127   :  { %v3476_v30 = vor.u32 %v4550_v22, %v3473_v23  ;;  %v3604_v31 = vor.u32 %v4582_v24, %v3601_v25  ;;  %v4646_v16 = vld [vmem:[#allocation2 + $0x5cc] sm:$0xf]  ;;  %v3857_v17 = vld [vmem:[#allocation2 + $0x5d8] sm:$0xf0] }
 0x128   :  { %v1862_v12 = vpop.f32.mrf.mxu0  ;;  %v1875_v13 = vpop.f32.mrf.mxu1  ;;  %v4534_v23 = vld [vmem:[#allocation2 + $0x24c] sm:$0xf]  ;;  %v3409_v24 = vld [vmem:[#allocation2 + $0x258] sm:$0xf0] }
 0x129   :  { %2164 = vmatpush.bf16.msrb.mxu0 %v3220_v27  ;;  %2177 = vmatpush.bf16.msrb.mxu1 %v3348_v28  ;;  %v3284_v27 = vor.u32 %v4502_v20, %v3281_v21  ;;  %v4466_v28 = vld [vmem:[#allocation2 + $0x2c] sm:$0xf]  ;;  %v3553_v13 = vld [vmem:[#allocation2 + $0x378] sm:$0xf0]  ;;  %v3428_v21 = vor.u32 %v4538_v8, %v3425_v3 }
 0x12a   :  { %2142 = vmatpush.bf16.msra.mxu2 %v3920_v35  ;;  %2155 = vmatpush.bf16.msra.mxu3 %v4048_v36  ;;  %v3457_v35 = vld [vmem:[#allocation2 + $0x2b8] sm:$0xf0]  ;;  %v4578_v36 = vld [vmem:[#allocation2 + $0x3ac] sm:$0xf]  ;;  %v3140_v38 = vor.u32 %v4466_v28, %v3137_v29 }
 0x12b   :  { %v3460_v46 = vor.u32 %v4546_v34, %v3457_v35  ;;  %v3588_v47 = vor.u32 %v4578_v36, %v3585_v37  ;;  %v4570_v12 = vld [vmem:[#allocation2 + $0x36c] sm:$0xf]  ;;  %v3537_v28 = vld [vmem:[#allocation2 + $0x358] sm:$0xf0]  ;;  %v3412_v34 = vor.u32 %v4534_v23, %v3409_v24 }
 0x12c   :  { %v3556_v22 = vor.u32 %v4570_v12, %v3553_v13  ;;  %v4610_v29 = vld [vmem:[#allocation2 + $0x4ac] sm:$0xf]  ;;  %v4129_v3 = vld [vmem:[#allocation2 + $0x7f8] sm:$0xf0] }
 0x12d   :  { %2165 = vmatpush.bf16.msrb.mxu0 %v3204_v41  ;;  %2178 = vmatpush.bf16.msrb.mxu1 %v3332_v42  ;;  %v4462_v42 = vld [vmem:[#allocation2 + $0xc] sm:$0xf]  ;;  %v4113_v24 = vld [vmem:[#allocation2 + $0x7d8] sm:$0xf0] }
 0x12e   :  { %2143 = vmatpush.bf16.msra.mxu2 %v3904_v50  ;;  %2156 = vmatpush.bf16.msra.mxu3 %v4032_v51  ;;  %v3441_v50 = vld [vmem:[#allocation2 + $0x298] sm:$0xf0]  ;;  %v4574_v51 = vld [vmem:[#allocation2 + $0x38c] sm:$0xf]  ;;  %v3124_v57 = vor.u32 %v4462_v42, %v3121_v44 }
 0x12f   :  { %v3444_v61 = vor.u32 %v4542_v49, %v3441_v50  ;;  %v3572_v0 = vor.u32 %v4574_v51, %v3569_v52  ;;  %v3521_v44 = vld [vmem:[#allocation2 + $0x338] sm:$0xf0]  ;;  %v4526_v51 = vld [vmem:[#allocation2 + $0x20c] sm:$0xf] }
 0x130   :  { %v3377_v52 = vld [vmem:[#allocation2 + $0x218] sm:$0xf0]  ;;  %v4558_v53 = vld [vmem:[#allocation2 + $0x30c] sm:$0xf] }
 0x131   :  { %2166 = vmatpush.bf16.msrb.mxu0 %v3188_v55  ;;  %2179 = vmatpush.bf16.msrb.mxu1 %v3316_v56  ;;  %v1912_v40 = vpop.f32.mrf.mxu0  ;;  %v1925_v41 = vpop.f32.mrf.mxu1  ;;  %v4650_v55 = vld [vmem:[#allocation2 + $0x5ec] sm:$0xf]  ;;  %v3873_v56 = vld [vmem:[#allocation2 + $0x5f8] sm:$0xf0] }
 0x132   :  { %2144 = vmatpush.bf16.msra.mxu2 %v3888_v7  ;;  %2157 = vmatpush.bf16.msra.mxu3 %v4016_v9  ;;  %v3876_v7 = vor.u32 %v4650_v55, %v3873_v56  ;;  %v3505_v56 = vld [vmem:[#allocation2 + $0x318] sm:$0xf0]  ;;  %v4714_v8 = vld [vmem:[#allocation2 + $0x7ec] sm:$0xf] }
 0x133   :  { %v4710_v23 = vld [vmem:[#allocation2 + $0x7cc] sm:$0xf] }
 0x135   :  { %2167 = vmatpush.bf16.msrb.mxu0 %v3172_v14  ;;  %2180 = vmatpush.bf16.msrb.mxu1 %v3300_v11  ;;  %v4614_v14 = vld [vmem:[#allocation2 + $0x4cc] sm:$0xf]  ;;  %v3729_v11 = vld [vmem:[#allocation2 + $0x4d8] sm:$0xf0] }
 0x136   :  { %2189 = vmatpush.bf16.msrb.mxu2 %v3492_v18  ;;  %2202 = vmatpush.bf16.msrb.mxu3 %v3620_v19  ;;  %v1886_v1 = vpop.f32.mrf.mxu2  ;;  %v1899_v2 = vpop.f32.mrf.mxu3  ;;  %v3732_v25 = vor.u32 %v4614_v14, %v3729_v11  ;;  %v4598_v11 = vld [vmem:[#allocation2 + $0x44c] sm:$0xf] }
 0x137   :  { %2145 = vmatmul.bf16.vlgmr.msra.gmra.mxu2 %v5052_v15  ;;  %2158 = vmatmul.bf16.vlgmr.msra.gmra.mxu3 %v5054_v10  ;;  %v1887_v9 = vadd.f32 %v1886_v1, %v5072_v43  ;;  %v4682_v1 = vld [vmem:[#allocation2 + $0x6ec] sm:$0xf] }
 0x139   :  { %2168 = vmatpush.bf16.msrb.mxu0 %v3156_v26  ;;  %2181 = vmatpush.bf16.msrb.mxu1 %v3284_v27  ;;  %v1900_v18 = vadd.f32 %v1899_v2, %v1887_v9  ;;  %v1914_v19 = vpop.f32.mrf.mxu0  ;;  %v1927_v20 = vpop.f32.mrf.mxu1  ;;  %v3860_v26 = vor.u32 %v4646_v16, %v3857_v17  ;;  %v4566_v27 = vld [vmem:[#allocation2 + $0x34c] sm:$0xf]  ;;  %v4001_v2 = vld [vmem:[#allocation2 + $0x6f8] sm:$0xf0] }
 0x13a   :  { %2190 = vmatpush.bf16.msrb.mxu2 %v3476_v30  ;;  %2203 = vmatpush.bf16.msrb.mxu3 %v3604_v31  ;;  %v3713_v30 = vld [vmem:[#allocation2 + $0x4b8] sm:$0xf0]  ;;  %v4642_v31 = vld [vmem:[#allocation2 + $0x5ac] sm:$0xf]  ;;  %v3540_v35 = vor.u32 %v4566_v27, %v3537_v28  ;;  %v4004_v17 = vor.u32 %v4682_v1, %v4001_v2 }
 0x13b   :  { %v1913_v43 = vadd.f32 %v1912_v40, %v1900_v18  ;;  %v3716_v40 = vor.u32 %v4610_v29, %v3713_v30  ;;  %v3844_v42 = vor.u32 %v4642_v31, %v3841_v32  ;;  %v3665_v16 = vld [vmem:[#allocation2 + $0x458] sm:$0xf0]  ;;  %v4132_v18 = vor.u32 %v4714_v8, %v4129_v3  ;;  %v4630_v19 = vld [vmem:[#allocation2 + $0x54c] sm:$0xf] }
 0x13c   :  { %v3793_v20 = vld [vmem:[#allocation2 + $0x558] sm:$0xf0]  ;;  %v4594_v28 = vld [vmem:[#allocation2 + $0x42c] sm:$0xf]  ;;  %v4116_v31 = vor.u32 %v4710_v23, %v4113_v24 }
 0x13d   :  { %2169 = vmatpush.bf16.msrb.mxu0 %v3140_v38  ;;  %2182 = vmatpush.bf16.msrb.mxu1 %v3268_v39  ;;  %v5079_v33 = vadd.f32 %v1925_v41, %v1913_v43  ;;  %v4530_v38 = vld [vmem:[#allocation2 + $0x22c] sm:$0xf]  ;;  %v3393_v39 = vld [vmem:[#allocation2 + $0x238] sm:$0xf0]  ;;  %v3796_v27 = vor.u32 %v4630_v19, %v3793_v20 }
 0x13e   :  { %2191 = vmatpush.bf16.msrb.mxu2 %v3460_v46  ;;  %2204 = vmatpush.bf16.msrb.mxu3 %v3588_v47  ;;  %v1888_v36 = vpop.f32.mrf.mxu2  ;;  %v1901_v37 = vpop.f32.mrf.mxu3  ;;  %v4638_v46 = vld [vmem:[#allocation2 + $0x58c] sm:$0xf]  ;;  %v3825_v47 = vld [vmem:[#allocation2 + $0x598] sm:$0xf0]  ;;  %v3396_v41 = vor.u32 %v4530_v38, %v3393_v39 }
 0x13f   :  { %v3828_v55 = vor.u32 %v4638_v46, %v3825_v47  ;;  %v3649_v29 = vld [vmem:[#allocation2 + $0x438] sm:$0xf0]  ;;  %v4626_v32 = vld [vmem:[#allocation2 + $0x52c] sm:$0xf] }
 0x140   :  { %v3969_v36 = vld [vmem:[#allocation2 + $0x6b8] sm:$0xf0]  ;;  %v4706_v37 = vld [vmem:[#allocation2 + $0x7ac] sm:$0xf]  ;;  %v3652_v39 = vor.u32 %v4594_v28, %v3649_v29  ;;  %v4744_v28 = vld [vmem:[#allocation5 + $0xd4] sm:$0xf0] }
 0x141   :  { %2170 = vmatpush.bf16.msrb.mxu0 %v3124_v57  ;;  %2183 = vmatpush.bf16.msrb.mxu1 %v3252_v60  ;;  %v5081_v49 = vpop.f32.mrf.mxu0  ;;  %v5083_v50 = vpop.f32.mrf.mxu1  ;;  %v4602_v57 = vld [vmem:[#allocation2 + $0x46c] sm:$0xf]  ;;  %v3681_v60 = vld [vmem:[#allocation2 + $0x478] sm:$0xf0] }
 0x142   :  { %2192 = vmatpush.bf16.msrb.mxu2 %v3444_v61  ;;  %2205 = vmatpush.bf16.msrb.mxu3 %v3572_v0  ;;  %v4634_v61 = vld [vmem:[#allocation2 + $0x56c] sm:$0xf]  ;;  %v3809_v0 = vld [vmem:[#allocation2 + $0x578] sm:$0xf0]  ;;  %v3684_v9 = vor.u32 %v4602_v57, %v3681_v60 }
 0x143   :  { %v3812_v12 = vor.u32 %v4634_v61, %v3809_v0  ;;  %v4097_v38 = vld [vmem:[#allocation2 + $0x7b8] sm:$0xf0]  ;;  %v4666_v0 = vld [vmem:[#allocation2 + $0x66c] sm:$0xf] }
 0x144   :  { %2171 = vmatmul.bf16.vlgmr.msrb.gmra.mxu0 %v5023_v5  ;;  %2184 = vmatmul.bf16.vlgmr.msrb.gmra.mxu1 %v5025_v6  ;;  %v4562_v5 = vld [vmem:[#allocation2 + $0x32c] sm:$0xf]  ;;  %v4100_v47 = vor.u32 %v4706_v37, %v4097_v38  ;;  %v3937_v1 = vld [vmem:[#allocation2 + $0x678] sm:$0xf0]  ;;  %v4167_v38 = vld [vmem:[#allocation5 + $0x40] sm:$0xf] }
 0x145   :  { %2215 = vmatpush.bf16.msra.mxu0 %v3748_v4  ;;  %2228 = vmatpush.bf16.msra.mxu1 %v3876_v7  ;;  %v4606_v6 = vld [vmem:[#allocation2 + $0x48c] sm:$0xf]  ;;  %v3524_v48 = vor.u32 %v4562_v5, %v3521_v44  ;;  %v3380_v4 = vor.u32 %v4526_v51, %v3377_v52  ;;  %v3508_v7 = vor.u32 %v4558_v53, %v3505_v56  ;;  %v4081_v51 = vld [vmem:[#allocation2 + $0x798] sm:$0xf0]  ;;  %v4191_v52 = vld [vmem:[#allocation5 + $0x70] sm:$0xf] }
 0x146   :  { %2193 = vmatpush.bf16.msrb.mxu2 %v3428_v21  ;;  %2206 = vmatpush.bf16.msrb.mxu3 %v3556_v22  ;;  %v3700_v54 = vor.u32 %v4606_v6, %v3697_v45  ;;  %v5085_v13 = vpop.f32.mrf.mxu2  ;;  %v5087_v14 = vpop.f32.mrf.mxu3  ;;  %v4678_v21 = vld [vmem:[#allocation2 + $0x6cc] sm:$0xf]  ;;  %v3985_v22 = vld [vmem:[#allocation2 + $0x6d8] sm:$0xf0]  ;;  %v4732_v53 = vld [vmem:[#allocation5 + $0x74] sm:$0xf0] }
 0x147   :  { %v3988_v30 = vor.u32 %v4678_v21, %v3985_v22  ;;  %v4590_v44 = vld [vmem:[#allocation2 + $0x40c] sm:$0xf]  ;;  %v3633_v6 = vld [vmem:[#allocation2 + $0x418] sm:$0xf0]  ;;  %v4192_v3 = vor.u32 %v4732_v53, %v4191_v52  ;;  %v4724_v52 = vld [vmem:[#allocation5 + $0x34] sm:$0xf0] }
 0x148   :  { %v4622_v45 = vld [vmem:[#allocation2 + $0x50c] sm:$0xf]  ;;  %v3636_v56 = vor.u32 %v4590_v44, %v3633_v6  ;;  %v4065_v8 = vld [vmem:[#allocation2 + $0x778] sm:$0xf0]  ;;  %v4223_v53 = vld [vmem:[#allocation5 + $0xb0] sm:$0xf] }
 0x149   :  { %2216 = vmatpush.bf16.msra.mxu0 %v3732_v25  ;;  %2229 = vmatpush.bf16.msra.mxu1 %v3860_v26  ;;  %v1966_v43 = vpop.f32.mrf.mxu0  ;;  %v1979_v25 = vpop.f32.mrf.mxu1  ;;  %v3668_v26 = vor.u32 %v4598_v11, %v3665_v16  ;;  %v4698_v2 = vld [vmem:[#allocation2 + $0x76c] sm:$0xf]  ;;  %v4746_v11 = vld [vmem:[#allocation5 + $0xe4] sm:$0xf0]  ;;  %v3940_v16 = vor.u32 %v4666_v0, %v3937_v1  ;;  %v3921_v21 = vld [vmem:[#allocation2 + $0x658] sm:$0xf0] }
 0x14a   :  { %2194 = vmatpush.bf16.msrb.mxu2 %v3412_v34  ;;  %2207 = vmatpush.bf16.msrb.mxu3 %v3540_v35  ;;  %v3777_v34 = vld [vmem:[#allocation2 + $0x538] sm:$0xf0]  ;;  %v4674_v35 = vld [vmem:[#allocation2 + $0x6ac] sm:$0xf]  ;;  %v4175_v25 = vld [vmem:[#allocation5 + $0x50] sm:$0xf] }
 0x14b   :  { %v3972_v46 = vor.u32 %v4674_v35, %v3969_v36  ;;  %v4662_v20 = vld [vmem:[#allocation2 + $0x64c] sm:$0xf]  ;;  %v4049_v23 = vld [vmem:[#allocation2 + $0x758] sm:$0xf0]  ;;  %v4722_v0 = vld [vmem:[#allocation5 + $0x24] sm:$0xf0] }
 0x14c   :  { %v4694_v22 = vld [vmem:[#allocation2 + $0x74c] sm:$0xf]  ;;  %v3924_v29 = vor.u32 %v4662_v20, %v3921_v21  ;;  %v4033_v35 = vld [vmem:[#allocation2 + $0x738] sm:$0xf0]  ;;  %v4215_v1 = vld [vmem:[#allocation5 + $0xa0] sm:$0xf] }
 0x14d   :  { %2217 = vmatpush.bf16.msra.mxu0 %v3716_v40  ;;  %2230 = vmatpush.bf16.msra.mxu1 %v3844_v42  ;;  %v3780_v40 = vor.u32 %v4626_v32, %v3777_v34  ;;  %v3905_v32 = vld [vmem:[#allocation2 + $0x638] sm:$0xf0]  ;;  %v4690_v34 = vld [vmem:[#allocation2 + $0x72c] sm:$0xf]  ;;  %v4135_v21 = vld [vmem:[#allocation5] sm:$0xf] }
 0x14e   :  { %2195 = vmatpush.bf16.msrb.mxu2 %v3396_v41  ;;  %2208 = vmatpush.bf16.msrb.mxu3 %v3524_v48  ;;  %v1940_v42 = vpop.f32.mrf.mxu2  ;;  %v1953_v5 = vpop.f32.mrf.mxu3  ;;  %v3761_v41 = vld [vmem:[#allocation2 + $0x518] sm:$0xf0]  ;;  %v4036_v44 = vor.u32 %v4690_v34, %v4033_v35 }
 0x14f   :  { %v3953_v48 = vld [vmem:[#allocation2 + $0x698] sm:$0xf0]  ;;  %v3764_v57 = vor.u32 %v4622_v45, %v3761_v41  ;;  %v4686_v41 = vld [vmem:[#allocation2 + $0x70c] sm:$0xf] }
 0x151   :  { %2218 = vmatpush.bf16.msra.mxu0 %v3700_v54  ;;  %2231 = vmatpush.bf16.msra.mxu1 %v3828_v55  ;;  %v4255_v54 = vld [vmem:[#allocation5 + $0xf0] sm:$0xf]  ;;  %v4748_v55 = vld [vmem:[#allocation5 + $0xf4] sm:$0xf0] }
 0x152   :  { %2196 = vmatpush.bf16.msrb.mxu2 %v3380_v4  ;;  %2209 = vmatpush.bf16.msrb.mxu3 %v3508_v7  ;;  %v4256_v4 = vor.u32 %v4748_v55, %v4255_v54  ;;  %v4183_v7 = vld [vmem:[#allocation5 + $0x60] sm:$0xf]  ;;  %v4740_v54 = vld [vmem:[#allocation5 + $0xb4] sm:$0xf0] }
 0x155   :  { %2219 = vmatpush.bf16.msra.mxu0 %v3684_v9  ;;  %2232 = vmatpush.bf16.msra.mxu1 %v3812_v12  ;;  %v4730_v9 = vld [vmem:[#allocation5 + $0x64] sm:$0xf0]  ;;  %v4247_v12 = vld [vmem:[#allocation5 + $0xe0] sm:$0xf] }
 0x156   :  { %2241 = vmatpush.bf16.msra.mxu2 %v4004_v17  ;;  %2254 = vmatpush.bf16.msra.mxu3 %v4132_v18  ;;  %v4068_v17 = vor.u32 %v4698_v2, %v4065_v8  ;;  %v4184_v24 = vor.u32 %v4730_v9, %v4183_v7  ;;  %v4248_v43 = vor.u32 %v4746_v11, %v4247_v12  ;;  %v4738_v2 = vld [vmem:[#allocation5 + $0xa4] sm:$0xf0]  ;;  %v4143_v12 = vld [vmem:[#allocation5 + $0x10] sm:$0xf]  ;;  %v4720_v11 = vld [vmem:[#allocation5 + $0x14] sm:$0xf0] }
 0x157   :  { %2197 = vmatmul.bf16.vlgmr.msrb.gmra.mxu2 %v5040_v62  ;;  %2210 = vmatmul.bf16.vlgmr.msrb.gmra.mxu3 %v5042_v63  ;;  %v4670_v62 = vld [vmem:[#allocation2 + $0x68c] sm:$0xf]  ;;  %v4216_v9 = vor.u32 %v4738_v2, %v4215_v1 }
 0x158   :  { %v4702_v63 = vld [vmem:[#allocation2 + $0x78c] sm:$0xf]  ;;  %v3956_v60 = vor.u32 %v4670_v62, %v3953_v48  ;;  %v4017_v62 = vld [vmem:[#allocation2 + $0x718] sm:$0xf0] }
 0x159   :  { %2220 = vmatpush.bf16.msra.mxu0 %v3668_v26  ;;  %2233 = vmatpush.bf16.msra.mxu1 %v3796_v27  ;;  %v4084_v61 = vor.u32 %v4702_v63, %v4081_v51  ;;  %v4728_v26 = vld [vmem:[#allocation5 + $0x54] sm:$0xf0]  ;;  %v4239_v27 = vld [vmem:[#allocation5 + $0xd0] sm:$0xf] }
 0x15a   :  { %2242 = vmatpush.bf16.msra.mxu2 %v3988_v30  ;;  %2255 = vmatpush.bf16.msra.mxu3 %v4116_v31  ;;  %v5091_v18 = vpop.f32.mrf.mxu2  ;;  %v5093_v19 = vpop.f32.mrf.mxu3  ;;  %v4052_v30 = vor.u32 %v4694_v22, %v4049_v23  ;;  %v4658_v31 = vld [vmem:[#allocation2 + $0x62c] sm:$0xf]  ;;  %v4176_v36 = vor.u32 %v4728_v26, %v4175_v25  ;;  %v4240_v37 = vor.u32 %v4744_v28, %v4239_v27  ;;  %v4159_v51 = vld [vmem:[#allocation5 + $0x30] sm:$0xf]  ;;  %v4193_v25 = vld [vmem:[#allocation5 + $0x78] sm:$0xf0] }
 0x15b   :  { %v3908_v5 = vor.u32 %v4658_v31, %v3905_v32  ;;  %v4144_v22 = vor.u32 %v4720_v11, %v4143_v12  ;;  %v4747_v26 = vld [vmem:[#allocation5 + $0xf4] sm:$0xf]  ;;  %v2272_v28 = vld [vmem:[#allocation1] sm:$0xff] }
 0x15c   :  { %v2276_v31 = vpack.i.b16 %v2272_v28, %v2272_v28  ;;  %v4161_v11 = vld [vmem:[#allocation5 + $0x38] sm:$0xf0] }
 0x15d   :  { %2221 = vmatpush.bf16.msra.mxu0 %v3652_v39  ;;  %2234 = vmatpush.bf16.msra.mxu1 %v3780_v40  ;;  %v4726_v39 = vld [vmem:[#allocation5 + $0x44] sm:$0xf0] }
 0x15e   :  { %2243 = vmatpush.bf16.msra.mxu2 %v3972_v46  ;;  %2256 = vmatpush.bf16.msra.mxu3 %v4100_v47  ;;  %v4742_v40 = vld [vmem:[#allocation5 + $0xc4] sm:$0xf0]  ;;  %v4654_v46 = vld [vmem:[#allocation2 + $0x60c] sm:$0xf]  ;;  %v3889_v47 = vld [vmem:[#allocation2 + $0x618] sm:$0xf0]  ;;  %v4168_v48 = vor.u32 %v4726_v39, %v4167_v38 }
 0x15f   :  { %v3892_v55 = vor.u32 %v4654_v46, %v3889_v47  ;;  %v4745_v38 = vld [vmem:[#allocation5 + $0xe4] sm:$0xf]  ;;  %v4249_v39 = vld [vmem:[#allocation5 + $0xe8] sm:$0xf0]  ;;  %v4727_v46 = vld [vmem:[#allocation5 + $0x54] sm:$0xf] }
 0x161   :  { %2222 = vmatpush.bf16.msra.mxu0 %v3636_v56  ;;  %2235 = vmatpush.bf16.msra.mxu1 %v3764_v57  ;;  %v5099_v42 = vpop.f32.mrf.mxu1  ;;  %v4020_v56 = vor.u32 %v4686_v41, %v4017_v62  ;;  %v4160_v57 = vor.u32 %v4724_v52, %v4159_v51  ;;  %v4177_v41 = vld [vmem:[#allocation5 + $0x58] sm:$0xf0]  ;;  %v4743_v62 = vld [vmem:[#allocation5 + $0xd4] sm:$0xf]  ;;  %v4725_v51 = vld [vmem:[#allocation5 + $0x44] sm:$0xf] }
 0x162   :  { %2244 = vmatpush.bf16.msra.mxu2 %v3956_v60  ;;  %2257 = vmatpush.bf16.msra.mxu3 %v4084_v61  ;;  %v1992_v6 = vpop.f32.mrf.mxu2  ;;  %v2005_v45 = vpop.f32.mrf.mxu3  ;;  %v4224_v60 = vor.u32 %v4740_v54, %v4223_v53  ;;  %v4151_v61 = vld [vmem:[#allocation5 + $0x20] sm:$0xf] }
 0x163   :  { %v4152_v7 = vor.u32 %v4722_v0, %v4151_v61  ;;  %v4252_v45 = vor.u32 %v4745_v38, %v4249_v39  ;;  %v4201_v38 = vld [vmem:[#allocation5 + $0x88] sm:$0xf0] }
 0x164   :  { %2223 = vmatmul.bf16.vlgmr.msra.gmra.mxu0 %v5036_v58  ;;  %2236 = vmatmul.bf16.vlgmr.msra.gmra.mxu1 %v5038_v59  ;;  %v4231_v58 = vld [vmem:[#allocation5 + $0xc0] sm:$0xf]  ;;  %v5097_v59 = vpop.f32.mrf.mxu0 }
 0x165   :  { %2698 = vmatpush.bf16.msrb.mxu0 %v4192_v3  ;;  %2711 = vmatpush.bf16.msrb.mxu1 %v4256_v4  ;;  %v4232_v63 = vor.u32 %v4742_v40, %v4231_v58  ;;  %v1978_v4 = vadd.f32 %v5083_v50, %v5081_v49  ;;  %v4718_v49 = vld [vmem:[#allocation5 + $0x4] sm:$0xf0]  ;;  %v4199_v50 = vld [vmem:[#allocation5 + $0x80] sm:$0xf] }
 0x166   :  { %2245 = vmatpush.bf16.msra.mxu2 %v3940_v16  ;;  %2258 = vmatpush.bf16.msra.mxu3 %v4068_v17  ;;  %v4207_v16 = vld [vmem:[#allocation5 + $0x90] sm:$0xf]  ;;  %v4736_v17 = vld [vmem:[#allocation5 + $0x94] sm:$0xf0] }
 0x167   :  { %v1991_v20 = vadd.f32 %v5091_v18, %v1978_v4  ;;  %v4208_v23 = vor.u32 %v4736_v17, %v4207_v16  ;;  %v4257_v18 = vld [vmem:[#allocation5 + $0xf8] sm:$0xf0]  ;;  %v4739_v16 = vld [vmem:[#allocation5 + $0xb4] sm:$0xf] }
 0x168   :  { %v4260_v35 = vor.u32 %v4747_v26, %v4257_v18  ;;  %v4225_v17 = vld [vmem:[#allocation5 + $0xb8] sm:$0xf0]  ;;  %v4217_v26 = vld [vmem:[#allocation5 + $0xa8] sm:$0xf0] }
 0x169   :  { %2699 = vmatpush.bf16.msrb.mxu0 %v4184_v24  ;;  %2712 = vmatpush.bf16.msrb.mxu1 %v4248_v43  ;;  %v2031_v3 = vpop.f32.mrf.mxu1  ;;  %v4734_v24 = vld [vmem:[#allocation5 + $0x84] sm:$0xf0]  ;;  %v4731_v43 = vld [vmem:[#allocation5 + $0x74] sm:$0xf]  ;;  %v2004_v27 = vadd.f32 %v5093_v19, %v1991_v20  ;;  %v1939_v19 = vadd.f32 %v5085_v13, %v5079_v33  ;;  %v4180_v13 = vor.u32 %v4727_v46, %v4177_v41 }
 0x16a   :  { %2246 = vmatpush.bf16.msra.mxu2 %v3924_v29  ;;  %2259 = vmatpush.bf16.msra.mxu3 %v4052_v30  ;;  %v2273_v29 = vld [vmem:[#allocation1 + $0x9] sm:$0xff]  ;;  %v4200_v30 = vor.u32 %v4734_v24, %v4199_v50  ;;  %v4196_v34 = vor.u32 %v4731_v43, %v4193_v25  ;;  %v4153_v43 = vld [vmem:[#allocation5 + $0x28] sm:$0xf0] }
 0x16b   :  { %v2279_v32 = vpack.i.b16 %v2273_v29, %v2273_v29  ;;  %v4737_v25 = vld [vmem:[#allocation5 + $0xa4] sm:$0xf] }
 0x16c   :  { %v2018_v8 = vpop.f32.mrf.mxu0  ;;  %v4220_v18 = vor.u32 %v4737_v25, %v4217_v26  ;;  %v4772_v25 = vld [vmem:[#allocation5 + $0x1b4] sm:$0xf0]  ;;  %v4279_v26 = vld [vmem:[#allocation5 + $0x120] sm:$0xf] }
 0x16d   :  { %2700 = vmatpush.bf16.msrb.mxu0 %v4176_v36  ;;  %2713 = vmatpush.bf16.msrb.mxu1 %v4240_v37  ;;  %v4729_v36 = vld [vmem:[#allocation5 + $0x64] sm:$0xf]  ;;  %v4185_v37 = vld [vmem:[#allocation5 + $0x68] sm:$0xf0] }
 0x16e   :  { %2247 = vmatpush.bf16.msra.mxu2 %v3908_v5  ;;  %2260 = vmatpush.bf16.msra.mxu3 %v4036_v44  ;;  %v2278_v5 = vperm.slane %v2276_v31, 0  ;;  %v2281_v44 = vperm.slane %v2279_v32, 0  ;;  %v4188_v6 = vor.u32 %v4729_v36, %v4185_v37  ;;  %v4209_v31 = vld [vmem:[#allocation5 + $0x98] sm:$0xf0]  ;;  %v4137_v36 = vld [vmem:[#allocation5 + $0x8] sm:$0xf0] }
 0x16f   :  { %v4733_v37 = vld [vmem:[#allocation5 + $0x84] sm:$0xf] }
 0x170   :  { %v2292_v53 = vunpack.c.l.bf16 %v2278_v5  ;;  %v2293_v54 = vunpack.c.l.bf16 %v2281_v44 }
 0x171   :  { %2701 = vmatpush.bf16.msrb.mxu0 %v4168_v48  ;;  %2714 = vmatpush.bf16.msrb.mxu1 %v4232_v63  ;;  %v4241_v48 = vld [vmem:[#allocation5 + $0xd8] sm:$0xf0]  ;;  %v1952_v63 = vadd.f32 %v5087_v14, %v1939_v19  ;;  %v4204_v19 = vor.u32 %v4733_v37, %v4201_v38 }
 0x172   :  { %2248 = vmatpush.bf16.msra.mxu2 %v3892_v55  ;;  %2261 = vmatpush.bf16.msra.mxu3 %v4020_v56  ;;  %v4169_v55 = vld [vmem:[#allocation5 + $0x48] sm:$0xf0]  ;;  %v4741_v56 = vld [vmem:[#allocation5 + $0xc4] sm:$0xf] }
 0x173   :  { %v4172_v14 = vor.u32 %v4725_v51, %v4169_v55  ;;  %v4780_v51 = vld [vmem:[#allocation5 + $0x1f4] sm:$0xf0]  ;;  %v4311_v55 = vld [vmem:[#allocation5 + $0x160] sm:$0xf] }
 0x175   :  { %2702 = vmatpush.bf16.msrb.mxu0 %v4160_v57  ;;  %2715 = vmatpush.bf16.msrb.mxu1 %v4224_v60  ;;  %v4233_v57 = vld [vmem:[#allocation5 + $0xc8] sm:$0xf0] }
 0x176   :  { %2249 = vmatmul.bf16.vlgmr.msra.gmra.mxu2 %v5052_v15  ;;  %2262 = vmatmul.bf16.vlgmr.msra.gmra.mxu3 %v5054_v10  ;;  %v2017_v15 = vadd.f32 %v5097_v59, %v2004_v27  ;;  %v4136_v10 = vor.u32 %v4718_v49, %v4135_v21  ;;  %v4236_v4 = vor.u32 %v4741_v56, %v4233_v57  ;;  %v4721_v49 = vld [vmem:[#allocation5 + $0x24] sm:$0xf]  ;;  %v4762_v56 = vld [vmem:[#allocation5 + $0x164] sm:$0xf0]  ;;  %v4375_v57 = vld [vmem:[#allocation5 + $0x1e0] sm:$0xf] }
 0x177   :  { %v4156_v29 = vor.u32 %v4721_v49, %v4153_v43  ;;  %v4287_v49 = vld [vmem:[#allocation5 + $0x130] sm:$0xf] }
 0x178   :  { %v2030_v58 = vadd.f32 %v5099_v42, %v2017_v15  ;;  %v4244_v42 = vor.u32 %v4743_v62, %v4241_v48  ;;  %v4719_v15 = vld [vmem:[#allocation5 + $0x14] sm:$0xf] }
 0x179   :  { %2703 = vmatpush.bf16.msrb.mxu0 %v4152_v7  ;;  %2716 = vmatpush.bf16.msrb.mxu1 %v4216_v9  ;;  %v4723_v7 = vld [vmem:[#allocation5 + $0x34] sm:$0xf] }
 0x17a   :  { %v2042_v40 = vpop.f32.mrf.mxu2  ;;  %v2055_v59 = vpop.f32.mrf.mxu3 }
 0x17b   :  { %v2043_v47 = vadd.f32 %v2042_v40, %v2030_v58 }
 0x17d   :  { %2704 = vmatpush.bf16.msrb.mxu0 %v4144_v22  ;;  %2717 = vmatpush.bf16.msrb.mxu1 %v4208_v23  ;;  %v2056_v33 = vadd.f32 %v2055_v59, %v2043_v47  ;;  %v4164_v22 = vor.u32 %v4723_v7, %v4161_v11  ;;  %v4228_v23 = vor.u32 %v4739_v16, %v4225_v17  ;;  %v4295_v16 = vld [vmem:[#allocation5 + $0x140] sm:$0xf]  ;;  %v4758_v17 = vld [vmem:[#allocation5 + $0x144] sm:$0xf0] }
 0x17f   :  { %v2267_v52 = vpack.c.bf16 %v2056_v33, %v1952_v63  ;;  %v4319_v63 = vld [vmem:[#allocation5 + $0x170] sm:$0xf]  ;;  %v4764_v33 = vld [vmem:[#allocation5 + $0x174] sm:$0xf0] }
 0x181   :  { %2705 = vmatpush.bf16.msrb.mxu0 %v4136_v10  ;;  %2718 = vmatpush.bf16.msrb.mxu1 %v4200_v30  ;;  %v2288_v60 = vunpack.c.l.bf16 %v2267_v52  ;;  %v2289_v61 = vunpack.c.h.bf16 %v2267_v52  ;;  %v2068_v0 = vpop.f32.mrf.mxu0  ;;  %v2081_v1 = vpop.f32.mrf.mxu1  ;;  %v4145_v10 = vld [vmem:[#allocation5 + $0x18] sm:$0xf0]  ;;  %v4735_v30 = vld [vmem:[#allocation5 + $0x94] sm:$0xf] }
 0x182   :  { %v2082_v2 = vadd.f32 %v2081_v1, %v2068_v0  ;;  %v2044_v8 = vpop.f32.mrf.mxu2  ;;  %v2057_v3 = vpop.f32.mrf.mxu3  ;;  %v4148_v32 = vor.u32 %v4719_v15, %v4145_v10  ;;  %v4303_v1 = vld [vmem:[#allocation5 + $0x150] sm:$0xf] }
 0x183   :  { %v2296_v9 = vadd.f32 %v2292_v53, %v2288_v60  ;;  %v2297_v12 = vadd.f32 %v2293_v54, %v2289_v61  ;;  %v4312_v60 = vor.u32 %v4762_v56, %v4311_v55  ;;  %v4778_v61 = vld [vmem:[#allocation5 + $0x1e4] sm:$0xf0]  ;;  %v4367_v8 = vld [vmem:[#allocation5 + $0x1d0] sm:$0xf]  ;;  %v4759_v56 = vld [vmem:[#allocation5 + $0x154] sm:$0xf] }
 0x184   :  { %v4376_v0 = vor.u32 %v4778_v61, %v4375_v57  ;;  %v4305_v57 = vld [vmem:[#allocation5 + $0x158] sm:$0xf0]  ;;  %v4775_v61 = vld [vmem:[#allocation5 + $0x1d4] sm:$0xf] }
 0x185   :  { %2750 = vmatpush.bf16.msra.mxu0 %v4196_v34  ;;  %2763 = vmatpush.bf16.msra.mxu1 %v4260_v35  ;;  %v2306_v20 = vmax.f32 %v2296_v9, 0.0  ;;  %v2307_v21 = vmax.f32 %v2297_v12, 0.0  ;;  %v4212_v34 = vor.u32 %v4735_v30, %v4209_v31  ;;  %v4717_v35 = vld [vmem:[#allocation5 + $0x4] sm:$0xf] }
 0x186   :  { %v4140_v39 = vor.u32 %v4717_v35, %v4137_v36  ;;  %v4335_v35 = vld [vmem:[#allocation5 + $0x190] sm:$0xf]  ;;  %v4768_v36 = vld [vmem:[#allocation5 + $0x194] sm:$0xf0] }
 0x187   :  { %v2310_v50 = vpack.c.bf16 %v2306_v20, %v2306_v20  ;;  %v2311_v24 = vpack.c.bf16 %v2307_v21, %v2307_v21  ;;  %v4359_v20 = vld [vmem:[#allocation5 + $0x1c0] sm:$0xf]  ;;  %v4296_v21 = vor.u32 %v4758_v17, %v4295_v16  ;;  %v4336_v38 = vor.u32 %v4768_v36, %v4335_v35  ;;  %v4361_v17 = vld [vmem:[#allocation5 + $0x1c8] sm:$0xf0]  ;;  %v4337_v36 = vld [vmem:[#allocation5 + $0x198] sm:$0xf0] }
 0x189   :  { %2751 = vmatpush.bf16.msra.mxu0 %v4188_v6  ;;  %2764 = vmatpush.bf16.msra.mxu1 %v4252_v45  ;;  %v2070_v27 = vpop.f32.mrf.mxu0  ;;  %v2083_v28 = vpop.f32.mrf.mxu1 }
 0x18a   :  { %2706 = vmatmul.bf16.vlgmr.msrb.gmra.mxu0 %v2310_v50  ;;  %2719 = vmatmul.bf16.vlgmr.msrb.gmra.mxu1 %v2311_v24  ;;  %v4754_v27 = vld [vmem:[#allocation5 + $0x124] sm:$0xf0] }
 0x18b   :  { %v4280_v30 = vor.u32 %v4754_v27, %v4279_v26  ;;  %v4769_v26 = vld [vmem:[#allocation5 + $0x1a4] sm:$0xf] }
 0x18d   :  { %2752 = vmatpush.bf16.msra.mxu0 %v4180_v13  ;;  %2765 = vmatpush.bf16.msra.mxu1 %v4244_v42  ;;  %v4383_v13 = vld [vmem:[#allocation5 + $0x1f0] sm:$0xf]  ;;  %v4320_v42 = vor.u32 %v4764_v33, %v4319_v63  ;;  %v4313_v63 = vld [vmem:[#allocation5 + $0x168] sm:$0xf0]  ;;  %v4777_v33 = vld [vmem:[#allocation5 + $0x1e4] sm:$0xf] }
 0x18e   :  { %v4384_v52 = vor.u32 %v4780_v51, %v4383_v13 }
 0x18f   :  { %2724 = vmatpush.bf16.msrb.mxu2 %v4320_v42 }
 0x190   :  { %2737 = vmatpush.bf16.msrb.mxu3 %v4384_v52  ;;  %v4377_v52 = vld [vmem:[#allocation5 + $0x1e8] sm:$0xf0] }
 0x191   :  { %2753 = vmatpush.bf16.msra.mxu0 %v4172_v14  ;;  %2766 = vmatpush.bf16.msra.mxu1 %v4236_v4  ;;  %v4776_v14 = vld [vmem:[#allocation5 + $0x1d4] sm:$0xf0]  ;;  %v4380_v55 = vor.u32 %v4777_v33, %v4377_v52 }
 0x192   :  { %v4368_v4 = vor.u32 %v4776_v14, %v4367_v8  ;;  %v4297_v14 = vld [vmem:[#allocation5 + $0x148] sm:$0xf0] }
 0x193   :  { %2725 = vmatpush.bf16.msrb.mxu2 %v4312_v60  ;;  %v4308_v60 = vor.u32 %v4759_v56, %v4305_v57 }
 0x194   :  { %2738 = vmatpush.bf16.msrb.mxu3 %v4376_v0  ;;  %v4369_v0 = vld [vmem:[#allocation5 + $0x1d8] sm:$0xf0] }
 0x195   :  { %2754 = vmatpush.bf16.msra.mxu0 %v4164_v22  ;;  %2767 = vmatpush.bf16.msra.mxu1 %v4228_v23  ;;  %v4774_v22 = vld [vmem:[#allocation5 + $0x1c4] sm:$0xf0] }
 0x196   :  { %v4360_v23 = vor.u32 %v4774_v22, %v4359_v20  ;;  %v4289_v22 = vld [vmem:[#allocation5 + $0x138] sm:$0xf0] }
 0x198   :  { %2739 = vmatpush.bf16.msrb.mxu3 %v4368_v4  ;;  %v4773_v4 = vld [vmem:[#allocation5 + $0x1c4] sm:$0xf] }
 0x199   :  { %2755 = vmatpush.bf16.msra.mxu0 %v4156_v29  ;;  %2768 = vmatpush.bf16.msra.mxu1 %v4220_v18  ;;  %v4343_v29 = vld [vmem:[#allocation5 + $0x1a0] sm:$0xf]  ;;  %v4770_v18 = vld [vmem:[#allocation5 + $0x1a4] sm:$0xf0]  ;;  %v4364_v20 = vor.u32 %v4773_v4, %v4361_v17 }
 0x19a   :  { %v2094_v58 = vpop.f32.mrf.mxu2  ;;  %v2107_v40 = vpop.f32.mrf.mxu3  ;;  %v4344_v31 = vor.u32 %v4770_v18, %v4343_v29 }
 0x19b   :  { %v2095_v59 = vadd.f32 %v2094_v58, %v2082_v2  ;;  %v4760_v2 = vld [vmem:[#allocation5 + $0x154] sm:$0xf0]  ;;  %v4327_v58 = vld [vmem:[#allocation5 + $0x180] sm:$0xf] }
 0x19c   :  { %v4304_v3 = vor.u32 %v4760_v2, %v4303_v1  ;;  %2740 = vmatpush.bf16.msrb.mxu3 %v4360_v23  ;;  %v4372_v1 = vor.u32 %v4775_v61, %v4369_v0  ;;  %v4771_v23 = vld [vmem:[#allocation5 + $0x1b4] sm:$0xf] }
 0x19d   :  { %2756 = vmatpush.bf16.msra.mxu0 %v4148_v32  ;;  %2769 = vmatpush.bf16.msra.mxu1 %v4212_v34  ;;  %v2108_v5 = vadd.f32 %v2107_v40, %v2095_v59  ;;  %v4271_v32 = vld [vmem:[#allocation5 + $0x110] sm:$0xf]  ;;  %v4752_v34 = vld [vmem:[#allocation5 + $0x114] sm:$0xf0]  ;;  %v4766_v40 = vld [vmem:[#allocation5 + $0x184] sm:$0xf0] }
 0x19e   :  { %2726 = vmatpush.bf16.msrb.mxu2 %v4304_v3  ;;  %v4272_v37 = vor.u32 %v4752_v34, %v4271_v32  ;;  %v4757_v3 = vld [vmem:[#allocation5 + $0x144] sm:$0xf]  ;;  %v4273_v32 = vld [vmem:[#allocation5 + $0x118] sm:$0xf0]  ;;  %v4767_v34 = vld [vmem:[#allocation5 + $0x194] sm:$0xf] }
 0x19f   :  { %v4300_v16 = vor.u32 %v4757_v3, %v4297_v14 }
 0x1a1   :  { %2757 = vmatpush.bf16.msra.mxu0 %v4140_v39  ;;  %2770 = vmatpush.bf16.msra.mxu1 %v4204_v19  ;;  %v2120_v44 = vpop.f32.mrf.mxu0  ;;  %v2133_v6 = vpop.f32.mrf.mxu1  ;;  %v4263_v39 = vld [vmem:[#allocation5 + $0x100] sm:$0xf]  ;;  %v4750_v19 = vld [vmem:[#allocation5 + $0x104] sm:$0xf0] }
 0x1a2   :  { %v2121_v45 = vadd.f32 %v2120_v44, %v2108_v5  ;;  %v2096_v46 = vpop.f32.mrf.mxu2  ;;  %v2109_v47 = vpop.f32.mrf.mxu3  ;;  %2727 = vmatpush.bf16.msrb.mxu2 %v4296_v21  ;;  %v4264_v59 = vor.u32 %v4750_v19, %v4263_v39  ;;  %v4328_v5 = vor.u32 %v4766_v40, %v4327_v58  ;;  %v4763_v44 = vld [vmem:[#allocation5 + $0x174] sm:$0xf]  ;;  %v4340_v39 = vor.u32 %v4767_v34, %v4337_v36  ;;  %v4765_v19 = vld [vmem:[#allocation5 + $0x184] sm:$0xf]  ;;  %v4329_v58 = vld [vmem:[#allocation5 + $0x188] sm:$0xf0] }
 0x1a3   :  { %v4385_v47 = vld [vmem:[#allocation5 + $0x1f8] sm:$0xf0]  ;;  %v4755_v21 = vld [vmem:[#allocation5 + $0x134] sm:$0xf] }
 0x1a4   :  { %2758 = vmatmul.bf16.vlgmr.msra.gmra.mxu0 %v2310_v50  ;;  %2771 = vmatmul.bf16.vlgmr.msra.gmra.mxu1 %v2311_v24  ;;  %v5112_v41 = vadd.f32 %v2133_v6, %v2121_v45  ;;  %v4756_v50 = vld [vmem:[#allocation5 + $0x134] sm:$0xf0]  ;;  %v4351_v24 = vld [vmem:[#allocation5 + $0x1b0] sm:$0xf]  ;;  %v4321_v6 = vld [vmem:[#allocation5 + $0x178] sm:$0xf0] }
 0x1a5   :  { %v4288_v43 = vor.u32 %v4756_v50, %v4287_v49  ;;  %v4352_v28 = vor.u32 %v4772_v25, %v4351_v24  ;;  %v4779_v45 = vld [vmem:[#allocation5 + $0x1f4] sm:$0xf]  ;;  %v4324_v46 = vor.u32 %v4763_v44, %v4321_v6  ;;  %v4292_v49 = vor.u32 %v4755_v21, %v4289_v22  ;;  %v4353_v50 = vld [vmem:[#allocation5 + $0x1b8] sm:$0xf0]  ;;  %v4281_v25 = vld [vmem:[#allocation5 + $0x128] sm:$0xf0] }
 0x1a6   :  { %v4356_v24 = vor.u32 %v4771_v23, %v4353_v50  ;;  %v2274_v44 = vld [vmem:[#allocation1 + $0x12] sm:$0xff]  ;;  %v4789_v34 = vld [vmem:[%s5194_s7 + $0x40] sm:$0xff] }
 0x1a7   :  { %2728 = vmatpush.bf16.msrb.mxu2 %v4288_v43  ;;  %2741 = vmatpush.bf16.msrb.mxu3 %v4352_v28  ;;  %v4753_v43 = vld [vmem:[#allocation5 + $0x124] sm:$0xf]  ;;  %v4345_v28 = vld [vmem:[#allocation5 + $0x1a8] sm:$0xf0]  ;;  %v2282_v6 = vpack.i.b16 %v2274_v44, %v2274_v44  ;;  %v4788_v23 = vld [vmem:[%s5194_s7 + $0x38] sm:$0xff] }
 0x1a8   :  { %v4284_v27 = vor.u32 %v4753_v43, %v4281_v25  ;;  %2959 = vmatpush.bf16.msrb.mxu0 %v4788_v23  ;;  %v4787_v50 = vld [vmem:[%s5194_s7 + $0x30] sm:$0xff]  ;;  %v4786_v43 = vld [vmem:[%s5194_s7 + $0x28] sm:$0xff] }
 0x1a9   :  { %v2122_v62 = vpop.f32.mrf.mxu0  ;;  %v2135_v48 = vpop.f32.mrf.mxu1  ;;  %v2284_v33 = vperm.slane %v2282_v6, 0  ;;  %v4794_v25 = vld [vmem:[%s5194_s7 + $0x68] sm:$0xff] }
 0x1aa   :  { %v4388_v62 = vor.u32 %v4779_v45, %v4385_v47  ;;  %v4761_v48 = vld [vmem:[#allocation5 + $0x164] sm:$0xf] }
 0x1ab   :  { %2729 = vmatpush.bf16.msrb.mxu2 %v4280_v30  ;;  %2742 = vmatpush.bf16.msrb.mxu3 %v4344_v31  ;;  %v4316_v51 = vor.u32 %v4761_v48, %v4313_v63  ;;  %v4751_v31 = vld [vmem:[#allocation5 + $0x114] sm:$0xf] }
 0x1ac   :  { %v4276_v35 = vor.u32 %v4751_v31, %v4273_v32  ;;  %2960 = vmatpush.bf16.msrb.mxu0 %v4787_v50  ;;  %v4790_v31 = vld [vmem:[%s5194_s7 + $0x48] sm:$0xff]  ;;  %v4781_v32 = vld [vmem:[%s5194_s7] sm:$0xff] }
 0x1af   :  { %2730 = vmatpush.bf16.msrb.mxu2 %v4272_v37  ;;  %2743 = vmatpush.bf16.msrb.mxu3 %v4336_v38  ;;  %v4749_v37 = vld [vmem:[#allocation5 + $0x104] sm:$0xf]  ;;  %v4265_v38 = vld [vmem:[#allocation5 + $0x108] sm:$0xf0] }
 0x1b0   :  { %v4268_v40 = vor.u32 %v4749_v37, %v4265_v38  ;;  %2961 = vmatpush.bf16.msrb.mxu0 %v4786_v43 }
 0x1b3   :  { %2731 = vmatpush.bf16.msrb.mxu2 %v4264_v59  ;;  %2744 = vmatpush.bf16.msrb.mxu3 %v4328_v5  ;;  %v4332_v5 = vor.u32 %v4765_v19, %v4329_v58 }
 0x1b7   :  { %2776 = vmatpush.bf16.msra.mxu2 %v4324_v46  ;;  %2789 = vmatpush.bf16.msra.mxu3 %v4388_v62 }
 0x1ba   :  { %v5114_v53 = vpop.f32.mrf.mxu2  ;;  %v5116_v54 = vpop.f32.mrf.mxu3 }
 0x1bb   :  { %2777 = vmatpush.bf16.msra.mxu2 %v4316_v51  ;;  %2790 = vmatpush.bf16.msra.mxu3 %v4380_v55  ;;  %v2147_v46 = vadd.f32 %v5114_v53, %v5112_v41  ;;  %v2294_v55 = vunpack.c.l.bf16 %v2284_v33 }
 0x1bf   :  { %2778 = vmatpush.bf16.msra.mxu2 %v4308_v60  ;;  %2791 = vmatpush.bf16.msra.mxu3 %v4372_v1 }
 0x1c1   :  { %v5118_v7 = vpop.f32.mrf.mxu0  ;;  %v5120_v9 = vpop.f32.mrf.mxu1 }
 0x1c2   :  { %v2148_v12 = vpop.f32.mrf.mxu2  ;;  %v2161_v11 = vpop.f32.mrf.mxu3 }
 0x1c3   :  { %2779 = vmatpush.bf16.msra.mxu2 %v4300_v16  ;;  %2792 = vmatpush.bf16.msra.mxu3 %v4364_v20 }
 0x1c7   :  { %2780 = vmatpush.bf16.msra.mxu2 %v4292_v49  ;;  %2793 = vmatpush.bf16.msra.mxu3 %v4356_v24  ;;  %v4796_v49 = vld [vmem:[%s5194_s7 + $0x78] sm:$0xff]  ;;  %v4795_v24 = vld [vmem:[%s5194_s7 + $0x70] sm:$0xff] }
 0x1c8   :  { %2972 = vmatpush.bf16.msrb.mxu1 %v4796_v49 }
 0x1c9   :  { %v2174_v15 = vpop.f32.mrf.mxu0  ;;  %v2187_v10 = vpop.f32.mrf.mxu1 }
 0x1ca   :  { %v4348_v15 = vor.u32 %v4769_v26, %v4345_v28  ;;  %v2186_v10 = vadd.f32 %v5120_v9, %v5118_v7  ;;  %v2275_v7 = vld [vmem:[#allocation1 + $0x1b] sm:$0xff] }
 0x1cb   :  { %2781 = vmatpush.bf16.msra.mxu2 %v4284_v27  ;;  %v2285_v45 = vpack.i.b16 %v2275_v7, %v2275_v7  ;;  %v4785_v26 = vld [vmem:[%s5194_s7 + $0x20] sm:$0xff] }
 0x1cc   :  { %2794 = vmatpush.bf16.msra.mxu3 %v4348_v15  ;;  %2973 = vmatpush.bf16.msrb.mxu1 %v4795_v24  ;;  %v4793_v27 = vld [vmem:[%s5194_s7 + $0x60] sm:$0xff]  ;;  %v4783_v15 = vld [vmem:[%s5194_s7 + $0x10] sm:$0xff] }
 0x1cd   :  { %v2803_v28 = vld [vmem:[%s5193_s6] sm:$0x3]  ;;  %2962 = vmatpush.bf16.msrb.mxu0 %v4785_v26 }
 0x1ce   :  { %2805 = vst [vmem:[#allocation1] ss:$9 sm:$0xff] %v2803_v28 }
 0x1cf   :  { %2782 = vmatpush.bf16.msra.mxu2 %v4276_v35 }
 0x1d0   :  { %2795 = vmatpush.bf16.msra.mxu3 %v4340_v39  ;;  %2974 = vmatpush.bf16.msrb.mxu1 %v4794_v25 }
 0x1d3   :  { %2783 = vmatpush.bf16.msra.mxu2 %v4268_v40 }
 0x1d4   :  { %2796 = vmatpush.bf16.msra.mxu3 %v4332_v5  ;;  %2975 = vmatpush.bf16.msrb.mxu1 %v4793_v27 }
 0x1d5   :  { %v2806_v39 = vld [vmem:[#allocation1] sm:$0xff]  ;;  %v2807_v19 = vld [vmem:[#allocation1 + $0x9] sm:$0xff] }
 0x1d6   :  { %v2808_v58 = vpack.i.b16 %v2806_v39, %v2806_v39  ;;  %v2811_v40 = vpack.i.b16 %v2807_v19, %v2807_v19 }
 0x1d8   :  { %v2813_v6 = vperm.slane %v2811_v40, 0 }
 0x1da   :  { %v2198_v13 = vpop.f32.mrf.mxu2  ;;  %v2211_v42 = vpop.f32.mrf.mxu3 }
 0x1db   :  { %v2199_v30 = vadd.f32 %v2198_v13, %v2186_v10  ;;  %v2287_v13 = vperm.slane %v2285_v45, 0  ;;  %v4791_v10 = vld [vmem:[%s5194_s7 + $0x50] sm:$0xff] }
 0x1dd   :  { %v2212_v59 = vadd.f32 %v2211_v42, %v2199_v30  ;;  %v2160_v42 = vadd.f32 %v5116_v54, %v2147_v46  ;;  %v2295_v56 = vunpack.c.l.bf16 %v2287_v13  ;;  %v4782_v30 = vld [vmem:[%s5194_s7 + $0x8] sm:$0xff] }
 0x1e1   :  { %v2224_v2 = vpop.f32.mrf.mxu0  ;;  %v2237_v8 = vpop.f32.mrf.mxu1 }
 0x1e2   :  { %v2200_v12 = vpop.f32.mrf.mxu2  ;;  %v2213_v11 = vpop.f32.mrf.mxu3  ;;  %v2225_v9 = vadd.f32 %v2224_v2, %v2212_v59 }
 0x1e4   :  { %v2238_v47 = vadd.f32 %v2237_v8, %v2225_v9  ;;  %v2810_v9 = vperm.slane %v2808_v58, 0 }
 0x1e9   :  { %v2226_v29 = vpop.f32.mrf.mxu0  ;;  %v2239_v18 = vpop.f32.mrf.mxu1 }
 0x1ea   :  { %v4784_v29 = vld [vmem:[%s5194_s7 + $0x18] sm:$0xff] }
 0x1eb   :  { %v4792_v18 = vld [vmem:[%s5194_s7 + $0x58] sm:$0xff]  ;;  %2963 = vmatpush.bf16.msrb.mxu0 %v4784_v29 }
 0x1ec   :  { %2976 = vmatpush.bf16.msrb.mxu1 %v4792_v18 }
 0x1ef   :  { %2964 = vmatpush.bf16.msrb.mxu0 %v4783_v15 }
 0x1f0   :  { %2977 = vmatpush.bf16.msrb.mxu1 %v4791_v10 }
 0x1f3   :  { %2965 = vmatpush.bf16.msrb.mxu0 %v4782_v30 }
 0x1f4   :  { %2978 = vmatpush.bf16.msrb.mxu1 %v4790_v31 }
 0x1f7   :  { %2966 = vmatpush.bf16.msrb.mxu0 %v4781_v32 }
 0x1f8   :  { %2979 = vmatpush.bf16.msrb.mxu1 %v4789_v34 }
 0x1f9   :  { %v2250_v62 = vpop.f32.mrf.mxu2  ;;  %v2263_v48 = vpop.f32.mrf.mxu3 }
 0x1fa   :  { %v2251_v63 = vadd.f32 %v2250_v62, %v2238_v47  ;;  %v2816_v62 = vunpack.c.l.bf16 %v2810_v9 }
 0x1fc   :  { %v2264_v51 = vadd.f32 %v2263_v48, %v2251_v63  ;;  %v2817_v48 = vunpack.c.l.bf16 %v2813_v6 }
 0x1fe   :  { %v2268_v52 = vpack.c.bf16 %v2264_v51, %v2160_v42 }
 0x200   :  { %v2290_v57 = vunpack.c.l.bf16 %v2268_v52  ;;  %v2291_v60 = vunpack.c.h.bf16 %v2268_v52 }
 0x201   :  { %v2252_v61 = vpop.f32.mrf.mxu2  ;;  %v2265_v0 = vpop.f32.mrf.mxu3 }
 0x202   :  { %v2298_v1 = vadd.f32 %v2294_v55, %v2290_v57  ;;  %v2299_v2 = vadd.f32 %v2295_v56, %v2291_v60  ;;  %v4805_v61 = vld [vmem:[%s5195_s8] ss:$0 sm:$0xff]  ;;  %s4894_s8 = smov [#allocation7]  }
 0x203   :  { %s3056_s0 = sshll.u32 %s4894_s8, 4  ;;  %s3057_s0 = int_to_ptr.vmem [resolvable:$true] %s3056_s0 }
 0x204   :  { %v2308_v3 = vmax.f32 %v2298_v1, 0.0  ;;  %v2309_v41 = vmax.f32 %v2299_v2, 0.0 }
 0x206   :  { %v2312_v53 = vpack.c.bf16 %v2308_v3, %v2308_v3  ;;  %v2313_v8 = vpack.c.bf16 %v2309_v41, %v2309_v41 }
 0x207   :  { %v2707_v14 = vpop.f32.mrf.mxu0  ;;  %v2720_v4 = vpop.f32.mrf.mxu1 }
 0x208   :  { %2732 = vmatmul.bf16.vlgmr.msrb.gmra.mxu2 %v2312_v53  ;;  %2745 = vmatmul.bf16.vlgmr.msrb.gmra.mxu3 %v2313_v8  ;;  %v2721_v12 = vadd.f32 %v2720_v4, %v2707_v14 }
 0x20f   :  { %v2709_v54 = vpop.f32.mrf.mxu0  ;;  %v2722_v11 = vpop.f32.mrf.mxu1 }
 0x218   :  { %2784 = vmatmul.bf16.vlgmr.msra.gmra.mxu2 %v2312_v53  ;;  %2797 = vmatmul.bf16.vlgmr.msra.gmra.mxu3 %v2313_v8 }
 0x221   :  { %v2759_v16 = vpop.f32.mrf.mxu0  ;;  %v2772_v17 = vpop.f32.mrf.mxu1 }
 0x222   :  { %v2773_v20 = vadd.f32 %v2772_v17, %v2759_v16 }
 0x229   :  { %v2761_v21 = vpop.f32.mrf.mxu0  ;;  %v2774_v22 = vpop.f32.mrf.mxu1 }
 0x28b   :  { %v2733_v35 = vpop.f32.mrf.mxu2  ;;  %v2746_v36 = vpop.f32.mrf.mxu3 }
 0x28c   :  { %v2734_v59 = vadd.f32 %v2733_v35, %v2721_v12 }
 0x28e   :  { %v2747_v45 = vadd.f32 %v2746_v36, %v2734_v59 }
 0x293   :  { %v2735_v37 = vpop.f32.mrf.mxu2  ;;  %v2748_v38 = vpop.f32.mrf.mxu3 }
 0x29b   :  { %v2785_v5 = vpop.f32.mrf.mxu2  ;;  %v2798_v44 = vpop.f32.mrf.mxu3 }
 0x29c   :  { %v2786_v7 = vadd.f32 %v2785_v5, %v2773_v20 }
 0x29e   :  { %v2799_v46 = vadd.f32 %v2798_v44, %v2786_v7 }
 0x2a0   :  { %v2802_v47 = vpack.c.bf16 %v2799_v46, %v2747_v45 }
 0x2a2   :  { %v2814_v63 = vunpack.c.l.bf16 %v2802_v47  ;;  %v2815_v33 = vunpack.c.h.bf16 %v2802_v47 }
 0x2a3   :  { %v2787_v13 = vpop.f32.mrf.mxu2  ;;  %v2800_v42 = vpop.f32.mrf.mxu3 }
 0x2a4   :  { %v2818_v51 = vadd.f32 %v2816_v62, %v2814_v63  ;;  %v2819_v52 = vadd.f32 %v2817_v48, %v2815_v33 }
 0x2a6   :  { %v2823_v55 = vmax.f32 %v2818_v51, 0.0  ;;  %v2824_v56 = vmax.f32 %v2819_v52, 0.0 }
 0x2a8   :  { %v2825_v57 = vpack.c.bf16 %v2823_v55, %v2823_v55  ;;  %v2826_v60 = vpack.c.bf16 %v2824_v56, %v2824_v56 }
 0x2aa   :  { %2967 = vmatmul.bf16.vlgmr.msrb.gmra.mxu0 %v2825_v57  ;;  %2980 = vmatmul.bf16.vlgmr.msrb.gmra.mxu1 %v2826_v60 }
 0x327   :  { %v2968_v0 = vpop.f32.mrf.mxu0  ;;  %v2981_v1 = vpop.f32.mrf.mxu1 }
 0x328   :  { %v2969_v2 = vadd.f32 %v4805_v61, %v2968_v0 }
 0x32a   :  { %v2982_v3 = vadd.f32 %v2981_v1, %v2969_v2 }
 0x32c   :  { %2985 = vxpose.xlu0.b32.start.end [1/1] (short) (narrow) %v2982_v3, 8 }
 0x32f   :  { %v2970_v41 = vpop.f32.mrf.mxu0  ;;  %v2983_v53 = vpop.f32.mrf.mxu1 }
 0x3d0   :  { %v3001_v8 = vpop.trf.xlu0 }
 0x3d1   :  { %v3018_v14 = vsel %vm3017_vm1, %v3001_v8, -inf }
 0x3d2   :  { %v3019_v4 = vrot.slane %v3018_v14, 4 }
 0x3d4   :  { %v3020_v12 = vmax.f32 %v3018_v14, %v3019_v4 }
 0x3d6   :  { %v3021_v54 = vrot.slane %v3020_v12, 2 }
 0x3d8   :  { %v3022_v11 = vmax.f32 %v3020_v12, %v3021_v54 }
 0x3da   :  { %v3023_v16 = vrot.slane %v3022_v11, 1 }
 0x3dc   :  { %v3024_v17 = vmax.f32 %v3022_v11, %v3023_v16 }
 0x3de   :  { %v3025_v20 = vsub.f32 %v3001_v8, %v3024_v17 }
 0x3e0   :  { %v3026_v21 = vmul.f32 1.442695, %v3025_v20 }
 0x3e2   :  { %4806 = vpow2.f32 %v3026_v21 }
 0x3e8   :  { %v4807_v22 = vpop.eup %4806 }
 0x3e9   :  { %v3028_v23 = vsel %vm3017_vm1, %v4807_v22, 0.0 }
 0x3ea   :  { %v3029_v49 = vrot.slane %v3028_v23, 4 }
 0x3ec   :  { %v3030_v50 = vadd.f32 %v3029_v49, %v3028_v23 }
 0x3ee   :  { %v3031_v24 = vrot.slane %v3030_v50, 2 }
 0x3f0   :  { %v3032_v43 = vadd.f32 %v3031_v24, %v3030_v50 }
 0x3f2   :  { %v3033_v25 = vrot.slane %v3032_v43, 1 }
 0x3f4   :  { %v3034_v26 = vadd.f32 %v3033_v25, %v3032_v43 }
 0x3f6   :  { %4808 = vrcp.f32 %v3034_v26  ;;  %v3046_v18 = vand.u32 2147483648, %v3034_v26  ;;  %v3044_v10 = vand.u32 2147483647, %v3034_v26  ;;  %vm3040_vm3 = vweird.f32 %v3034_v26 }
 0x3f8   :  { %v3047_v31 = vor.u32 1.1754944e-38, %v3046_v18  ;;  %vm3045_vm5 = vcmp.eq.f32.partialorder %v3044_v10, 8.507059e+37 }
 0x3fc   :  { %v4809_v27 = vpop.eup %4808 }
 0x3fd   :  { %v3036_v28 = vmul.f32 %v4809_v27, %v3034_v26  ;;  %vm3041_vm2 = vweird.f32 %v4809_v27 }
 0x3fe   :  { %vm3042_vm4 = vmor %vm3040_vm3, %vm3041_vm2 }
 0x3ff   :  { %v3037_v29 = vsub.f32 1.0, %v3036_v28 }
 0x401   :  { %v3038_v15 = vmul.f32 %v4809_v27, %v3037_v29 }
 0x403   :  { %v3039_v30 = vadd.f32 %v4809_v27, %v3038_v15 }
 0x405   :  { %v3043_v32 = vsel %vm3042_vm4, %v4809_v27, %v3039_v30 }
 0x406   :  { %v3048_v34 = vsel %vm3045_vm5, %v3047_v31, %v3043_v32 }
 0x407   :  { %v3049_v35 = vmul.f32 %v4807_v22, %v3048_v34 }
 0x409   :  { %3050 = vst.msk [vmem:[#allocation7] sm:$0xf] %vm3017_vm1, %v3049_v35 }
 0x40a   :  { %3061 = dma.vmem_to_hbm [thread:$0]  %s3057_s0, 64, %s3059_s20, [#allocation4]  }
 0x40b   :  { %4886 = dma.done.wait [#allocation4], 64  }
 0x40c   :  { %4887 = vsyncadd [#allocation4], 4294967232 }
 0x40d   :  { %3066 = vsyncpa [#allocation3], 1 }
 0x40e   :  { %3067 = vsyncpa [#allocation6], 1 }
 0x40f   :  { %3068 = vsyncpa [#allocation4], 1 }

// kernel: tpu_custom_call.1
= control target key start
LH: loop header
LB: loop body
LE: loop exit
PB: predicated region body
PF: predicated region fallthrough
CT: control target
= control target key end

     0   :  { %14 = vsyncpa [#allocation3], 0  ;;  %s5187_s0 = inlined_call_operand.vmem [shape: f32[8,16], index: 0, kind: input, shape index: {}]   ;;  %s5188_s1 = inlined_call_operand.vmem [shape: bf16[16,1024], index: 1, kind: input, shape index: {}]   ;;  %s5189_s2 = inlined_call_operand.vmem [shape: bf16[1,1024], index: 2, kind: input, shape index: {}]   ;;  %s5190_s3 = inlined_call_operand.hbm [shape: bf16[1024,512], index: 3, kind: input, shape index: {}]   ;;  %s5191_s4 = inlined_call_operand.vmem [shape: bf16[1,512], index: 4, kind: input, shape index: {}]   ;;  %s5192_s5 = inlined_call_operand.hbm [shape: bf16[512,256], index: 5, kind: input, shape index: {}]   ;;  %s5193_s6 = inlined_call_operand.vmem [shape: bf16[1,256], index: 6, kind: input, shape index: {}]   ;;  %s5194_s7 = inlined_call_operand.vmem [shape: bf16[256,4], index: 7, kind: input, shape index: {}]   ;;  %s5195_s8 = inlined_call_operand.vmem [shape: f32[1,4], index: 8, kind: input, shape index: {}]   ;;  %s5196_s9 = inlined_call_operand.hbm [shape: f32[4,8], index: 9, kind: output, shape index: {}]  }
   0x1   :  { %15 = vsyncpa [#allocation6], 0 }
   0x2   :  { %16 = vsyncpa [#allocation4], 0  ;;  %s27_s11 = sshll.u32 %s5190_s3, 4  ;;  %s4888_s12 = smov [#allocation2]   ;;  %s28_s11 = int_to_ptr.hbm [resolvable:$true] %s27_s11 }
   0x3   :  { %s29_s13 = sshll.u32 %s4888_s12, 4  ;;  %s42_s16 = sshll.u32 %s5192_s5, 4  ;;  %s30_s13 = int_to_ptr.vmem [resolvable:$true] %s29_s13  ;;  %s43_s16 = int_to_ptr.hbm [resolvable:$true] %s42_s16 }
   0x4   :  { %s4889_s17 = smov 256   ;;  %s4890_s18 = smov 16  }
   0x5   :  { %35 = dma.hbm_to_vmem [thread:$0]  %s28_s11, 32768, %s30_s13, [#allocation3], %s4889_s17, %s4889_s17, %s4890_s18  }
   0x6   :  { %s4891_s19 = smov [#allocation5]   ;;  %s4892_s21 = smov 128  }
   0x7   :  { %s44_s20 = sshll.u32 %s4891_s19, 4  ;;  %s4893_s22 = smov 8   ;;  %s45_s20 = int_to_ptr.vmem [resolvable:$true] %s44_s20 }
   0x8   :  { %50 = dma.hbm_to_vmem [thread:$0]  %s43_s16, 8192, %s45_s20, [#allocation6], %s4892_s21, %s4892_s21, %s4893_s22  }
   0x9   :  { %4882 = dma.done.wait [#allocation3], 32768  }
   0xa   :  { %4883 = vsyncadd [#allocation3], 4294934528 }
   0xb   :  { %4884 = dma.done.wait [#allocation6], 8192  }
   0xc   :  { %4885 = vsyncadd [#allocation6], 4294959104  ;;  %v3071_v0 = vld [vmem:[%s5188_s1] sm:$0xf]  ;;  %v4453_v2 = vld [vmem:[%s5188_s1 + $0x4] sm:$0xf] }
   0xd   :  { %v4457_v1 = vld [vmem:[%s5188_s1 + $0x1c] sm:$0xf0]  ;;  %v3073_v4 = vld [vmem:[%s5188_s1 + $0x20] sm:$0xf0]  ;;  %vm116_vm0 = vcmask 130048   ;;  %vm3017_vm1 = vcmask 60416  }
   0xe   :  { %v3072_v3 = vor.u32 %v4457_v1, %v3071_v0  ;;  %v66_v5 = vld [vmem:[%s5187_s0] sm:$0xff]  ;;  %v3079_v6 = vld [vmem:[%s5188_s1 + $0x8] sm:$0xf]  ;;  %v3076_v7 = vor.u32 %v4453_v2, %v3073_v4  ;;  %v4454_v10 = vld [vmem:[%s5188_s1 + $0xc] sm:$0xf]  ;;  %s3058_s20 = sshll.u32 %s5196_s9, 4  ;;  %s3059_s20 = int_to_ptr.hbm [resolvable:$true] %s3058_s20 }
   0xf   :  { %v4969_v8 = vpack.c.bf16 %v66_v5, %v66_v5  ;;  %v4458_v9 = vld [vmem:[%s5188_s1 + $0x24] sm:$0xf0]  ;;  %v3081_v11 = vld [vmem:[%s5188_s1 + $0x28] sm:$0xf0]  ;;  %v3087_v14 = vld [vmem:[%s5188_s1 + $0x10] sm:$0xf] }
  0x10   :  { %127 = vmatpush.bf16.msra.mxu2 %v3072_v3  ;;  %v3080_v12 = vor.u32 %v4458_v9, %v3079_v6  ;;  %v3084_v13 = vor.u32 %v4454_v10, %v3081_v11  ;;  %v4459_v15 = vld [vmem:[%s5188_s1 + $0x2c] sm:$0xf0]  ;;  %v4455_v16 = vld [vmem:[%s5188_s1 + $0x14] sm:$0xf]  ;;  %140 = vmatpush.bf16.msra.mxu3 %v3076_v7  ;;  %v3095_v19 = vld [vmem:[%s5188_s1 + $0x18] sm:$0xf] }
  0x11   :  { %v3088_v17 = vor.u32 %v4459_v15, %v3087_v14  ;;  %v3089_v18 = vld [vmem:[%s5188_s1 + $0x30] sm:$0xf0]  ;;  %v4460_v20 = vld [vmem:[%s5188_s1 + $0x34] sm:$0xf0]  ;;  %v4456_v23 = vld [vmem:[%s5188_s1 + $0x1c] sm:$0xf] }
  0x12   :  { %v3092_v21 = vor.u32 %v4455_v16, %v3089_v18  ;;  %v3096_v22 = vor.u32 %v4460_v20, %v3095_v19  ;;  %v3097_v24 = vld [vmem:[%s5188_s1 + $0x38] sm:$0xf0]  ;;  %v3223_v26 = vld [vmem:[#allocation2 + $0xe0] sm:$0xf]  ;;  %v4491_v27 = vld [vmem:[#allocation2 + $0xec] sm:$0xf0] }
  0x13   :  { %3101 = vmatmul.msk.bf16.vlgmr.msra.gmra.mxu2 %vm116_vm0, %v4969_v8  ;;  %179 = vmatpush.bf16.msra.mxu0 %v3088_v17  ;;  %v3100_v25 = vor.u32 %v4456_v23, %v3097_v24  ;;  %v3351_v28 = vld [vmem:[#allocation2 + $0x1e0] sm:$0xf]  ;;  %v3224_v29 = vor.u32 %v4491_v27, %v3223_v26  ;;  %v4523_v30 = vld [vmem:[#allocation2 + $0x1ec] sm:$0xf0] }
  0x14   :  { %153 = vmatpush.bf16.msrb.mxu2 %v3080_v12  ;;  %166 = vmatpush.bf16.msrb.mxu3 %v3084_v13  ;;  %v3207_v31 = vld [vmem:[#allocation2 + $0xc0] sm:$0xf]  ;;  %v4487_v32 = vld [vmem:[#allocation2 + $0xcc] sm:$0xf0]  ;;  %v3352_v33 = vor.u32 %v4523_v30, %v3351_v28 }
  0x15   :  { %3102 = vmatmul.msk.bf16.vlgmr.msra.gmra.mxu3 %vm116_vm0, %v4969_v8  ;;  %192 = vmatpush.bf16.msra.mxu1 %v3092_v21  ;;  %v3335_v34 = vld [vmem:[#allocation2 + $0x1c0] sm:$0xf]  ;;  %v4519_v35 = vld [vmem:[#allocation2 + $0x1cc] sm:$0xf0]  ;;  %v3208_v36 = vor.u32 %v4487_v32, %v3207_v31 }
  0x16   :  { %3105 = vmatmul.msk.bf16.vlgmr.msra.gmra.mxu0 %vm116_vm0, %v4969_v8  ;;  %v3336_v37 = vor.u32 %v4519_v35, %v3335_v34  ;;  %v3191_v38 = vld [vmem:[#allocation2 + $0xa0] sm:$0xf]  ;;  %v4483_v39 = vld [vmem:[#allocation2 + $0xac] sm:$0xf0] }
  0x17   :  { %1851 = vmatpush.bf16.msrb.mxu0 %v3224_v29  ;;  %v3319_v40 = vld [vmem:[#allocation2 + $0x1a0] sm:$0xf]  ;;  %v4515_v41 = vld [vmem:[#allocation2 + $0x1ac] sm:$0xf0]  ;;  %v3192_v42 = vor.u32 %v4483_v39, %v3191_v38 }
  0x18   :  { %205 = vmatpush.bf16.msra.mxu2 %v3096_v22  ;;  %218 = vmatpush.bf16.msra.mxu3 %v3100_v25  ;;  %v3320_v43 = vor.u32 %v4515_v41, %v3319_v40  ;;  %v3175_v44 = vld [vmem:[#allocation2 + $0x80] sm:$0xf]  ;;  %v4479_v45 = vld [vmem:[#allocation2 + $0x8c] sm:$0xf0] }
  0x19   :  { %3106 = vmatmul.msk.bf16.vlgmr.msra.gmra.mxu1 %vm116_vm0, %v4969_v8  ;;  %v3303_v46 = vld [vmem:[#allocation2 + $0x180] sm:$0xf]  ;;  %v4511_v47 = vld [vmem:[#allocation2 + $0x18c] sm:$0xf0]  ;;  %v3176_v52 = vor.u32 %v4479_v45, %v3175_v44 }
  0x1a   :  { %1864 = vmatpush.bf16.msrb.mxu1 %v3352_v33  ;;  %v3479_v48 = vld [vmem:[#allocation2 + $0x2e0] sm:$0xf]  ;;  %v4555_v49 = vld [vmem:[#allocation2 + $0x2ec] sm:$0xf0]  ;;  %v3304_v53 = vor.u32 %v4511_v47, %v3303_v46 }
  0x1b   :  { %1852 = vmatpush.bf16.msrb.mxu0 %v3208_v36  ;;  %v3607_v50 = vld [vmem:[#allocation2 + $0x3e0] sm:$0xf]  ;;  %v4587_v51 = vld [vmem:[#allocation2 + $0x3ec] sm:$0xf0]  ;;  %v3480_v58 = vor.u32 %v4555_v49, %v3479_v48 }
  0x1c   :  { %v3159_v54 = vld [vmem:[#allocation2 + $0x60] sm:$0xf]  ;;  %v4475_v55 = vld [vmem:[#allocation2 + $0x6c] sm:$0xf0]  ;;  %v3608_v59 = vor.u32 %v4587_v51, %v3607_v50 }
  0x1d   :  { %v3287_v56 = vld [vmem:[#allocation2 + $0x160] sm:$0xf]  ;;  %v4507_v57 = vld [vmem:[#allocation2 + $0x16c] sm:$0xf0]  ;;  %v3160_v0 = vor.u32 %v4475_v55, %v3159_v54 }
  0x1e   :  { %1865 = vmatpush.bf16.msrb.mxu1 %v3336_v37  ;;  %v3463_v60 = vld [vmem:[#allocation2 + $0x2c0] sm:$0xf]  ;;  %v4551_v61 = vld [vmem:[#allocation2 + $0x2cc] sm:$0xf0]  ;;  %v3288_v1 = vor.u32 %v4507_v57, %v3287_v56 }
  0x1f   :  { %1853 = vmatpush.bf16.msrb.mxu0 %v3192_v42  ;;  %v3591_v62 = vld [vmem:[#allocation2 + $0x3c0] sm:$0xf]  ;;  %v4583_v63 = vld [vmem:[#allocation2 + $0x3cc] sm:$0xf0]  ;;  %v3464_v6 = vor.u32 %v4551_v61, %v3463_v60 }
  0x20   :  { %v3143_v2 = vld [vmem:[#allocation2 + $0x40] sm:$0xf]  ;;  %v4471_v3 = vld [vmem:[#allocation2 + $0x4c] sm:$0xf0]  ;;  %v3592_v7 = vor.u32 %v4583_v63, %v3591_v62 }
  0x21   :  { %v3271_v4 = vld [vmem:[#allocation2 + $0x140] sm:$0xf]  ;;  %v4503_v5 = vld [vmem:[#allocation2 + $0x14c] sm:$0xf0]  ;;  %v3144_v13 = vor.u32 %v4471_v3, %v3143_v2 }
  0x22   :  { %1866 = vmatpush.bf16.msrb.mxu1 %v3320_v43  ;;  %v3447_v9 = vld [vmem:[#allocation2 + $0x2a0] sm:$0xf]  ;;  %v4547_v10 = vld [vmem:[#allocation2 + $0x2ac] sm:$0xf0]  ;;  %v3272_v14 = vor.u32 %v4503_v5, %v3271_v4 }
  0x23   :  { %3103 = vmatmul.msk.bf16.vlgmr.msrb.gmra.mxu2 %vm116_vm0, %v4969_v8  ;;  %1854 = vmatpush.bf16.msrb.mxu0 %v3176_v52  ;;  %v3575_v11 = vld [vmem:[#allocation2 + $0x3a0] sm:$0xf]  ;;  %v4579_v12 = vld [vmem:[#allocation2 + $0x3ac] sm:$0xf0]  ;;  %v3448_v19 = vor.u32 %v4547_v10, %v3447_v9 }
  0x24   :  { %1877 = vmatpush.bf16.msrb.mxu2 %v3480_v58  ;;  %v3127_v15 = vld [vmem:[#allocation2 + $0x20] sm:$0xf]  ;;  %v4467_v16 = vld [vmem:[#allocation2 + $0x2c] sm:$0xf0]  ;;  %v3576_v20 = vor.u32 %v4579_v12, %v3575_v11 }
  0x25   :  { %3104 = vmatmul.msk.bf16.vlgmr.msrb.gmra.mxu3 %vm116_vm0, %v4969_v8  ;;  %v3255_v17 = vld [vmem:[#allocation2 + $0x120] sm:$0xf]  ;;  %v4499_v18 = vld [vmem:[#allocation2 + $0x12c] sm:$0xf0]  ;;  %v3128_v25 = vor.u32 %v4467_v16, %v3127_v15 }
  0x26   :  { %1867 = vmatpush.bf16.msrb.mxu1 %v3304_v53  ;;  %1890 = vmatpush.bf16.msrb.mxu3 %v3608_v59  ;;  %v3431_v21 = vld [vmem:[#allocation2 + $0x280] sm:$0xf]  ;;  %v4543_v22 = vld [vmem:[#allocation2 + $0x28c] sm:$0xf0]  ;;  %v3256_v26 = vor.u32 %v4499_v18, %v3255_v17 }
  0x27   :  { %1855 = vmatpush.bf16.msrb.mxu0 %v3160_v0  ;;  %v3559_v23 = vld [vmem:[#allocation2 + $0x380] sm:$0xf]  ;;  %v4575_v24 = vld [vmem:[#allocation2 + $0x38c] sm:$0xf0]  ;;  %v3432_v31 = vor.u32 %v4543_v22, %v3431_v21 }
  0x28   :  { %1878 = vmatpush.bf16.msrb.mxu2 %v3464_v6  ;;  %v3111_v27 = vld [vmem:[#allocation2] sm:$0xf]  ;;  %v4463_v28 = vld [vmem:[#allocation2 + $0xc] sm:$0xf0]  ;;  %v3560_v32 = vor.u32 %v4575_v24, %v3559_v23 }
  0x29   :  { %v3239_v29 = vld [vmem:[#allocation2 + $0x100] sm:$0xf]  ;;  %v4495_v30 = vld [vmem:[#allocation2 + $0x10c] sm:$0xf0]  ;;  %v3112_v38 = vor.u32 %v4463_v28, %v3111_v27 }
  0x2a   :  { %1868 = vmatpush.bf16.msrb.mxu1 %v3288_v1  ;;  %1891 = vmatpush.bf16.msrb.mxu3 %v3592_v7  ;;  %v3735_v33 = vld [vmem:[#allocation2 + $0x4e0] sm:$0xf]  ;;  %v4619_v34 = vld [vmem:[#allocation2 + $0x4ec] sm:$0xf0]  ;;  %v3240_v42 = vor.u32 %v4495_v30, %v3239_v29 }
  0x2b   :  { %1856 = vmatpush.bf16.msrb.mxu0 %v3144_v13  ;;  %v3863_v35 = vld [vmem:[#allocation2 + $0x5e0] sm:$0xf]  ;;  %v4651_v36 = vld [vmem:[#allocation2 + $0x5ec] sm:$0xf0]  ;;  %v3736_v43 = vor.u32 %v4619_v34, %v3735_v33 }
  0x2c   :  { %1879 = vmatpush.bf16.msrb.mxu2 %v3448_v19  ;;  %v3415_v37 = vld [vmem:[#allocation2 + $0x260] sm:$0xf]  ;;  %v4539_v39 = vld [vmem:[#allocation2 + $0x26c] sm:$0xf0]  ;;  %v3864_v44 = vor.u32 %v4651_v36, %v3863_v35 }
  0x2d   :  { %v3543_v40 = vld [vmem:[#allocation2 + $0x360] sm:$0xf]  ;;  %v4571_v41 = vld [vmem:[#allocation2 + $0x36c] sm:$0xf0]  ;;  %v3416_v47 = vor.u32 %v4539_v39, %v3415_v37 }
  0x2e   :  { %1869 = vmatpush.bf16.msrb.mxu1 %v3272_v14  ;;  %1892 = vmatpush.bf16.msrb.mxu3 %v3576_v20  ;;  %v3719_v45 = vld [vmem:[#allocation2 + $0x4c0] sm:$0xf]  ;;  %v4615_v46 = vld [vmem:[#allocation2 + $0x4cc] sm:$0xf0]  ;;  %v3544_v48 = vor.u32 %v4571_v41, %v3543_v40 }
  0x2f   :  { %1857 = vmatpush.bf16.msrb.mxu0 %v3128_v25  ;;  %v3847_v49 = vld [vmem:[#allocation2 + $0x5c0] sm:$0xf]  ;;  %v4647_v50 = vld [vmem:[#allocation2 + $0x5cc] sm:$0xf0]  ;;  %v3720_v55 = vor.u32 %v4615_v46, %v3719_v45 }
  0x30   :  { %1880 = vmatpush.bf16.msrb.mxu2 %v3432_v31  ;;  %v3399_v51 = vld [vmem:[#allocation2 + $0x240] sm:$0xf]  ;;  %v4535_v52 = vld [vmem:[#allocation2 + $0x24c] sm:$0xf0]  ;;  %v3848_v56 = vor.u32 %v4647_v50, %v3847_v49  ;;  %v228_v31 = vld [vmem:[%s5189_s2] sm:$0xff] }
  0x31   :  { %v3527_v53 = vld [vmem:[#allocation2 + $0x340] sm:$0xf]  ;;  %v4567_v54 = vld [vmem:[#allocation2 + $0x34c] sm:$0xf0]  ;;  %v3400_v59 = vor.u32 %v4535_v52, %v3399_v51  ;;  %230 = vst [vmem:[#allocation1] ss:$9 sm:$0xff] %v228_v31 }
  0x32   :  { %1870 = vmatpush.bf16.msrb.mxu1 %v3256_v26  ;;  %1893 = vmatpush.bf16.msrb.mxu3 %v3560_v32  ;;  %v3703_v57 = vld [vmem:[#allocation2 + $0x4a0] sm:$0xf]  ;;  %v4611_v58 = vld [vmem:[#allocation2 + $0x4ac] sm:$0xf0]  ;;  %v3528_v60 = vor.u32 %v4567_v54, %v3527_v53 }
  0x33   :  { %3107 = vmatmul.msk.bf16.vlgmr.msra.gmra.mxu2 %vm116_vm0, %v4969_v8  ;;  %1858 = vmatpush.bf16.msrb.mxu0 %v3112_v38  ;;  %v3831_v61 = vld [vmem:[#allocation2 + $0x5a0] sm:$0xf]  ;;  %v4643_v62 = vld [vmem:[#allocation2 + $0x5ac] sm:$0xf0] }
  0x34   :  { %1881 = vmatpush.bf16.msrb.mxu2 %v3416_v47  ;;  %v3383_v63 = vld [vmem:[#allocation2 + $0x220] sm:$0xf]  ;;  %v4531_v0 = vld [vmem:[#allocation2 + $0x22c] sm:$0xf0]  ;;  %v3832_v3 = vor.u32 %v4643_v62, %v3831_v61 }
  0x35   :  { %3108 = vmatmul.msk.bf16.vlgmr.msra.gmra.mxu3 %vm116_vm0, %v4969_v8  ;;  %v3511_v1 = vld [vmem:[#allocation2 + $0x320] sm:$0xf]  ;;  %v4563_v2 = vld [vmem:[#allocation2 + $0x32c] sm:$0xf0]  ;;  %v3704_v8 = vor.u32 %v4611_v58, %v3703_v57  ;;  %v3384_v7 = vor.u32 %v4531_v0, %v3383_v63 }
  0x36   :  { %1871 = vmatpush.bf16.msrb.mxu1 %v3240_v42  ;;  %1894 = vmatpush.bf16.msrb.mxu3 %v3544_v48  ;;  %v3687_v4 = vld [vmem:[#allocation2 + $0x480] sm:$0xf]  ;;  %v4607_v5 = vld [vmem:[#allocation2 + $0x48c] sm:$0xf0]  ;;  %v3512_v9 = vor.u32 %v4563_v2, %v3511_v1 }
  0x37   :  { %1903 = vmatpush.bf16.msra.mxu0 %v3736_v43  ;;  %v3815_v6 = vld [vmem:[#allocation2 + $0x580] sm:$0xf]  ;;  %v4639_v10 = vld [vmem:[#allocation2 + $0x58c] sm:$0xf0]  ;;  %v3688_v19 = vor.u32 %v4607_v5, %v3687_v4 }
  0x38   :  { %1882 = vmatpush.bf16.msrb.mxu2 %v3400_v59  ;;  %v3367_v11 = vld [vmem:[#allocation2 + $0x200] sm:$0xf]  ;;  %v4527_v12 = vld [vmem:[#allocation2 + $0x20c] sm:$0xf0]  ;;  %v3816_v20 = vor.u32 %v4639_v10, %v3815_v6 }
  0x39   :  { %v3495_v13 = vld [vmem:[#allocation2 + $0x300] sm:$0xf]  ;;  %v4559_v14 = vld [vmem:[#allocation2 + $0x30c] sm:$0xf0]  ;;  %v3368_v22 = vor.u32 %v4527_v12, %v3367_v11 }
  0x3a   :  { %1916 = vmatpush.bf16.msra.mxu1 %v3864_v44  ;;  %1895 = vmatpush.bf16.msrb.mxu3 %v3528_v60  ;;  %v3991_v15 = vld [vmem:[#allocation2 + $0x6e0] sm:$0xf]  ;;  %v4683_v16 = vld [vmem:[#allocation2 + $0x6ec] sm:$0xf0]  ;;  %v3496_v23 = vor.u32 %v4559_v14, %v3495_v13 }
  0x3b   :  { %1904 = vmatpush.bf16.msra.mxu0 %v3720_v55  ;;  %v4119_v17 = vld [vmem:[#allocation2 + $0x7e0] sm:$0xf]  ;;  %v4715_v18 = vld [vmem:[#allocation2 + $0x7ec] sm:$0xf0]  ;;  %v3992_v27 = vor.u32 %v4683_v16, %v3991_v15 }
  0x3c   :  { %v3671_v21 = vld [vmem:[#allocation2 + $0x460] sm:$0xf]  ;;  %1883 = vmatpush.bf16.msrb.mxu2 %v3384_v7  ;;  %v4603_v24 = vld [vmem:[#allocation2 + $0x46c] sm:$0xf0]  ;;  %v4120_v28 = vor.u32 %v4715_v18, %v4119_v17 }
  0x3d   :  { %v3799_v25 = vld [vmem:[#allocation2 + $0x560] sm:$0xf]  ;;  %v4635_v26 = vld [vmem:[#allocation2 + $0x56c] sm:$0xf0]  ;;  %v3672_v29 = vor.u32 %v4603_v24, %v3671_v21  ;;  %v231_v21 = vld [vmem:[#allocation1] sm:$0xff] }
  0x3e   :  { %1917 = vmatpush.bf16.msra.mxu1 %v3848_v56  ;;  %1896 = vmatpush.bf16.msrb.mxu3 %v3512_v9  ;;  %v3800_v30 = vor.u32 %v4635_v26, %v3799_v25  ;;  %v3655_v32 = vld [vmem:[#allocation2 + $0x440] sm:$0xf]  ;;  %v4599_v33 = vld [vmem:[#allocation2 + $0x44c] sm:$0xf0] }
  0x3f   :  { %1905 = vmatpush.bf16.msra.mxu0 %v3704_v8  ;;  %v3783_v34 = vld [vmem:[#allocation2 + $0x540] sm:$0xf]  ;;  %v3656_v35 = vor.u32 %v4599_v33, %v3655_v32  ;;  %v4631_v36 = vld [vmem:[#allocation2 + $0x54c] sm:$0xf0] }
  0x40   :  { %1884 = vmatpush.bf16.msrb.mxu2 %v3368_v22  ;;  %v3975_v37 = vld [vmem:[#allocation2 + $0x6c0] sm:$0xf]  ;;  %v4679_v38 = vld [vmem:[#allocation2 + $0x6cc] sm:$0xf0]  ;;  %v3784_v39 = vor.u32 %v4631_v36, %v3783_v34 }
  0x41   :  { %v3976_v40 = vor.u32 %v4679_v38, %v3975_v37  ;;  %v4103_v41 = vld [vmem:[#allocation2 + $0x7c0] sm:$0xf]  ;;  %v4711_v42 = vld [vmem:[#allocation2 + $0x7cc] sm:$0xf0] }
  0x42   :  { %1918 = vmatpush.bf16.msra.mxu1 %v3832_v3  ;;  %1897 = vmatpush.bf16.msrb.mxu3 %v3496_v23  ;;  %v4104_v43 = vor.u32 %v4711_v42, %v4103_v41  ;;  %v3639_v44 = vld [vmem:[#allocation2 + $0x420] sm:$0xf]  ;;  %v4595_v45 = vld [vmem:[#allocation2 + $0x42c] sm:$0xf0]  ;;  %v236_v42 = vld [vmem:[#allocation1 + $0x2d] sm:$0xff] }
  0x43   :  { %1906 = vmatpush.bf16.msra.mxu0 %v3688_v19  ;;  %v3767_v46 = vld [vmem:[#allocation2 + $0x520] sm:$0xf]  ;;  %v3640_v47 = vor.u32 %v4595_v45, %v3639_v44  ;;  %v4627_v48 = vld [vmem:[#allocation2 + $0x52c] sm:$0xf0]  ;;  %v4489_v45 = vld [vmem:[#allocation2 + $0xe4] sm:$0xf] }
  0x44   :  { %1929 = vmatpush.bf16.msra.mxu2 %v3992_v27  ;;  %v3959_v49 = vld [vmem:[#allocation2 + $0x6a0] sm:$0xf]  ;;  %v4675_v50 = vld [vmem:[#allocation2 + $0x6ac] sm:$0xf0]  ;;  %v3768_v51 = vor.u32 %v4627_v48, %v3767_v46  ;;  %v239_v27 = vpack.i.b16 %v231_v21, %v231_v21  ;;  %v3225_v46 = vld [vmem:[#allocation2 + $0xf0] sm:$0xf0]  ;;  %v254_v48 = vpack.i.b16 %v236_v42, %v236_v42 }
  0x45   :  { %v3960_v52 = vor.u32 %v4675_v50, %v3959_v49  ;;  %v4087_v53 = vld [vmem:[#allocation2 + $0x7a0] sm:$0xf]  ;;  %v4707_v54 = vld [vmem:[#allocation2 + $0x7ac] sm:$0xf0] }
  0x46   :  { %1919 = vmatpush.bf16.msra.mxu1 %v3816_v20  ;;  %1942 = vmatpush.bf16.msra.mxu3 %v4120_v28  ;;  %v4088_v55 = vor.u32 %v4707_v54, %v4087_v53  ;;  %v3623_v56 = vld [vmem:[#allocation2 + $0x400] sm:$0xf]  ;;  %v4591_v57 = vld [vmem:[#allocation2 + $0x40c] sm:$0xf0]  ;;  %v241_v33 = vperm.slane %v239_v27, 0 }
  0x47   :  { %1907 = vmatpush.bf16.msra.mxu0 %v3672_v29  ;;  %v3751_v58 = vld [vmem:[#allocation2 + $0x500] sm:$0xf]  ;;  %v3624_v59 = vor.u32 %v4591_v57, %v3623_v56  ;;  %v4623_v60 = vld [vmem:[#allocation2 + $0x50c] sm:$0xf0]  ;;  %v3353_v53 = vld [vmem:[#allocation2 + $0x1f0] sm:$0xf0] }
  0x48   :  { %1930 = vmatpush.bf16.msra.mxu2 %v3976_v40  ;;  %v3943_v61 = vld [vmem:[#allocation2 + $0x680] sm:$0xf]  ;;  %v4671_v62 = vld [vmem:[#allocation2 + $0x68c] sm:$0xf0]  ;;  %v3752_v63 = vor.u32 %v4623_v60, %v3751_v58  ;;  %v3228_v60 = vor.u32 %v4489_v45, %v3225_v46  ;;  %v3161_v45 = vld [vmem:[#allocation2 + $0x70] sm:$0xf0] }
  0x49   :  { %v3944_v0 = vor.u32 %v4671_v62, %v3943_v61  ;;  %v4071_v1 = vld [vmem:[#allocation2 + $0x780] sm:$0xf]  ;;  %v4703_v2 = vld [vmem:[#allocation2 + $0x78c] sm:$0xf0]  ;;  %v4485_v61 = vld [vmem:[#allocation2 + $0xc4] sm:$0xf] }
  0x4a   :  { %1920 = vmatpush.bf16.msra.mxu1 %v3800_v30  ;;  %1943 = vmatpush.bf16.msra.mxu3 %v4104_v43  ;;  %v4072_v8 = vor.u32 %v4703_v2, %v4071_v1  ;;  %v3927_v3 = vld [vmem:[#allocation2 + $0x660] sm:$0xf]  ;;  %v4667_v4 = vld [vmem:[#allocation2 + $0x66c] sm:$0xf0]  ;;  %v3209_v62 = vld [vmem:[#allocation2 + $0xd0] sm:$0xf0] }
  0x4b   :  { %1908 = vmatpush.bf16.msra.mxu0 %v3656_v35  ;;  %v4055_v5 = vld [vmem:[#allocation2 + $0x760] sm:$0xf]  ;;  %v3928_v6 = vor.u32 %v4667_v4, %v3927_v3  ;;  %v4699_v7 = vld [vmem:[#allocation2 + $0x76c] sm:$0xf0]  ;;  %v4517_v1 = vld [vmem:[#allocation2 + $0x1c4] sm:$0xf] }
  0x4c   :  { %1931 = vmatpush.bf16.msra.mxu2 %v3960_v52  ;;  %v4056_v9 = vor.u32 %v4699_v7, %v4055_v5  ;;  %v3911_v10 = vld [vmem:[#allocation2 + $0x640] sm:$0xf]  ;;  %v4663_v11 = vld [vmem:[#allocation2 + $0x64c] sm:$0xf0]  ;;  %v4521_v52 = vld [vmem:[#allocation2 + $0x1e4] sm:$0xf] }
  0x4d   :  { %v3912_v12 = vor.u32 %v4663_v11, %v3911_v10  ;;  %v4039_v13 = vld [vmem:[#allocation2 + $0x740] sm:$0xf]  ;;  %v4695_v14 = vld [vmem:[#allocation2 + $0x74c] sm:$0xf0]  ;;  %v3337_v2 = vld [vmem:[#allocation2 + $0x1d0] sm:$0xf0] }
  0x4e   :  { %1921 = vmatpush.bf16.msra.mxu1 %v3784_v39  ;;  %1944 = vmatpush.bf16.msra.mxu3 %v4088_v55  ;;  %v4040_v15 = vor.u32 %v4695_v14, %v4039_v13  ;;  %v3895_v16 = vld [vmem:[#allocation2 + $0x620] sm:$0xf]  ;;  %v4659_v17 = vld [vmem:[#allocation2 + $0x62c] sm:$0xf0]  ;;  %v271_v39 = vunpack.c.l.bf16 %v241_v33  ;;  %v256_v4 = vperm.slane %v254_v48, 0  ;;  %v5029_v11 = vld [vmem:[#allocation1 + $0x3f] sm:$0xff]  ;;  %v3212_v13 = vor.u32 %v4485_v61, %v3209_v62 }
  0x4f   :  { %1909 = vmatpush.bf16.msra.mxu0 %v3640_v47  ;;  %v4023_v18 = vld [vmem:[#allocation2 + $0x720] sm:$0xf]  ;;  %v3896_v19 = vor.u32 %v4659_v17, %v3895_v16  ;;  %v4691_v20 = vld [vmem:[#allocation2 + $0x72c] sm:$0xf0]  ;;  %v3340_v14 = vor.u32 %v4517_v1, %v3337_v2  ;;  %v4505_v48 = vld [vmem:[#allocation2 + $0x164] sm:$0xf] }
  0x50   :  { %1932 = vmatpush.bf16.msra.mxu2 %v3944_v0  ;;  %v232_v22 = vld [vmem:[#allocation1 + $0x9] sm:$0xff]  ;;  %v4024_v23 = vor.u32 %v4691_v20, %v4023_v18  ;;  %v4655_v25 = vld [vmem:[#allocation2 + $0x60c] sm:$0xf0]  ;;  %v3356_v0 = vor.u32 %v4521_v52, %v3353_v53  ;;  %v276_v18 = vunpack.c.l.bf16 %v256_v4  ;;  %v3193_v20 = vld [vmem:[#allocation2 + $0xb0] sm:$0xf0] }
  0x51   :  { %v3879_v24 = vld [vmem:[#allocation2 + $0x600] sm:$0xf]  ;;  %v242_v28 = vpack.i.b16 %v232_v22, %v232_v22  ;;  %v4687_v30 = vld [vmem:[#allocation2 + $0x70c] sm:$0xf0]  ;;  %v3145_v1 = vld [vmem:[#allocation2 + $0x50] sm:$0xf0] }
  0x52   :  { %1922 = vmatpush.bf16.msra.mxu1 %v3768_v51  ;;  %1945 = vmatpush.bf16.msra.mxu3 %v4072_v8  ;;  %v4007_v26 = vld [vmem:[#allocation2 + $0x700] sm:$0xf]  ;;  %v3880_v29 = vor.u32 %v4655_v25, %v3879_v24  ;;  %v233_v55 = vld [vmem:[#allocation1 + $0x12] sm:$0xff]  ;;  %v234_v56 = vld [vmem:[#allocation1 + $0x1b] sm:$0xff] }
  0x53   :  { %1910 = vmatpush.bf16.msra.mxu0 %v3624_v59  ;;  %v4008_v31 = vor.u32 %v4687_v30, %v4007_v26  ;;  %v244_v34 = vperm.slane %v242_v28, 0  ;;  %v235_v41 = vld [vmem:[#allocation1 + $0x24] sm:$0xff]  ;;  %v245_v7 = vpack.i.b16 %v233_v55, %v233_v55  ;;  %v5027_v10 = vld [vmem:[#allocation1 + $0x36] sm:$0xff] }
  0x54   :  { %1933 = vmatpush.bf16.msra.mxu2 %v3928_v6  ;;  %v251_v47 = vpack.i.b16 %v235_v41, %v235_v41  ;;  %v3321_v24 = vld [vmem:[#allocation2 + $0x1b0] sm:$0xf0]  ;;  %v257_v2 = vpack.i.b16 %v5027_v10, %v5027_v10 }
  0x55   :  { %v272_v40 = vunpack.c.l.bf16 %v244_v34  ;;  %v247_v21 = vperm.slane %v245_v7, 0  ;;  %v4501_v7 = vld [vmem:[#allocation2 + $0x144] sm:$0xf] }
  0x56   :  { %1923 = vmatpush.bf16.msra.mxu1 %v3752_v63  ;;  %1946 = vmatpush.bf16.msra.mxu3 %v4056_v9  ;;  %v253_v3 = vperm.slane %v251_v47, 0  ;;  %v248_v9 = vpack.i.b16 %v234_v56, %v234_v56  ;;  %v4585_v56 = vld [vmem:[#allocation2 + $0x3e4] sm:$0xf] }
  0x57   :  { %v273_v33 = vunpack.c.l.bf16 %v247_v21 }
  0x58   :  { %1934 = vmatpush.bf16.msra.mxu2 %v3912_v12  ;;  %v2269_v12 = vld [vmem:[%s5191_s4] sm:$0xf]  ;;  %v275_v17 = vunpack.c.l.bf16 %v253_v3  ;;  %v250_v22 = vperm.slane %v248_v9, 0  ;;  %v3273_v9 = vld [vmem:[#allocation2 + $0x150] sm:$0xf0] }
  0x59   :  { %2271 = vst [vmem:[#allocation1] ss:$9 sm:$0xff] %v2269_v12  ;;  %v4549_v12 = vld [vmem:[#allocation2 + $0x2c4] sm:$0xf] }
  0x5a   :  { %1947 = vmatpush.bf16.msra.mxu3 %v4040_v15  ;;  %v274_v34 = vunpack.c.l.bf16 %v250_v22  ;;  %v4497_v22 = vld [vmem:[#allocation2 + $0x124] sm:$0xf] }
  0x5c   :  { %1935 = vmatpush.bf16.msra.mxu2 %v3896_v19  ;;  %v4481_v19 = vld [vmem:[#allocation2 + $0xa4] sm:$0xf] }
  0x5d   :  { %v3196_v26 = vor.u32 %v4481_v19, %v3193_v20  ;;  %v3129_v19 = vld [vmem:[#allocation2 + $0x30] sm:$0xf0] }
  0x5e   :  { %1948 = vmatpush.bf16.msra.mxu3 %v4024_v23  ;;  %v4513_v23 = vld [vmem:[#allocation2 + $0x1a4] sm:$0xf] }
  0x5f   :  { %v3324_v30 = vor.u32 %v4513_v23, %v3321_v24  ;;  %v3257_v23 = vld [vmem:[#allocation2 + $0x130] sm:$0xf0]  ;;  %v4545_v24 = vld [vmem:[#allocation2 + $0x2a4] sm:$0xf] }
  0x60   :  { %1936 = vmatpush.bf16.msra.mxu2 %v3880_v29 }
  0x62   :  { %1949 = vmatpush.bf16.msra.mxu3 %v4008_v31  ;;  %v4477_v31 = vld [vmem:[#allocation2 + $0x84] sm:$0xf] }
  0x93   :  { %v181_v32 = vpop.f32.mrf.mxu0 }
  0x96   :  { %v194_v35 = vpop.f32.mrf.mxu1  ;;  %v129_v36 = vpop.f32.mrf.mxu2 }
  0x97   :  { %v226_v8 = vpack.c.bf16 %v194_v35, %v181_v32  ;;  %v3177_v35 = vld [vmem:[#allocation2 + $0x90] sm:$0xf0] }
  0x98   :  { %v142_v37 = vpop.f32.mrf.mxu3  ;;  %v3180_v42 = vor.u32 %v4477_v31, %v3177_v35  ;;  %v4461_v35 = vld [vmem:[#allocation2 + $0x4] sm:$0xf] }
  0x99   :  { %v224_v38 = vpack.c.bf16 %v142_v37, %v129_v36  ;;  %v267_v15 = vunpack.c.l.bf16 %v226_v8  ;;  %v268_v16 = vunpack.c.h.bf16 %v226_v8  ;;  %v4509_v36 = vld [vmem:[#allocation2 + $0x184] sm:$0xf]  ;;  %v3305_v37 = vld [vmem:[#allocation2 + $0x190] sm:$0xf0]  ;;  %v260_v8 = vpack.i.b16 %v5029_v11, %v5029_v11 }
  0x9a   :  { %v3276_v11 = vor.u32 %v4501_v7, %v3273_v9  ;;  %v3721_v9 = vld [vmem:[#allocation2 + $0x4d0] sm:$0xf0] }
  0x9b   :  { %v263_v43 = vunpack.c.l.bf16 %v224_v38  ;;  %v264_v44 = vunpack.c.h.bf16 %v224_v38  ;;  %v183_v49 = vpop.f32.mrf.mxu0  ;;  %v283_v28 = vadd.f32 %v275_v17, %v267_v15  ;;  %v284_v29 = vadd.f32 %v276_v18, %v268_v16  ;;  %v3593_v15 = vld [vmem:[#allocation2 + $0x3d0] sm:$0xf0]  ;;  %v4465_v18 = vld [vmem:[#allocation2 + $0x24] sm:$0xf] }
  0x9c   :  { %v3289_v49 = vld [vmem:[#allocation2 + $0x170] sm:$0xf0]  ;;  %v259_v16 = vperm.slane %v257_v2, 0  ;;  %v262_v17 = vperm.slane %v260_v8, 0 }
  0x9d   :  { %v279_v50 = vadd.f32 %v271_v39, %v263_v43  ;;  %v280_v51 = vadd.f32 %v272_v40, %v264_v44  ;;  %v303_v40 = vmax.f32 %v283_v28, 0.0  ;;  %v304_v41 = vmax.f32 %v284_v29, 0.0  ;;  %v4473_v44 = vld [vmem:[#allocation2 + $0x64] sm:$0xf]  ;;  %v3577_v28 = vld [vmem:[#allocation2 + $0x3b0] sm:$0xf0] }
  0x9e   :  { %v196_v54 = vpop.f32.mrf.mxu1  ;;  %v131_v59 = vpop.f32.mrf.mxu2  ;;  %v3308_v43 = vor.u32 %v4509_v36, %v3305_v37  ;;  %v3164_v55 = vor.u32 %v4473_v44, %v3161_v45  ;;  %v3292_v61 = vor.u32 %v4505_v48, %v3289_v49  ;;  %v3113_v36 = vld [vmem:[#allocation2 + $0x10] sm:$0xf0]  ;;  %v4493_v37 = vld [vmem:[#allocation2 + $0x104] sm:$0xf] }
  0x9f   :  { %v299_v57 = vmax.f32 %v279_v50, 0.0  ;;  %v300_v58 = vmax.f32 %v280_v51, 0.0  ;;  %v4553_v50 = vld [vmem:[#allocation2 + $0x2e4] sm:$0xf]  ;;  %v3481_v51 = vld [vmem:[#allocation2 + $0x2f0] sm:$0xf0]  ;;  %v5038_v59 = vpack.c.bf16 %v304_v41, %v304_v41  ;;  %v3116_v48 = vor.u32 %v4461_v35, %v3113_v36 }
  0xa0   :  { %v144_v63 = vpop.f32.mrf.mxu3  ;;  %v3484_v3 = vor.u32 %v4553_v50, %v3481_v51  ;;  %v4541_v41 = vld [vmem:[#allocation2 + $0x284] sm:$0xf]  ;;  %v3737_v49 = vld [vmem:[#allocation2 + $0x4f0] sm:$0xf0] }
  0xa1   :  { %v5023_v5 = vpack.c.bf16 %v299_v57, %v299_v57  ;;  %v5025_v6 = vpack.c.bf16 %v300_v58, %v300_v58  ;;  %v3609_v57 = vld [vmem:[#allocation2 + $0x3f0] sm:$0xf0]  ;;  %v5036_v58 = vpack.c.bf16 %v303_v40, %v303_v40  ;;  %v4573_v45 = vld [vmem:[#allocation2 + $0x384] sm:$0xf] }
  0xa2   :  { %v3612_v4 = vor.u32 %v4585_v56, %v3609_v57  ;;  %v3241_v40 = vld [vmem:[#allocation2 + $0x110] sm:$0xf0]  ;;  %v4649_v50 = vld [vmem:[#allocation2 + $0x5e4] sm:$0xf] }
  0xa3   :  { %1859 = vmatmul.bf16.vlgmr.msrb.gmra.mxu0 %v5023_v5  ;;  %1872 = vmatmul.bf16.vlgmr.msrb.gmra.mxu1 %v5025_v6  ;;  %v3865_v51 = vld [vmem:[#allocation2 + $0x5f0] sm:$0xf0]  ;;  %v4537_v57 = vld [vmem:[#allocation2 + $0x264] sm:$0xf] }
  0xa4   :  { %1955 = vmatpush.bf16.msrb.mxu0 %v3228_v60  ;;  %1968 = vmatpush.bf16.msrb.mxu1 %v3356_v0  ;;  %v4469_v0 = vld [vmem:[#allocation2 + $0x44] sm:$0xf]  ;;  %v3868_v8 = vor.u32 %v4649_v50, %v3865_v51  ;;  %v3689_v36 = vld [vmem:[#allocation2 + $0x490] sm:$0xf0] }
  0xa5   :  { %v3148_v10 = vor.u32 %v4469_v0, %v3145_v1  ;;  %v4605_v35 = vld [vmem:[#allocation2 + $0x484] sm:$0xf]  ;;  %v3801_v50 = vld [vmem:[#allocation2 + $0x570] sm:$0xf0] }
  0xa6   :  { %v155_v25 = vpop.f32.mrf.mxu2  ;;  %v4681_v51 = vld [vmem:[#allocation2 + $0x6e4] sm:$0xf] }
  0xa8   :  { %1956 = vmatpush.bf16.msrb.mxu0 %v3212_v13  ;;  %1969 = vmatpush.bf16.msrb.mxu1 %v3340_v14  ;;  %v168_v27 = vpop.f32.mrf.mxu3  ;;  %v3465_v13 = vld [vmem:[#allocation2 + $0x2d0] sm:$0xf0]  ;;  %v4581_v14 = vld [vmem:[#allocation2 + $0x3c4] sm:$0xf] }
  0xa9   :  { %v225_v32 = vpack.c.bf16 %v168_v27, %v155_v25  ;;  %v3468_v20 = vor.u32 %v4549_v12, %v3465_v13  ;;  %v3596_v21 = vor.u32 %v4581_v14, %v3593_v15  ;;  %v4577_v27 = vld [vmem:[#allocation2 + $0x3a4] sm:$0xf]  ;;  %v3849_v13 = vld [vmem:[#allocation2 + $0x5d0] sm:$0xf0] }
  0xaa   :  { %v4645_v12 = vld [vmem:[#allocation2 + $0x5c4] sm:$0xf] }
  0xab   :  { %v265_v38 = vunpack.c.l.bf16 %v225_v32  ;;  %v266_v39 = vunpack.c.h.bf16 %v225_v32  ;;  %v277_v32 = vunpack.c.l.bf16 %v259_v16 }
  0xac   :  { %1957 = vmatpush.bf16.msrb.mxu0 %v3196_v26  ;;  %1970 = vmatpush.bf16.msrb.mxu1 %v3324_v30  ;;  %v3449_v26 = vld [vmem:[#allocation2 + $0x2b0] sm:$0xf0]  ;;  %v3132_v30 = vor.u32 %v4465_v18, %v3129_v19 }
  0xad   :  { %v281_v46 = vadd.f32 %v273_v33, %v265_v38  ;;  %v282_v47 = vadd.f32 %v274_v34, %v266_v39  ;;  %v278_v33 = vunpack.c.l.bf16 %v262_v17  ;;  %v3260_v34 = vor.u32 %v4497_v22, %v3257_v23  ;;  %v4533_v17 = vld [vmem:[#allocation2 + $0x244] sm:$0xf]  ;;  %v3401_v18 = vld [vmem:[#allocation2 + $0x250] sm:$0xf0] }
  0xae   :  { %v157_v54 = vpop.f32.mrf.mxu2  ;;  %v3452_v38 = vor.u32 %v4545_v24, %v3449_v26  ;;  %v3580_v39 = vor.u32 %v4577_v27, %v3577_v28  ;;  %v3529_v22 = vld [vmem:[#allocation2 + $0x350] sm:$0xf0]  ;;  %v4609_v23 = vld [vmem:[#allocation2 + $0x4a4] sm:$0xf]  ;;  %v3404_v27 = vor.u32 %v4533_v17, %v3401_v18 }
  0xaf   :  { %v301_v52 = vmax.f32 %v281_v46, 0.0  ;;  %v302_v53 = vmax.f32 %v282_v47, 0.0  ;;  %v3561_v46 = vld [vmem:[#allocation2 + $0x390] sm:$0xf0]  ;;  %v4617_v47 = vld [vmem:[#allocation2 + $0x4e4] sm:$0xf]  ;;  %v3244_v54 = vor.u32 %v4493_v37, %v3241_v40 }
  0xb0   :  { %1958 = vmatpush.bf16.msrb.mxu0 %v3180_v42  ;;  %1971 = vmatpush.bf16.msrb.mxu1 %v3308_v43  ;;  %v170_v60 = vpop.f32.mrf.mxu3  ;;  %v3433_v42 = vld [vmem:[#allocation2 + $0x290] sm:$0xf0]  ;;  %v3564_v56 = vor.u32 %v4573_v45, %v3561_v46  ;;  %v3740_v2 = vor.u32 %v4617_v47, %v3737_v49  ;;  %v4637_v37 = vld [vmem:[#allocation2 + $0x584] sm:$0xf] }
  0xb1   :  { %v5040_v62 = vpack.c.bf16 %v301_v52, %v301_v52  ;;  %v5042_v63 = vpack.c.bf16 %v302_v53, %v302_v53  ;;  %v3417_v60 = vld [vmem:[#allocation2 + $0x270] sm:$0xf0]  ;;  %v4601_v47 = vld [vmem:[#allocation2 + $0x464] sm:$0xf] }
  0xb2   :  { %v3705_v24 = vld [vmem:[#allocation2 + $0x4b0] sm:$0xf0]  ;;  %v4633_v49 = vld [vmem:[#allocation2 + $0x564] sm:$0xf] }
  0xb3   :  { %1885 = vmatmul.bf16.vlgmr.msrb.gmra.mxu2 %v5040_v62  ;;  %1898 = vmatmul.bf16.vlgmr.msrb.gmra.mxu3 %v5042_v63  ;;  %v3833_v26 = vld [vmem:[#allocation2 + $0x5b0] sm:$0xf0] }
  0xb4   :  { %1911 = vmatmul.bf16.vlgmr.msra.gmra.mxu0 %v5036_v58  ;;  %1924 = vmatmul.bf16.vlgmr.msra.gmra.mxu1 %v5038_v59  ;;  %v3497_v46 = vld [vmem:[#allocation2 + $0x310] sm:$0xf0] }
  0xb5   :  { %1959 = vmatpush.bf16.msrb.mxu0 %v3164_v55  ;;  %1972 = vmatpush.bf16.msrb.mxu1 %v3292_v61  ;;  %v3436_v55 = vor.u32 %v4541_v41, %v3433_v42  ;;  %v4569_v61 = vld [vmem:[#allocation2 + $0x364] sm:$0xf]  ;;  %v3369_v42 = vld [vmem:[#allocation2 + $0x210] sm:$0xf0] }
  0xb6   :  { %1981 = vmatpush.bf16.msrb.mxu2 %v3484_v3  ;;  %1994 = vmatpush.bf16.msrb.mxu3 %v3612_v4  ;;  %v207_v25 = vpop.f32.mrf.mxu2  ;;  %v3545_v3 = vld [vmem:[#allocation2 + $0x370] sm:$0xf0]  ;;  %v4613_v4 = vld [vmem:[#allocation2 + $0x4c4] sm:$0xf] }
  0xb7   :  { %v3548_v16 = vor.u32 %v4569_v61, %v3545_v3  ;;  %v3724_v19 = vor.u32 %v4613_v4, %v3721_v9  ;;  %v4525_v41 = vld [vmem:[#allocation2 + $0x204] sm:$0xf]  ;;  %v3785_v3 = vld [vmem:[#allocation2 + $0x550] sm:$0xf0] }
  0xb8   :  { %v220_v29 = vpop.f32.mrf.mxu3  ;;  %v4597_v61 = vld [vmem:[#allocation2 + $0x444] sm:$0xf] }
  0xb9   :  { %1960 = vmatpush.bf16.msrb.mxu0 %v3148_v10  ;;  %1973 = vmatpush.bf16.msrb.mxu1 %v3276_v11  ;;  %v227_v31 = vpack.c.bf16 %v220_v29, %v207_v25  ;;  %v3420_v11 = vor.u32 %v4537_v57, %v3417_v60  ;;  %v4641_v25 = vld [vmem:[#allocation2 + $0x5a4] sm:$0xf]  ;;  %v3804_v60 = vor.u32 %v4633_v49, %v3801_v50  ;;  %v4057_v50 = vld [vmem:[#allocation2 + $0x770] sm:$0xf0] }
  0xba   :  { %1982 = vmatpush.bf16.msrb.mxu2 %v3468_v20  ;;  %1995 = vmatpush.bf16.msrb.mxu3 %v3596_v21  ;;  %v3852_v20 = vor.u32 %v4645_v12, %v3849_v13  ;;  %v4565_v21 = vld [vmem:[#allocation2 + $0x344] sm:$0xf]  ;;  %v4105_v12 = vld [vmem:[#allocation2 + $0x7d0] sm:$0xf0] }
  0xbb   :  { %v269_v43 = vunpack.c.l.bf16 %v227_v31  ;;  %v270_v44 = vunpack.c.h.bf16 %v227_v31  ;;  %v3532_v28 = vor.u32 %v4565_v21, %v3529_v22  ;;  %v4529_v29 = vld [vmem:[#allocation2 + $0x224] sm:$0xf]  ;;  %v3708_v31 = vor.u32 %v4609_v23, %v3705_v24  ;;  %v3961_v22 = vld [vmem:[#allocation2 + $0x6b0] sm:$0xf0] }
  0xbc   :  { %v4677_v4 = vld [vmem:[#allocation2 + $0x6c4] sm:$0xf]  ;;  %v4089_v24 = vld [vmem:[#allocation2 + $0x7b0] sm:$0xf0] }
  0xbd   :  { %v285_v52 = vadd.f32 %v277_v32, %v269_v43  ;;  %v286_v53 = vadd.f32 %v278_v33, %v270_v44  ;;  %1961 = vmatpush.bf16.msrb.mxu0 %v3132_v30  ;;  %1974 = vmatpush.bf16.msrb.mxu1 %v3260_v34  ;;  %v3385_v30 = vld [vmem:[#allocation2 + $0x230] sm:$0xf0]  ;;  %v3836_v32 = vor.u32 %v4641_v25, %v3833_v26  ;;  %v4561_v33 = vld [vmem:[#allocation2 + $0x324] sm:$0xf] }
  0xbe   :  { %1983 = vmatpush.bf16.msrb.mxu2 %v3452_v38  ;;  %1996 = vmatpush.bf16.msrb.mxu3 %v3580_v39  ;;  %v209_v7 = vpop.f32.mrf.mxu2  ;;  %v3513_v34 = vld [vmem:[#allocation2 + $0x330] sm:$0xf0]  ;;  %v3388_v39 = vor.u32 %v4529_v29, %v3385_v30  ;;  %v4557_v43 = vld [vmem:[#allocation2 + $0x304] sm:$0xf]  ;;  %v3692_v44 = vor.u32 %v4605_v35, %v3689_v36 }
  0xbf   :  { %v305_v0 = vmax.f32 %v285_v52, 0.0  ;;  %v306_v1 = vmax.f32 %v286_v53, 0.0  ;;  %v3817_v38 = vld [vmem:[#allocation2 + $0x590] sm:$0xf0]  ;;  %v3516_v40 = vor.u32 %v4561_v33, %v3513_v34  ;;  %v4713_v53 = vld [vmem:[#allocation2 + $0x7e4] sm:$0xf] }
  0xc0   :  { %v222_v14 = vpop.f32.mrf.mxu3  ;;  %v3820_v45 = vor.u32 %v4637_v37, %v3817_v38  ;;  %v3993_v52 = vld [vmem:[#allocation2 + $0x6f0] sm:$0xf0]  ;;  %v4709_v9 = vld [vmem:[#allocation2 + $0x7c4] sm:$0xf]  ;;  %v3231_v37 = vld [vmem:[#allocation2 + $0xe8] sm:$0xf] }
  0xc1   :  { %v5052_v15 = vpack.c.bf16 %v305_v0, %v305_v0  ;;  %v5054_v10 = vpack.c.bf16 %v306_v1, %v306_v1  ;;  %1962 = vmatpush.bf16.msrb.mxu0 %v3116_v48  ;;  %1975 = vmatpush.bf16.msrb.mxu1 %v3244_v54  ;;  %v3673_v48 = vld [vmem:[#allocation2 + $0x470] sm:$0xf0]  ;;  %v3996_v1 = vor.u32 %v4681_v51, %v3993_v52  ;;  %v4673_v21 = vld [vmem:[#allocation2 + $0x6a4] sm:$0xf]  ;;  %v4492_v38 = vld [vmem:[#allocation2 + $0xf4] sm:$0xf0] }
  0xc2   :  { %1984 = vmatpush.bf16.msrb.mxu2 %v3436_v55  ;;  %1997 = vmatpush.bf16.msrb.mxu3 %v3564_v56  ;;  %v4121_v54 = vld [vmem:[#allocation2 + $0x7f0] sm:$0xf0]  ;;  %v3372_v55 = vor.u32 %v4525_v41, %v3369_v42  ;;  %v3500_v56 = vor.u32 %v4557_v43, %v3497_v46  ;;  %v3676_v57 = vor.u32 %v4601_v47, %v3673_v48  ;;  %v4705_v23 = vld [vmem:[#allocation2 + $0x7a4] sm:$0xf]  ;;  %v3215_v51 = vld [vmem:[#allocation2 + $0xc8] sm:$0xf] }
  0xc3   :  { %1937 = vmatmul.bf16.vlgmr.msra.gmra.mxu2 %v5052_v15  ;;  %1950 = vmatmul.bf16.vlgmr.msra.gmra.mxu3 %v5054_v10  ;;  %v3657_v0 = vld [vmem:[#allocation2 + $0x450] sm:$0xf0]  ;;  %v4108_v18 = vor.u32 %v4709_v9, %v4105_v12  ;;  %v4621_v29 = vld [vmem:[#allocation2 + $0x504] sm:$0xf]  ;;  %v3964_v30 = vor.u32 %v4673_v21, %v3961_v22  ;;  %v3232_v47 = vor.u32 %v4492_v38, %v3231_v37  ;;  %v4488_v52 = vld [vmem:[#allocation2 + $0xd4] sm:$0xf0] }
  0xc4   :  { %1963 = vmatmul.bf16.vlgmr.msrb.gmra.mxu0 %v5023_v5  ;;  %1976 = vmatmul.bf16.vlgmr.msrb.gmra.mxu1 %v5025_v6  ;;  %v3977_v7 = vld [vmem:[#allocation2 + $0x6d0] sm:$0xf0]  ;;  %v3660_v13 = vor.u32 %v4597_v61, %v3657_v0  ;;  %v4669_v33 = vld [vmem:[#allocation2 + $0x684] sm:$0xf]  ;;  %v3216_v61 = vor.u32 %v4488_v52, %v3215_v51  ;;  %v3311_v21 = vld [vmem:[#allocation2 + $0x188] sm:$0xf] }
  0xc5   :  { %2007 = vmatpush.bf16.msra.mxu0 %v3740_v2  ;;  %2020 = vmatpush.bf16.msra.mxu1 %v3868_v8  ;;  %v4124_v2 = vor.u32 %v4713_v53, %v4121_v54  ;;  %v4629_v8 = vld [vmem:[#allocation2 + $0x544] sm:$0xf]  ;;  %v3980_v17 = vor.u32 %v4677_v4, %v3977_v7  ;;  %v3945_v34 = vld [vmem:[#allocation2 + $0x690] sm:$0xf0]  ;;  %v3343_v53 = vld [vmem:[#allocation2 + $0x1c8] sm:$0xf] }
  0xc6   :  { %1985 = vmatpush.bf16.msrb.mxu2 %v3420_v11  ;;  %1998 = vmatpush.bf16.msrb.mxu3 %v3548_v16  ;;  %v3788_v14 = vor.u32 %v4629_v8, %v3785_v3  ;;  %v4593_v11 = vld [vmem:[#allocation2 + $0x424] sm:$0xf]  ;;  %v3641_v16 = vld [vmem:[#allocation2 + $0x430] sm:$0xf0]  ;;  %v3948_v43 = vor.u32 %v4669_v33, %v3945_v34  ;;  %v4520_v54 = vld [vmem:[#allocation2 + $0x1d4] sm:$0xf0] }
  0xc7   :  { %v3644_v25 = vor.u32 %v4593_v11, %v3641_v16  ;;  %v4701_v35 = vld [vmem:[#allocation2 + $0x784] sm:$0xf]  ;;  %v4073_v36 = vld [vmem:[#allocation2 + $0x790] sm:$0xf0]  ;;  %v3344_v0 = vor.u32 %v4520_v54, %v3343_v53  ;;  %v3199_v8 = vld [vmem:[#allocation2 + $0xa8] sm:$0xf] }
  0xc8   :  { %v3929_v46 = vld [vmem:[#allocation2 + $0x670] sm:$0xf0]  ;;  %v4697_v49 = vld [vmem:[#allocation2 + $0x764] sm:$0xf]  ;;  %v4484_v3 = vld [vmem:[#allocation2 + $0xb4] sm:$0xf0] }
  0xc9   :  { %2008 = vmatpush.bf16.msra.mxu0 %v3724_v19  ;;  %2021 = vmatpush.bf16.msra.mxu1 %v3852_v20  ;;  %v4625_v19 = vld [vmem:[#allocation2 + $0x524] sm:$0xf]  ;;  %v3769_v20 = vld [vmem:[#allocation2 + $0x530] sm:$0xf0]  ;;  %v3327_v4 = vld [vmem:[#allocation2 + $0x1a8] sm:$0xf]  ;;  %v3200_v11 = vor.u32 %v4484_v3, %v3199_v8 }
  0xca   :  { %1986 = vmatpush.bf16.msrb.mxu2 %v3404_v27  ;;  %1999 = vmatpush.bf16.msrb.mxu3 %v3532_v28  ;;  %v3772_v26 = vor.u32 %v4625_v19, %v3769_v20  ;;  %v4589_v27 = vld [vmem:[#allocation2 + $0x404] sm:$0xf]  ;;  %v3625_v28 = vld [vmem:[#allocation2 + $0x410] sm:$0xf0]  ;;  %v4516_v7 = vld [vmem:[#allocation2 + $0x1b4] sm:$0xf0] }
  0xcb   :  { %v3628_v41 = vor.u32 %v4589_v27, %v3625_v28  ;;  %v3328_v16 = vor.u32 %v4516_v7, %v3327_v4  ;;  %v3183_v19 = vld [vmem:[#allocation2 + $0x88] sm:$0xf]  ;;  %v4480_v20 = vld [vmem:[#allocation2 + $0x94] sm:$0xf0]  ;;  %v4685_v27 = vld [vmem:[#allocation2 + $0x704] sm:$0xf] }
  0xcc   :  { %v4512_v22 = vld [vmem:[#allocation2 + $0x194] sm:$0xf0]  ;;  %v3184_v28 = vor.u32 %v4480_v20, %v3183_v19  ;;  %v3295_v33 = vld [vmem:[#allocation2 + $0x168] sm:$0xf] }
  0xcd   :  { %2009 = vmatpush.bf16.msra.mxu0 %v3708_v31  ;;  %2022 = vmatpush.bf16.msra.mxu1 %v3836_v32  ;;  %v4092_v31 = vor.u32 %v4705_v23, %v4089_v24  ;;  %v3753_v32 = vld [vmem:[#allocation2 + $0x510] sm:$0xf0]  ;;  %v4508_v34 = vld [vmem:[#allocation2 + $0x174] sm:$0xf0]  ;;  %v3615_v37 = vld [vmem:[#allocation2 + $0x3e8] sm:$0xf] }
  0xce   :  { %1987 = vmatpush.bf16.msrb.mxu2 %v3388_v39  ;;  %2000 = vmatpush.bf16.msrb.mxu3 %v3516_v40  ;;  %v3359_v39 = vld [vmem:[#allocation2 + $0x1e8] sm:$0xf]  ;;  %v4524_v40 = vld [vmem:[#allocation2 + $0x1f4] sm:$0xf0]  ;;  %v3756_v42 = vor.u32 %v4621_v29, %v3753_v32  ;;  %v3312_v29 = vor.u32 %v4512_v22, %v3311_v21 }
  0xcf   :  { %v3360_v48 = vor.u32 %v4524_v40, %v3359_v39  ;;  %v4476_v32 = vld [vmem:[#allocation2 + $0x74] sm:$0xf0]  ;;  %v3599_v51 = vld [vmem:[#allocation2 + $0x3c8] sm:$0xf] }
  0xd0   :  { %v4588_v38 = vld [vmem:[#allocation2 + $0x3f4] sm:$0xf0]  ;;  %v3583_v8 = vld [vmem:[#allocation2 + $0x3a8] sm:$0xf] }
  0xd1   :  { %2010 = vmatpush.bf16.msra.mxu0 %v3692_v44  ;;  %2023 = vmatpush.bf16.msra.mxu1 %v3820_v45  ;;  %v4076_v44 = vor.u32 %v4701_v35, %v4073_v36  ;;  %v4665_v45 = vld [vmem:[#allocation2 + $0x664] sm:$0xf]  ;;  %v3487_v35 = vld [vmem:[#allocation2 + $0x2e8] sm:$0xf]  ;;  %v4556_v36 = vld [vmem:[#allocation2 + $0x2f4] sm:$0xf0] }
  0xd2   :  { %1988 = vmatpush.bf16.msrb.mxu2 %v3372_v55  ;;  %2001 = vmatpush.bf16.msrb.mxu3 %v3500_v56  ;;  %v3932_v55 = vor.u32 %v4665_v45, %v3929_v46  ;;  %v4060_v56 = vor.u32 %v4697_v49, %v4057_v50  ;;  %v3488_v45 = vor.u32 %v4556_v36, %v3487_v35  ;;  %v3471_v49 = vld [vmem:[#allocation2 + $0x2c8] sm:$0xf]  ;;  %v4552_v50 = vld [vmem:[#allocation2 + $0x2d4] sm:$0xf0] }
  0xd3   :  { %v3616_v46 = vor.u32 %v4588_v38, %v3615_v37  ;;  %v4584_v52 = vld [vmem:[#allocation2 + $0x3d4] sm:$0xf0]  ;;  %v3567_v19 = vld [vmem:[#allocation2 + $0x388] sm:$0xf] }
  0xd4   :  { %v4580_v3 = vld [vmem:[#allocation2 + $0x3b4] sm:$0xf0]  ;;  %v3743_v21 = vld [vmem:[#allocation2 + $0x4e8] sm:$0xf] }
  0xd5   :  { %2011 = vmatpush.bf16.msra.mxu0 %v3676_v57  ;;  %2024 = vmatpush.bf16.msra.mxu1 %v3804_v60  ;;  %v4661_v57 = vld [vmem:[#allocation2 + $0x644] sm:$0xf]  ;;  %v3913_v60 = vld [vmem:[#allocation2 + $0x650] sm:$0xf0]  ;;  %v4576_v20 = vld [vmem:[#allocation2 + $0x394] sm:$0xf0] }
  0xd6   :  { %2033 = vmatpush.bf16.msra.mxu2 %v3996_v1  ;;  %2046 = vmatpush.bf16.msra.mxu3 %v4124_v2  ;;  %v4693_v1 = vld [vmem:[#allocation2 + $0x744] sm:$0xf]  ;;  %v4041_v2 = vld [vmem:[#allocation2 + $0x750] sm:$0xf0]  ;;  %v3916_v9 = vor.u32 %v4661_v57, %v3913_v60  ;;  %v3472_v57 = vor.u32 %v4552_v50, %v3471_v49  ;;  %v3600_v60 = vor.u32 %v4584_v52, %v3599_v51  ;;  %v4620_v22 = vld [vmem:[#allocation2 + $0x4f4] sm:$0xf0] }
  0xd7   :  { %1989 = vmatmul.bf16.vlgmr.msrb.gmra.mxu2 %v5040_v62  ;;  %2002 = vmatmul.bf16.vlgmr.msrb.gmra.mxu3 %v5042_v63  ;;  %v4044_v12 = vor.u32 %v4693_v1, %v4041_v2  ;;  %v3455_v1 = vld [vmem:[#allocation2 + $0x2a8] sm:$0xf]  ;;  %v4548_v2 = vld [vmem:[#allocation2 + $0x2b4] sm:$0xf0] }
  0xd8   :  { %v3727_v35 = vld [vmem:[#allocation2 + $0x4c8] sm:$0xf]  ;;  %v4616_v36 = vld [vmem:[#allocation2 + $0x4d4] sm:$0xf0] }
  0xd9   :  { %2012 = vmatpush.bf16.msra.mxu0 %v3660_v13  ;;  %2025 = vmatpush.bf16.msra.mxu1 %v3788_v14  ;;  %v4657_v13 = vld [vmem:[#allocation2 + $0x624] sm:$0xf]  ;;  %v3897_v14 = vld [vmem:[#allocation2 + $0x630] sm:$0xf0]  ;;  %v3855_v37 = vld [vmem:[#allocation2 + $0x5c8] sm:$0xf] }
  0xda   :  { %2034 = vmatpush.bf16.msra.mxu2 %v3980_v17  ;;  %2047 = vmatpush.bf16.msra.mxu3 %v4108_v18  ;;  %v4689_v17 = vld [vmem:[#allocation2 + $0x724] sm:$0xf]  ;;  %v4025_v18 = vld [vmem:[#allocation2 + $0x730] sm:$0xf0]  ;;  %v3900_v23 = vor.u32 %v4657_v13, %v3897_v14  ;;  %v3247_v13 = vld [vmem:[#allocation2 + $0x108] sm:$0xf]  ;;  %v3456_v14 = vor.u32 %v4548_v2, %v3455_v1 }
  0xdb   :  { %v4028_v24 = vor.u32 %v4689_v17, %v4025_v18  ;;  %v3439_v17 = vld [vmem:[#allocation2 + $0x288] sm:$0xf]  ;;  %v4544_v18 = vld [vmem:[#allocation2 + $0x294] sm:$0xf0] }
  0xdc   :  { %v4648_v38 = vld [vmem:[#allocation2 + $0x5d4] sm:$0xf0]  ;;  %v3839_v49 = vld [vmem:[#allocation2 + $0x5a8] sm:$0xf] }
  0xdd   :  { %2013 = vmatpush.bf16.msra.mxu0 %v3644_v25  ;;  %2026 = vmatpush.bf16.msra.mxu1 %v3772_v26  ;;  %v4653_v25 = vld [vmem:[#allocation2 + $0x604] sm:$0xf]  ;;  %v3881_v26 = vld [vmem:[#allocation2 + $0x610] sm:$0xf0]  ;;  %v4644_v50 = vld [vmem:[#allocation2 + $0x5b4] sm:$0xf0] }
  0xde   :  { %2035 = vmatpush.bf16.msra.mxu2 %v3964_v30  ;;  %2048 = vmatpush.bf16.msra.mxu3 %v4092_v31  ;;  %v4009_v30 = vld [vmem:[#allocation2 + $0x710] sm:$0xf0]  ;;  %v3167_v31 = vld [vmem:[#allocation2 + $0x68] sm:$0xf]  ;;  %v3884_v39 = vor.u32 %v4653_v25, %v3881_v26  ;;  %v4640_v2 = vld [vmem:[#allocation2 + $0x594] sm:$0xf0] }
  0xdf   :  { %v4012_v40 = vor.u32 %v4685_v27, %v4009_v30  ;;  %v3440_v27 = vor.u32 %v4544_v18, %v3439_v17  ;;  %v4540_v30 = vld [vmem:[#allocation2 + $0x274] sm:$0xf0]  ;;  %v3823_v1 = vld [vmem:[#allocation2 + $0x588] sm:$0xf] }
  0xe0   :  { %v3807_v17 = vld [vmem:[#allocation2 + $0x568] sm:$0xf]  ;;  %v4636_v18 = vld [vmem:[#allocation2 + $0x574] sm:$0xf0] }
  0xe1   :  { %2014 = vmatpush.bf16.msra.mxu0 %v3628_v41  ;;  %2027 = vmatpush.bf16.msra.mxu1 %v3756_v42  ;;  %v3168_v41 = vor.u32 %v4476_v32, %v3167_v31  ;;  %v3296_v42 = vor.u32 %v4508_v34, %v3295_v33  ;;  %v3744_v31 = vor.u32 %v4620_v22, %v3743_v21  ;;  %v3551_v33 = vld [vmem:[#allocation2 + $0x368] sm:$0xf]  ;;  %v4572_v34 = vld [vmem:[#allocation2 + $0x374] sm:$0xf0] }
  0xe2   :  { %2036 = vmatpush.bf16.msra.mxu2 %v3948_v43  ;;  %2049 = vmatpush.bf16.msra.mxu3 %v4076_v44  ;;  %v3151_v43 = vld [vmem:[#allocation2 + $0x48] sm:$0xf]  ;;  %v4472_v44 = vld [vmem:[#allocation2 + $0x54] sm:$0xf0] }
  0xe3   :  { %v3152_v53 = vor.u32 %v4472_v44, %v3151_v43  ;;  %v3728_v43 = vor.u32 %v4616_v36, %v3727_v35  ;;  %v3856_v44 = vor.u32 %v4648_v38, %v3855_v37  ;;  %v4127_v21 = vld [vmem:[#allocation2 + $0x7e8] sm:$0xf]  ;;  %v4716_v22 = vld [vmem:[#allocation2 + $0x7f4] sm:$0xf0] }
  0xe4   :  { %2015 = vmatmul.bf16.vlgmr.msra.gmra.mxu0 %v5036_v58  ;;  %2028 = vmatmul.bf16.vlgmr.msra.gmra.mxu1 %v5038_v59  ;;  %v4111_v35 = vld [vmem:[#allocation2 + $0x7c8] sm:$0xf]  ;;  %v4712_v36 = vld [vmem:[#allocation2 + $0x7d4] sm:$0xf0] }
  0xe5   :  { %2059 = vmatpush.bf16.msrb.mxu0 %v3232_v47  ;;  %2072 = vmatpush.bf16.msrb.mxu1 %v3360_v48  ;;  %v3279_v47 = vld [vmem:[#allocation2 + $0x148] sm:$0xf]  ;;  %v4504_v48 = vld [vmem:[#allocation2 + $0x154] sm:$0xf0] }
  0xe6   :  { %2037 = vmatpush.bf16.msra.mxu2 %v3932_v55  ;;  %2050 = vmatpush.bf16.msra.mxu3 %v4060_v56  ;;  %v3280_v54 = vor.u32 %v4504_v48, %v3279_v47  ;;  %v3135_v55 = vld [vmem:[#allocation2 + $0x28] sm:$0xf]  ;;  %v4468_v56 = vld [vmem:[#allocation2 + $0x34] sm:$0xf0] }
  0xe7   :  { %v3136_v4 = vor.u32 %v4468_v56, %v3135_v55  ;;  %v3711_v47 = vld [vmem:[#allocation2 + $0x4a8] sm:$0xf]  ;;  %v4612_v48 = vld [vmem:[#allocation2 + $0x4b4] sm:$0xf0]  ;;  %v3840_v56 = vor.u32 %v4644_v50, %v3839_v49 }
  0xe8   :  { %v3712_v55 = vor.u32 %v4612_v48, %v3711_v47  ;;  %v4095_v47 = vld [vmem:[#allocation2 + $0x7a8] sm:$0xf]  ;;  %v4708_v48 = vld [vmem:[#allocation2 + $0x7b4] sm:$0xf0] }
  0xe9   :  { %2060 = vmatpush.bf16.msrb.mxu0 %v3216_v61  ;;  %2073 = vmatpush.bf16.msrb.mxu1 %v3344_v0  ;;  %v3263_v61 = vld [vmem:[#allocation2 + $0x128] sm:$0xf]  ;;  %v4500_v0 = vld [vmem:[#allocation2 + $0x134] sm:$0xf0] }
  0xea   :  { %2038 = vmatpush.bf16.msra.mxu2 %v3916_v9  ;;  %2051 = vmatpush.bf16.msra.mxu3 %v4044_v12  ;;  %v3264_v7 = vor.u32 %v4500_v0, %v3263_v61  ;;  %v3119_v9 = vld [vmem:[#allocation2 + $0x8] sm:$0xf]  ;;  %v4464_v12 = vld [vmem:[#allocation2 + $0x14] sm:$0xf0] }
  0xeb   :  { %v3120_v25 = vor.u32 %v4464_v12, %v3119_v9  ;;  %v3695_v61 = vld [vmem:[#allocation2 + $0x488] sm:$0xf]  ;;  %v4608_v0 = vld [vmem:[#allocation2 + $0x494] sm:$0xf0] }
  0xec   :  { %v3503_v9 = vld [vmem:[#allocation2 + $0x308] sm:$0xf]  ;;  %v3696_v12 = vor.u32 %v4608_v0, %v3695_v61  ;;  %v4704_v0 = vld [vmem:[#allocation2 + $0x794] sm:$0xf0] }
  0xed   :  { %2061 = vmatpush.bf16.msrb.mxu0 %v3200_v11  ;;  %2074 = vmatpush.bf16.msrb.mxu1 %v3328_v16  ;;  %v3584_v11 = vor.u32 %v4580_v3, %v3583_v8  ;;  %v4496_v16 = vld [vmem:[#allocation2 + $0x114] sm:$0xf0]  ;;  %v4079_v61 = vld [vmem:[#allocation2 + $0x788] sm:$0xf] }
  0xee   :  { %2039 = vmatpush.bf16.msra.mxu2 %v3900_v23  ;;  %2052 = vmatpush.bf16.msra.mxu3 %v4028_v24  ;;  %v3871_v23 = vld [vmem:[#allocation2 + $0x5e8] sm:$0xf]  ;;  %v4652_v24 = vld [vmem:[#allocation2 + $0x5f4] sm:$0xf0]  ;;  %v3248_v26 = vor.u32 %v4496_v16, %v3247_v13  ;;  %v3824_v13 = vor.u32 %v4640_v2, %v3823_v1  ;;  %v4490_v1 = vld [vmem:[#allocation2 + $0xec] sm:$0xf] }
  0xef   :  { %v3872_v32 = vor.u32 %v4652_v24, %v3871_v23  ;;  %v4604_v16 = vld [vmem:[#allocation2 + $0x474] sm:$0xf0]  ;;  %v3233_v2 = vld [vmem:[#allocation2 + $0xf8] sm:$0xf0] }
  0xf1   :  { %2062 = vmatpush.bf16.msrb.mxu0 %v3184_v28  ;;  %2075 = vmatpush.bf16.msrb.mxu1 %v3312_v29  ;;  %v3568_v28 = vor.u32 %v4576_v20, %v3567_v19  ;;  %v3423_v29 = vld [vmem:[#allocation2 + $0x268] sm:$0xf]  ;;  %v4684_v20 = vld [vmem:[#allocation2 + $0x6f4] sm:$0xf0] }
  0xf2   :  { %2040 = vmatpush.bf16.msra.mxu2 %v3884_v39  ;;  %2053 = vmatpush.bf16.msra.mxu3 %v4012_v40  ;;  %v3424_v39 = vor.u32 %v4540_v30, %v3423_v29  ;;  %v3552_v40 = vor.u32 %v4572_v34, %v3551_v33  ;;  %v3999_v19 = vld [vmem:[#allocation2 + $0x6e8] sm:$0xf]  ;;  %v4128_v30 = vor.u32 %v4716_v22, %v4127_v21  ;;  %v4680_v34 = vld [vmem:[#allocation2 + $0x6d4] sm:$0xf0]  ;;  %v4518_v21 = vld [vmem:[#allocation2 + $0x1cc] sm:$0xf] }
  0xf3   :  { %v4000_v29 = vor.u32 %v4684_v20, %v3999_v19  ;;  %v3983_v33 = vld [vmem:[#allocation2 + $0x6c8] sm:$0xf]  ;;  %v4486_v19 = vld [vmem:[#allocation2 + $0xcc] sm:$0xf]  ;;  %v3217_v20 = vld [vmem:[#allocation2 + $0xd8] sm:$0xf0] }
  0xf4   :  { %v3345_v22 = vld [vmem:[#allocation2 + $0x1d8] sm:$0xf0] }
  0xf5   :  { %2063 = vmatpush.bf16.msrb.mxu0 %v3168_v41  ;;  %2076 = vmatpush.bf16.msrb.mxu1 %v3296_v42  ;;  %v3407_v41 = vld [vmem:[#allocation2 + $0x248] sm:$0xf]  ;;  %v4536_v42 = vld [vmem:[#allocation2 + $0x254] sm:$0xf0] }
  0xf6   :  { %2085 = vmatpush.bf16.msrb.mxu2 %v3488_v45  ;;  %2098 = vmatpush.bf16.msrb.mxu3 %v3616_v46  ;;  %v3535_v45 = vld [vmem:[#allocation2 + $0x348] sm:$0xf]  ;;  %v4568_v46 = vld [vmem:[#allocation2 + $0x354] sm:$0xf0]  ;;  %v3408_v51 = vor.u32 %v4536_v42, %v3407_v41  ;;  %v3984_v41 = vor.u32 %v4680_v34, %v3983_v33  ;;  %v4112_v42 = vor.u32 %v4712_v36, %v4111_v35  ;;  %v4514_v33 = vld [vmem:[#allocation2 + $0x1ac] sm:$0xf] }
  0xf7   :  { %2041 = vmatmul.bf16.vlgmr.msra.gmra.mxu2 %v5052_v15  ;;  %2054 = vmatmul.bf16.vlgmr.msra.gmra.mxu3 %v5054_v10  ;;  %v3536_v52 = vor.u32 %v4568_v46, %v3535_v45  ;;  %v3967_v45 = vld [vmem:[#allocation2 + $0x6a8] sm:$0xf]  ;;  %v4676_v46 = vld [vmem:[#allocation2 + $0x6b4] sm:$0xf0]  ;;  %v3329_v34 = vld [vmem:[#allocation2 + $0x1b8] sm:$0xf0] }
  0xf9   :  { %2064 = vmatpush.bf16.msrb.mxu0 %v3152_v53  ;;  %2077 = vmatpush.bf16.msrb.mxu1 %v3280_v54  ;;  %v3391_v53 = vld [vmem:[#allocation2 + $0x228] sm:$0xf]  ;;  %v4532_v54 = vld [vmem:[#allocation2 + $0x234] sm:$0xf0] }
  0xfa   :  { %2086 = vmatpush.bf16.msrb.mxu2 %v3472_v57  ;;  %2099 = vmatpush.bf16.msrb.mxu3 %v3600_v60  ;;  %v3519_v57 = vld [vmem:[#allocation2 + $0x328] sm:$0xf]  ;;  %v4564_v60 = vld [vmem:[#allocation2 + $0x334] sm:$0xf0]  ;;  %v3392_v8 = vor.u32 %v4532_v54, %v3391_v53  ;;  %v3968_v54 = vor.u32 %v4676_v46, %v3967_v45  ;;  %v4478_v46 = vld [vmem:[#allocation2 + $0x8c] sm:$0xf] }
  0xfb   :  { %v3520_v3 = vor.u32 %v4564_v60, %v3519_v57  ;;  %v3759_v53 = vld [vmem:[#allocation2 + $0x508] sm:$0xf]  ;;  %v4672_v60 = vld [vmem:[#allocation2 + $0x694] sm:$0xf0] }
  0xfc   :  { %v3951_v57 = vld [vmem:[#allocation2 + $0x688] sm:$0xf]  ;;  %v4692_v45 = vld [vmem:[#allocation2 + $0x734] sm:$0xf0] }
  0xfd   :  { %2065 = vmatpush.bf16.msrb.mxu0 %v3136_v4  ;;  %2078 = vmatpush.bf16.msrb.mxu1 %v3264_v7  ;;  %v3375_v4 = vld [vmem:[#allocation2 + $0x208] sm:$0xf]  ;;  %v4528_v7 = vld [vmem:[#allocation2 + $0x214] sm:$0xf0] }
  0xfe   :  { %2087 = vmatpush.bf16.msrb.mxu2 %v3456_v14  ;;  %2100 = vmatpush.bf16.msrb.mxu3 %v3584_v11  ;;  %v4560_v14 = vld [vmem:[#allocation2 + $0x314] sm:$0xf0]  ;;  %v3679_v11 = vld [vmem:[#allocation2 + $0x468] sm:$0xf]  ;;  %v3376_v23 = vor.u32 %v4528_v7, %v3375_v4 }
  0xff   :  { %v3504_v24 = vor.u32 %v4560_v14, %v3503_v9  ;;  %v3952_v9 = vor.u32 %v4672_v60, %v3951_v57  ;;  %v4668_v14 = vld [vmem:[#allocation2 + $0x674] sm:$0xf0]  ;;  %v4474_v60 = vld [vmem:[#allocation2 + $0x6c] sm:$0xf] }
 0x100   :  { %v4688_v57 = vld [vmem:[#allocation2 + $0x714] sm:$0xf0] }
 0x101   :  { %2066 = vmatpush.bf16.msrb.mxu0 %v3120_v25  ;;  %2079 = vmatpush.bf16.msrb.mxu1 %v3248_v26  ;;  %v3680_v25 = vor.u32 %v4604_v16, %v3679_v11  ;;  %v3808_v26 = vor.u32 %v4636_v18, %v3807_v17  ;;  %v3236_v11 = vor.u32 %v4490_v1, %v3233_v2  ;;  %v4063_v17 = vld [vmem:[#allocation2 + $0x768] sm:$0xf]  ;;  %v4700_v18 = vld [vmem:[#allocation2 + $0x774] sm:$0xf0]  ;;  %v3297_v1 = vld [vmem:[#allocation2 + $0x178] sm:$0xf0] }
 0x102   :  { %2088 = vmatpush.bf16.msrb.mxu2 %v3440_v27  ;;  %2101 = vmatpush.bf16.msrb.mxu3 %v3568_v28  ;;  %v3663_v27 = vld [vmem:[#allocation2 + $0x448] sm:$0xf]  ;;  %v4600_v28 = vld [vmem:[#allocation2 + $0x454] sm:$0xf0]  ;;  %v4554_v2 = vld [vmem:[#allocation2 + $0x2ec] sm:$0xf] }
 0x103   :  { %v3664_v37 = vor.u32 %v4600_v28, %v3663_v27  ;;  %v3220_v27 = vor.u32 %v4486_v19, %v3217_v20  ;;  %v3348_v28 = vor.u32 %v4518_v21, %v3345_v22  ;;  %v4502_v20 = vld [vmem:[#allocation2 + $0x14c] sm:$0xf]  ;;  %v3281_v21 = vld [vmem:[#allocation2 + $0x158] sm:$0xf0] }
 0x104   :  { %2067 = vmatmul.bf16.vlgmr.msrb.gmra.mxu0 %v5023_v5  ;;  %2080 = vmatmul.bf16.vlgmr.msrb.gmra.mxu1 %v5025_v6  ;;  %v4550_v22 = vld [vmem:[#allocation2 + $0x2cc] sm:$0xf] }
 0x105   :  { %2111 = vmatpush.bf16.msra.mxu0 %v3744_v31  ;;  %2124 = vmatpush.bf16.msra.mxu1 %v3872_v32  ;;  %v3791_v31 = vld [vmem:[#allocation2 + $0x548] sm:$0xf]  ;;  %v4632_v32 = vld [vmem:[#allocation2 + $0x554] sm:$0xf0] }
 0x106   :  { %2089 = vmatpush.bf16.msrb.mxu2 %v3424_v39  ;;  %2102 = vmatpush.bf16.msrb.mxu3 %v3552_v40  ;;  %v3792_v38 = vor.u32 %v4632_v32, %v3791_v31  ;;  %v3647_v39 = vld [vmem:[#allocation2 + $0x428] sm:$0xf]  ;;  %v4596_v40 = vld [vmem:[#allocation2 + $0x434] sm:$0xf0]  ;;  %v4482_v31 = vld [vmem:[#allocation2 + $0xac] sm:$0xf] }
 0x107   :  { %v3648_v49 = vor.u32 %v4596_v40, %v3647_v39  ;;  %v3201_v32 = vld [vmem:[#allocation2 + $0xb8] sm:$0xf0]  ;;  %v3903_v39 = vld [vmem:[#allocation2 + $0x628] sm:$0xf]  ;;  %v4660_v40 = vld [vmem:[#allocation2 + $0x634] sm:$0xf0] }
 0x109   :  { %2112 = vmatpush.bf16.msra.mxu0 %v3728_v43  ;;  %2125 = vmatpush.bf16.msra.mxu1 %v3856_v44  ;;  %v3775_v43 = vld [vmem:[#allocation2 + $0x528] sm:$0xf]  ;;  %v4628_v44 = vld [vmem:[#allocation2 + $0x534] sm:$0xf0] }
 0x10a   :  { %2090 = vmatpush.bf16.msrb.mxu2 %v3408_v51  ;;  %2103 = vmatpush.bf16.msrb.mxu3 %v3536_v52  ;;  %v3776_v50 = vor.u32 %v4628_v44, %v3775_v43  ;;  %v3631_v51 = vld [vmem:[#allocation2 + $0x408] sm:$0xf]  ;;  %v4592_v52 = vld [vmem:[#allocation2 + $0x414] sm:$0xf0] }
 0x10b   :  { %v3632_v4 = vor.u32 %v4592_v52, %v3631_v51  ;;  %v4031_v44 = vld [vmem:[#allocation2 + $0x728] sm:$0xf] }
 0x10c   :  { %v4032_v51 = vor.u32 %v4692_v45, %v4031_v44  ;;  %v3887_v52 = vld [vmem:[#allocation2 + $0x608] sm:$0xf]  ;;  %v3121_v44 = vld [vmem:[#allocation2 + $0x18] sm:$0xf0]  ;;  %v4494_v45 = vld [vmem:[#allocation2 + $0x10c] sm:$0xf] }
 0x10d   :  { %2113 = vmatpush.bf16.msra.mxu0 %v3712_v55  ;;  %2126 = vmatpush.bf16.msra.mxu1 %v3840_v56  ;;  %v4096_v55 = vor.u32 %v4708_v48, %v4095_v47  ;;  %v4624_v56 = vld [vmem:[#allocation2 + $0x514] sm:$0xf0]  ;;  %v3185_v47 = vld [vmem:[#allocation2 + $0x98] sm:$0xf0]  ;;  %v4510_v48 = vld [vmem:[#allocation2 + $0x18c] sm:$0xf] }
 0x10e   :  { %2091 = vmatpush.bf16.msrb.mxu2 %v3392_v8  ;;  %2104 = vmatpush.bf16.msrb.mxu3 %v3520_v3  ;;  %v4522_v8 = vld [vmem:[#allocation2 + $0x1ec] sm:$0xf]  ;;  %v3361_v3 = vld [vmem:[#allocation2 + $0x1f8] sm:$0xf0]  ;;  %v3760_v7 = vor.u32 %v4624_v56, %v3759_v53  ;;  %v4656_v53 = vld [vmem:[#allocation2 + $0x614] sm:$0xf0] }
 0x10f   :  { %v3364_v16 = vor.u32 %v4522_v8, %v3361_v3  ;;  %v3489_v8 = vld [vmem:[#allocation2 + $0x2f8] sm:$0xf0]  ;;  %v4586_v3 = vld [vmem:[#allocation2 + $0x3ec] sm:$0xf] }
 0x111   :  { %2114 = vmatpush.bf16.msra.mxu0 %v3696_v12  ;;  %2127 = vmatpush.bf16.msra.mxu1 %v3824_v13  ;;  %v4080_v12 = vor.u32 %v4704_v0, %v4079_v61  ;;  %v3935_v13 = vld [vmem:[#allocation2 + $0x668] sm:$0xf]  ;;  %v3169_v61 = vld [vmem:[#allocation2 + $0x78] sm:$0xf0]  ;;  %v4506_v0 = vld [vmem:[#allocation2 + $0x16c] sm:$0xf] }
 0x112   :  { %2092 = vmatpush.bf16.msrb.mxu2 %v3376_v23  ;;  %2105 = vmatpush.bf16.msrb.mxu3 %v3504_v24  ;;  %v3936_v23 = vor.u32 %v4668_v14, %v3935_v13  ;;  %v4064_v24 = vor.u32 %v4700_v18, %v4063_v17  ;;  %v3172_v14 = vor.u32 %v4474_v60, %v3169_v61  ;;  %v3153_v17 = vld [vmem:[#allocation2 + $0x58] sm:$0xf0] }
 0x113   :  { %v3492_v18 = vor.u32 %v4554_v2, %v3489_v8  ;;  %v4538_v8 = vld [vmem:[#allocation2 + $0x26c] sm:$0xf] }
 0x115   :  { %2115 = vmatpush.bf16.msra.mxu0 %v3680_v25  ;;  %2128 = vmatpush.bf16.msra.mxu1 %v3808_v26  ;;  %v3919_v25 = vld [vmem:[#allocation2 + $0x648] sm:$0xf]  ;;  %v4664_v26 = vld [vmem:[#allocation2 + $0x654] sm:$0xf0] }
 0x116   :  { %2137 = vmatpush.bf16.msra.mxu2 %v4000_v29  ;;  %2150 = vmatpush.bf16.msra.mxu3 %v4128_v30  ;;  %v4047_v29 = vld [vmem:[#allocation2 + $0x748] sm:$0xf]  ;;  %v4696_v30 = vld [vmem:[#allocation2 + $0x754] sm:$0xf0]  ;;  %v3920_v35 = vor.u32 %v4664_v26, %v3919_v25  ;;  %v3601_v25 = vld [vmem:[#allocation2 + $0x3d8] sm:$0xf0] }
 0x117   :  { %2093 = vmatmul.bf16.vlgmr.msrb.gmra.mxu2 %v5040_v62  ;;  %2106 = vmatmul.bf16.vlgmr.msrb.gmra.mxu3 %v5042_v63  ;;  %v4048_v36 = vor.u32 %v4696_v30, %v4047_v29  ;;  %v3137_v29 = vld [vmem:[#allocation2 + $0x38] sm:$0xf0] }
 0x119   :  { %2116 = vmatpush.bf16.msra.mxu0 %v3664_v37  ;;  %2129 = vmatpush.bf16.msra.mxu1 %v3792_v38 }
 0x11a   :  { %2138 = vmatpush.bf16.msra.mxu2 %v3984_v41  ;;  %2151 = vmatpush.bf16.msra.mxu3 %v4112_v42  ;;  %v3204_v41 = vor.u32 %v4482_v31, %v3201_v32  ;;  %v3332_v42 = vor.u32 %v4514_v33, %v3329_v34  ;;  %v4498_v32 = vld [vmem:[#allocation2 + $0x12c] sm:$0xf]  ;;  %v3265_v33 = vld [vmem:[#allocation2 + $0x138] sm:$0xf0] }
 0x11b   :  { %v4546_v34 = vld [vmem:[#allocation2 + $0x2ac] sm:$0xf] }
 0x11d   :  { %2117 = vmatpush.bf16.msra.mxu0 %v3648_v49  ;;  %2130 = vmatpush.bf16.msra.mxu1 %v3776_v50  ;;  %v3313_v49 = vld [vmem:[#allocation2 + $0x198] sm:$0xf0]  ;;  %v3904_v50 = vor.u32 %v4660_v40, %v3903_v39  ;;  %v3268_v39 = vor.u32 %v4498_v32, %v3265_v33 }
 0x11e   :  { %2139 = vmatpush.bf16.msra.mxu2 %v3968_v54  ;;  %2152 = vmatpush.bf16.msra.mxu3 %v4096_v55  ;;  %v4015_v54 = vld [vmem:[#allocation2 + $0x708] sm:$0xf]  ;;  %v3188_v55 = vor.u32 %v4478_v46, %v3185_v47  ;;  %v3316_v56 = vor.u32 %v4510_v48, %v3313_v49  ;;  %v3249_v48 = vld [vmem:[#allocation2 + $0x118] sm:$0xf0]  ;;  %v4542_v49 = vld [vmem:[#allocation2 + $0x28c] sm:$0xf] }
 0x11f   :  { %v3252_v60 = vor.u32 %v4494_v45, %v3249_v48  ;;  %v3841_v32 = vld [vmem:[#allocation2 + $0x5b8] sm:$0xf0] }
 0x120   :  { %v1860_v37 = vpop.f32.mrf.mxu0  ;;  %v1873_v38 = vpop.f32.mrf.mxu1  ;;  %v3697_v45 = vld [vmem:[#allocation2 + $0x498] sm:$0xf0] }
 0x121   :  { %2118 = vmatpush.bf16.msra.mxu0 %v3632_v4  ;;  %2131 = vmatpush.bf16.msra.mxu1 %v3760_v7  ;;  %v5072_v43 = vadd.f32 %v1873_v38, %v1860_v37  ;;  %v3617_v4 = vld [vmem:[#allocation2 + $0x3f8] sm:$0xf0]  ;;  %v3888_v7 = vor.u32 %v4656_v53, %v3887_v52  ;;  %v4618_v53 = vld [vmem:[#allocation2 + $0x4ec] sm:$0xf] }
 0x122   :  { %2140 = vmatpush.bf16.msra.mxu2 %v3952_v9  ;;  %2153 = vmatpush.bf16.msra.mxu3 %v4080_v12  ;;  %v4016_v9 = vor.u32 %v4688_v57, %v4015_v54  ;;  %v3620_v19 = vor.u32 %v4586_v3, %v3617_v4  ;;  %v3585_v37 = vld [vmem:[#allocation2 + $0x3b8] sm:$0xf0] }
 0x123   :  { %v3569_v52 = vld [vmem:[#allocation2 + $0x398] sm:$0xf0] }
 0x124   :  { %2119 = vmatmul.bf16.vlgmr.msra.gmra.mxu0 %v5036_v58  ;;  %2132 = vmatmul.bf16.vlgmr.msra.gmra.mxu1 %v5038_v59  ;;  %v3745_v54 = vld [vmem:[#allocation2 + $0x4f8] sm:$0xf0] }
 0x125   :  { %2163 = vmatpush.bf16.msrb.mxu0 %v3236_v11  ;;  %2176 = vmatpush.bf16.msrb.mxu1 %v3364_v16  ;;  %v3300_v11 = vor.u32 %v4506_v0, %v3297_v1  ;;  %v4470_v16 = vld [vmem:[#allocation2 + $0x4c] sm:$0xf]  ;;  %v3425_v3 = vld [vmem:[#allocation2 + $0x278] sm:$0xf0]  ;;  %v3748_v4 = vor.u32 %v4618_v53, %v3745_v54 }
 0x126   :  { %2141 = vmatpush.bf16.msra.mxu2 %v3936_v23  ;;  %2154 = vmatpush.bf16.msra.mxu3 %v4064_v24  ;;  %v3473_v23 = vld [vmem:[#allocation2 + $0x2d8] sm:$0xf0]  ;;  %v4582_v24 = vld [vmem:[#allocation2 + $0x3cc] sm:$0xf]  ;;  %v3156_v26 = vor.u32 %v4470_v16, %v3153_v17 }
 0x127   :  { %v3476_v30 = vor.u32 %v4550_v22, %v3473_v23  ;;  %v3604_v31 = vor.u32 %v4582_v24, %v3601_v25  ;;  %v4646_v16 = vld [vmem:[#allocation2 + $0x5cc] sm:$0xf]  ;;  %v3857_v17 = vld [vmem:[#allocation2 + $0x5d8] sm:$0xf0] }
 0x128   :  { %v1862_v12 = vpop.f32.mrf.mxu0  ;;  %v1875_v13 = vpop.f32.mrf.mxu1  ;;  %v4534_v23 = vld [vmem:[#allocation2 + $0x24c] sm:$0xf]  ;;  %v3409_v24 = vld [vmem:[#allocation2 + $0x258] sm:$0xf0] }
 0x129   :  { %2164 = vmatpush.bf16.msrb.mxu0 %v3220_v27  ;;  %2177 = vmatpush.bf16.msrb.mxu1 %v3348_v28  ;;  %v3284_v27 = vor.u32 %v4502_v20, %v3281_v21  ;;  %v4466_v28 = vld [vmem:[#allocation2 + $0x2c] sm:$0xf]  ;;  %v3553_v13 = vld [vmem:[#allocation2 + $0x378] sm:$0xf0]  ;;  %v3428_v21 = vor.u32 %v4538_v8, %v3425_v3 }
 0x12a   :  { %2142 = vmatpush.bf16.msra.mxu2 %v3920_v35  ;;  %2155 = vmatpush.bf16.msra.mxu3 %v4048_v36  ;;  %v3457_v35 = vld [vmem:[#allocation2 + $0x2b8] sm:$0xf0]  ;;  %v4578_v36 = vld [vmem:[#allocation2 + $0x3ac] sm:$0xf]  ;;  %v3140_v38 = vor.u32 %v4466_v28, %v3137_v29 }
 0x12b   :  { %v3460_v46 = vor.u32 %v4546_v34, %v3457_v35  ;;  %v3588_v47 = vor.u32 %v4578_v36, %v3585_v37  ;;  %v4570_v12 = vld [vmem:[#allocation2 + $0x36c] sm:$0xf]  ;;  %v3537_v28 = vld [vmem:[#allocation2 + $0x358] sm:$0xf0]  ;;  %v3412_v34 = vor.u32 %v4534_v23, %v3409_v24 }
 0x12c   :  { %v3556_v22 = vor.u32 %v4570_v12, %v3553_v13  ;;  %v4610_v29 = vld [vmem:[#allocation2 + $0x4ac] sm:$0xf]  ;;  %v4129_v3 = vld [vmem:[#allocation2 + $0x7f8] sm:$0xf0] }
 0x12d   :  { %2165 = vmatpush.bf16.msrb.mxu0 %v3204_v41  ;;  %2178 = vmatpush.bf16.msrb.mxu1 %v3332_v42  ;;  %v4462_v42 = vld [vmem:[#allocation2 + $0xc] sm:$0xf]  ;;  %v4113_v24 = vld [vmem:[#allocation2 + $0x7d8] sm:$0xf0] }
 0x12e   :  { %2143 = vmatpush.bf16.msra.mxu2 %v3904_v50  ;;  %2156 = vmatpush.bf16.msra.mxu3 %v4032_v51  ;;  %v3441_v50 = vld [vmem:[#allocation2 + $0x298] sm:$0xf0]  ;;  %v4574_v51 = vld [vmem:[#allocation2 + $0x38c] sm:$0xf]  ;;  %v3124_v57 = vor.u32 %v4462_v42, %v3121_v44 }
 0x12f   :  { %v3444_v61 = vor.u32 %v4542_v49, %v3441_v50  ;;  %v3572_v0 = vor.u32 %v4574_v51, %v3569_v52  ;;  %v3521_v44 = vld [vmem:[#allocation2 + $0x338] sm:$0xf0]  ;;  %v4526_v51 = vld [vmem:[#allocation2 + $0x20c] sm:$0xf] }
 0x130   :  { %v3377_v52 = vld [vmem:[#allocation2 + $0x218] sm:$0xf0]  ;;  %v4558_v53 = vld [vmem:[#allocation2 + $0x30c] sm:$0xf] }
 0x131   :  { %2166 = vmatpush.bf16.msrb.mxu0 %v3188_v55  ;;  %2179 = vmatpush.bf16.msrb.mxu1 %v3316_v56  ;;  %v1912_v40 = vpop.f32.mrf.mxu0  ;;  %v1925_v41 = vpop.f32.mrf.mxu1  ;;  %v4650_v55 = vld [vmem:[#allocation2 + $0x5ec] sm:$0xf]  ;;  %v3873_v56 = vld [vmem:[#allocation2 + $0x5f8] sm:$0xf0] }
 0x132   :  { %2144 = vmatpush.bf16.msra.mxu2 %v3888_v7  ;;  %2157 = vmatpush.bf16.msra.mxu3 %v4016_v9  ;;  %v3876_v7 = vor.u32 %v4650_v55, %v3873_v56  ;;  %v3505_v56 = vld [vmem:[#allocation2 + $0x318] sm:$0xf0]  ;;  %v4714_v8 = vld [vmem:[#allocation2 + $0x7ec] sm:$0xf] }
 0x133   :  { %v4710_v23 = vld [vmem:[#allocation2 + $0x7cc] sm:$0xf] }
 0x135   :  { %2167 = vmatpush.bf16.msrb.mxu0 %v3172_v14  ;;  %2180 = vmatpush.bf16.msrb.mxu1 %v3300_v11  ;;  %v4614_v14 = vld [vmem:[#allocation2 + $0x4cc] sm:$0xf]  ;;  %v3729_v11 = vld [vmem:[#allocation2 + $0x4d8] sm:$0xf0] }
 0x136   :  { %2189 = vmatpush.bf16.msrb.mxu2 %v3492_v18  ;;  %2202 = vmatpush.bf16.msrb.mxu3 %v3620_v19  ;;  %v1886_v1 = vpop.f32.mrf.mxu2  ;;  %v1899_v2 = vpop.f32.mrf.mxu3  ;;  %v3732_v25 = vor.u32 %v4614_v14, %v3729_v11  ;;  %v4598_v11 = vld [vmem:[#allocation2 + $0x44c] sm:$0xf] }
 0x137   :  { %2145 = vmatmul.bf16.vlgmr.msra.gmra.mxu2 %v5052_v15  ;;  %2158 = vmatmul.bf16.vlgmr.msra.gmra.mxu3 %v5054_v10  ;;  %v1887_v9 = vadd.f32 %v1886_v1, %v5072_v43  ;;  %v4682_v1 = vld [vmem:[#allocation2 + $0x6ec] sm:$0xf] }
 0x139   :  { %2168 = vmatpush.bf16.msrb.mxu0 %v3156_v26  ;;  %2181 = vmatpush.bf16.msrb.mxu1 %v3284_v27  ;;  %v1900_v18 = vadd.f32 %v1899_v2, %v1887_v9  ;;  %v1914_v19 = vpop.f32.mrf.mxu0  ;;  %v1927_v20 = vpop.f32.mrf.mxu1  ;;  %v3860_v26 = vor.u32 %v4646_v16, %v3857_v17  ;;  %v4566_v27 = vld [vmem:[#allocation2 + $0x34c] sm:$0xf]  ;;  %v4001_v2 = vld [vmem:[#allocation2 + $0x6f8] sm:$0xf0] }
 0x13a   :  { %2190 = vmatpush.bf16.msrb.mxu2 %v3476_v30  ;;  %2203 = vmatpush.bf16.msrb.mxu3 %v3604_v31  ;;  %v3713_v30 = vld [vmem:[#allocation2 + $0x4b8] sm:$0xf0]  ;;  %v4642_v31 = vld [vmem:[#allocation2 + $0x5ac] sm:$0xf]  ;;  %v3540_v35 = vor.u32 %v4566_v27, %v3537_v28  ;;  %v4004_v17 = vor.u32 %v4682_v1, %v4001_v2 }
 0x13b   :  { %v1913_v43 = vadd.f32 %v1912_v40, %v1900_v18  ;;  %v3716_v40 = vor.u32 %v4610_v29, %v3713_v30  ;;  %v3844_v42 = vor.u32 %v4642_v31, %v3841_v32  ;;  %v3665_v16 = vld [vmem:[#allocation2 + $0x458] sm:$0xf0]  ;;  %v4132_v18 = vor.u32 %v4714_v8, %v4129_v3  ;;  %v4630_v19 = vld [vmem:[#allocation2 + $0x54c] sm:$0xf] }
 0x13c   :  { %v3793_v20 = vld [vmem:[#allocation2 + $0x558] sm:$0xf0]  ;;  %v4594_v28 = vld [vmem:[#allocation2 + $0x42c] sm:$0xf]  ;;  %v4116_v31 = vor.u32 %v4710_v23, %v4113_v24 }
 0x13d   :  { %2169 = vmatpush.bf16.msrb.mxu0 %v3140_v38  ;;  %2182 = vmatpush.bf16.msrb.mxu1 %v3268_v39  ;;  %v5079_v33 = vadd.f32 %v1925_v41, %v1913_v43  ;;  %v4530_v38 = vld [vmem:[#allocation2 + $0x22c] sm:$0xf]  ;;  %v3393_v39 = vld [vmem:[#allocation2 + $0x238] sm:$0xf0]  ;;  %v3796_v27 = vor.u32 %v4630_v19, %v3793_v20 }
 0x13e   :  { %2191 = vmatpush.bf16.msrb.mxu2 %v3460_v46  ;;  %2204 = vmatpush.bf16.msrb.mxu3 %v3588_v47  ;;  %v1888_v36 = vpop.f32.mrf.mxu2  ;;  %v1901_v37 = vpop.f32.mrf.mxu3  ;;  %v4638_v46 = vld [vmem:[#allocation2 + $0x58c] sm:$0xf]  ;;  %v3825_v47 = vld [vmem:[#allocation2 + $0x598] sm:$0xf0]  ;;  %v3396_v41 = vor.u32 %v4530_v38, %v3393_v39 }
 0x13f   :  { %v3828_v55 = vor.u32 %v4638_v46, %v3825_v47  ;;  %v3649_v29 = vld [vmem:[#allocation2 + $0x438] sm:$0xf0]  ;;  %v4626_v32 = vld [vmem:[#allocation2 + $0x52c] sm:$0xf] }
 0x140   :  { %v3969_v36 = vld [vmem:[#allocation2 + $0x6b8] sm:$0xf0]  ;;  %v4706_v37 = vld [vmem:[#allocation2 + $0x7ac] sm:$0xf]  ;;  %v3652_v39 = vor.u32 %v4594_v28, %v3649_v29  ;;  %v4744_v28 = vld [vmem:[#allocation5 + $0xd4] sm:$0xf0] }
 0x141   :  { %2170 = vmatpush.bf16.msrb.mxu0 %v3124_v57  ;;  %2183 = vmatpush.bf16.msrb.mxu1 %v3252_v60  ;;  %v5081_v49 = vpop.f32.mrf.mxu0  ;;  %v5083_v50 = vpop.f32.mrf.mxu1  ;;  %v4602_v57 = vld [vmem:[#allocation2 + $0x46c] sm:$0xf]  ;;  %v3681_v60 = vld [vmem:[#allocation2 + $0x478] sm:$0xf0] }
 0x142   :  { %2192 = vmatpush.bf16.msrb.mxu2 %v3444_v61  ;;  %2205 = vmatpush.bf16.msrb.mxu3 %v3572_v0  ;;  %v4634_v61 = vld [vmem:[#allocation2 + $0x56c] sm:$0xf]  ;;  %v3809_v0 = vld [vmem:[#allocation2 + $0x578] sm:$0xf0]  ;;  %v3684_v9 = vor.u32 %v4602_v57, %v3681_v60 }
 0x143   :  { %v3812_v12 = vor.u32 %v4634_v61, %v3809_v0  ;;  %v4097_v38 = vld [vmem:[#allocation2 + $0x7b8] sm:$0xf0]  ;;  %v4666_v0 = vld [vmem:[#allocation2 + $0x66c] sm:$0xf] }
 0x144   :  { %2171 = vmatmul.bf16.vlgmr.msrb.gmra.mxu0 %v5023_v5  ;;  %2184 = vmatmul.bf16.vlgmr.msrb.gmra.mxu1 %v5025_v6  ;;  %v4562_v5 = vld [vmem:[#allocation2 + $0x32c] sm:$0xf]  ;;  %v4100_v47 = vor.u32 %v4706_v37, %v4097_v38  ;;  %v3937_v1 = vld [vmem:[#allocation2 + $0x678] sm:$0xf0]  ;;  %v4167_v38 = vld [vmem:[#allocation5 + $0x40] sm:$0xf] }
 0x145   :  { %2215 = vmatpush.bf16.msra.mxu0 %v3748_v4  ;;  %2228 = vmatpush.bf16.msra.mxu1 %v3876_v7  ;;  %v4606_v6 = vld [vmem:[#allocation2 + $0x48c] sm:$0xf]  ;;  %v3524_v48 = vor.u32 %v4562_v5, %v3521_v44  ;;  %v3380_v4 = vor.u32 %v4526_v51, %v3377_v52  ;;  %v3508_v7 = vor.u32 %v4558_v53, %v3505_v56  ;;  %v4081_v51 = vld [vmem:[#allocation2 + $0x798] sm:$0xf0]  ;;  %v4191_v52 = vld [vmem:[#allocation5 + $0x70] sm:$0xf] }
 0x146   :  { %2193 = vmatpush.bf16.msrb.mxu2 %v3428_v21  ;;  %2206 = vmatpush.bf16.msrb.mxu3 %v3556_v22  ;;  %v3700_v54 = vor.u32 %v4606_v6, %v3697_v45  ;;  %v5085_v13 = vpop.f32.mrf.mxu2  ;;  %v5087_v14 = vpop.f32.mrf.mxu3  ;;  %v4678_v21 = vld [vmem:[#allocation2 + $0x6cc] sm:$0xf]  ;;  %v3985_v22 = vld [vmem:[#allocation2 + $0x6d8] sm:$0xf0]  ;;  %v4732_v53 = vld [vmem:[#allocation5 + $0x74] sm:$0xf0] }
 0x147   :  { %v3988_v30 = vor.u32 %v4678_v21, %v3985_v22  ;;  %v4590_v44 = vld [vmem:[#allocation2 + $0x40c] sm:$0xf]  ;;  %v3633_v6 = vld [vmem:[#allocation2 + $0x418] sm:$0xf0]  ;;  %v4192_v3 = vor.u32 %v4732_v53, %v4191_v52  ;;  %v4724_v52 = vld [vmem:[#allocation5 + $0x34] sm:$0xf0] }
 0x148   :  { %v4622_v45 = vld [vmem:[#allocation2 + $0x50c] sm:$0xf]  ;;  %v3636_v56 = vor.u32 %v4590_v44, %v3633_v6  ;;  %v4065_v8 = vld [vmem:[#allocation2 + $0x778] sm:$0xf0]  ;;  %v4223_v53 = vld [vmem:[#allocation5 + $0xb0] sm:$0xf] }
 0x149   :  { %2216 = vmatpush.bf16.msra.mxu0 %v3732_v25  ;;  %2229 = vmatpush.bf16.msra.mxu1 %v3860_v26  ;;  %v1966_v43 = vpop.f32.mrf.mxu0  ;;  %v1979_v25 = vpop.f32.mrf.mxu1  ;;  %v3668_v26 = vor.u32 %v4598_v11, %v3665_v16  ;;  %v4698_v2 = vld [vmem:[#allocation2 + $0x76c] sm:$0xf]  ;;  %v4746_v11 = vld [vmem:[#allocation5 + $0xe4] sm:$0xf0]  ;;  %v3940_v16 = vor.u32 %v4666_v0, %v3937_v1  ;;  %v3921_v21 = vld [vmem:[#allocation2 + $0x658] sm:$0xf0] }
 0x14a   :  { %2194 = vmatpush.bf16.msrb.mxu2 %v3412_v34  ;;  %2207 = vmatpush.bf16.msrb.mxu3 %v3540_v35  ;;  %v3777_v34 = vld [vmem:[#allocation2 + $0x538] sm:$0xf0]  ;;  %v4674_v35 = vld [vmem:[#allocation2 + $0x6ac] sm:$0xf]  ;;  %v4175_v25 = vld [vmem:[#allocation5 + $0x50] sm:$0xf] }
 0x14b   :  { %v3972_v46 = vor.u32 %v4674_v35, %v3969_v36  ;;  %v4662_v20 = vld [vmem:[#allocation2 + $0x64c] sm:$0xf]  ;;  %v4049_v23 = vld [vmem:[#allocation2 + $0x758] sm:$0xf0]  ;;  %v4722_v0 = vld [vmem:[#allocation5 + $0x24] sm:$0xf0] }
 0x14c   :  { %v4694_v22 = vld [vmem:[#allocation2 + $0x74c] sm:$0xf]  ;;  %v3924_v29 = vor.u32 %v4662_v20, %v3921_v21  ;;  %v4033_v35 = vld [vmem:[#allocation2 + $0x738] sm:$0xf0]  ;;  %v4215_v1 = vld [vmem:[#allocation5 + $0xa0] sm:$0xf] }
 0x14d   :  { %2217 = vmatpush.bf16.msra.mxu0 %v3716_v40  ;;  %2230 = vmatpush.bf16.msra.mxu1 %v3844_v42  ;;  %v3780_v40 = vor.u32 %v4626_v32, %v3777_v34  ;;  %v3905_v32 = vld [vmem:[#allocation2 + $0x638] sm:$0xf0]  ;;  %v4690_v34 = vld [vmem:[#allocation2 + $0x72c] sm:$0xf]  ;;  %v4135_v21 = vld [vmem:[#allocation5] sm:$0xf] }
 0x14e   :  { %2195 = vmatpush.bf16.msrb.mxu2 %v3396_v41  ;;  %2208 = vmatpush.bf16.msrb.mxu3 %v3524_v48  ;;  %v1940_v42 = vpop.f32.mrf.mxu2  ;;  %v1953_v5 = vpop.f32.mrf.mxu3  ;;  %v3761_v41 = vld [vmem:[#allocation2 + $0x518] sm:$0xf0]  ;;  %v4036_v44 = vor.u32 %v4690_v34, %v4033_v35 }
 0x14f   :  { %v3953_v48 = vld [vmem:[#allocation2 + $0x698] sm:$0xf0]  ;;  %v3764_v57 = vor.u32 %v4622_v45, %v3761_v41  ;;  %v4686_v41 = vld [vmem:[#allocation2 + $0x70c] sm:$0xf] }
 0x151   :  { %2218 = vmatpush.bf16.msra.mxu0 %v3700_v54  ;;  %2231 = vmatpush.bf16.msra.mxu1 %v3828_v55  ;;  %v4255_v54 = vld [vmem:[#allocation5 + $0xf0] sm:$0xf]  ;;  %v4748_v55 = vld [vmem:[#allocation5 + $0xf4] sm:$0xf0] }
 0x152   :  { %2196 = vmatpush.bf16.msrb.mxu2 %v3380_v4  ;;  %2209 = vmatpush.bf16.msrb.mxu3 %v3508_v7  ;;  %v4256_v4 = vor.u32 %v4748_v55, %v4255_v54  ;;  %v4183_v7 = vld [vmem:[#allocation5 + $0x60] sm:$0xf]  ;;  %v4740_v54 = vld [vmem:[#allocation5 + $0xb4] sm:$0xf0] }
 0x155   :  { %2219 = vmatpush.bf16.msra.mxu0 %v3684_v9  ;;  %2232 = vmatpush.bf16.msra.mxu1 %v3812_v12  ;;  %v4730_v9 = vld [vmem:[#allocation5 + $0x64] sm:$0xf0]  ;;  %v4247_v12 = vld [vmem:[#allocation5 + $0xe0] sm:$0xf] }
 0x156   :  { %2241 = vmatpush.bf16.msra.mxu2 %v4004_v17  ;;  %2254 = vmatpush.bf16.msra.mxu3 %v4132_v18  ;;  %v4068_v17 = vor.u32 %v4698_v2, %v4065_v8  ;;  %v4184_v24 = vor.u32 %v4730_v9, %v4183_v7  ;;  %v4248_v43 = vor.u32 %v4746_v11, %v4247_v12  ;;  %v4738_v2 = vld [vmem:[#allocation5 + $0xa4] sm:$0xf0]  ;;  %v4143_v12 = vld [vmem:[#allocation5 + $0x10] sm:$0xf]  ;;  %v4720_v11 = vld [vmem:[#allocation5 + $0x14] sm:$0xf0] }
 0x157   :  { %2197 = vmatmul.bf16.vlgmr.msrb.gmra.mxu2 %v5040_v62  ;;  %2210 = vmatmul.bf16.vlgmr.msrb.gmra.mxu3 %v5042_v63  ;;  %v4670_v62 = vld [vmem:[#allocation2 + $0x68c] sm:$0xf]  ;;  %v4216_v9 = vor.u32 %v4738_v2, %v4215_v1 }
 0x158   :  { %v4702_v63 = vld [vmem:[#allocation2 + $0x78c] sm:$0xf]  ;;  %v3956_v60 = vor.u32 %v4670_v62, %v3953_v48  ;;  %v4017_v62 = vld [vmem:[#allocation2 + $0x718] sm:$0xf0] }
 0x159   :  { %2220 = vmatpush.bf16.msra.mxu0 %v3668_v26  ;;  %2233 = vmatpush.bf16.msra.mxu1 %v3796_v27  ;;  %v4084_v61 = vor.u32 %v4702_v63, %v4081_v51  ;;  %v4728_v26 = vld [vmem:[#allocation5 + $0x54] sm:$0xf0]  ;;  %v4239_v27 = vld [vmem:[#allocation5 + $0xd0] sm:$0xf] }
 0x15a   :  { %2242 = vmatpush.bf16.msra.mxu2 %v3988_v30  ;;  %2255 = vmatpush.bf16.msra.mxu3 %v4116_v31  ;;  %v5091_v18 = vpop.f32.mrf.mxu2  ;;  %v5093_v19 = vpop.f32.mrf.mxu3  ;;  %v4052_v30 = vor.u32 %v4694_v22, %v4049_v23  ;;  %v4658_v31 = vld [vmem:[#allocation2 + $0x62c] sm:$0xf]  ;;  %v4176_v36 = vor.u32 %v4728_v26, %v4175_v25  ;;  %v4240_v37 = vor.u32 %v4744_v28, %v4239_v27  ;;  %v4159_v51 = vld [vmem:[#allocation5 + $0x30] sm:$0xf]  ;;  %v4193_v25 = vld [vmem:[#allocation5 + $0x78] sm:$0xf0] }
 0x15b   :  { %v3908_v5 = vor.u32 %v4658_v31, %v3905_v32  ;;  %v4144_v22 = vor.u32 %v4720_v11, %v4143_v12  ;;  %v4747_v26 = vld [vmem:[#allocation5 + $0xf4] sm:$0xf]  ;;  %v2272_v28 = vld [vmem:[#allocation1] sm:$0xff] }
 0x15c   :  { %v2276_v31 = vpack.i.b16 %v2272_v28, %v2272_v28  ;;  %v4161_v11 = vld [vmem:[#allocation5 + $0x38] sm:$0xf0] }
 0x15d   :  { %2221 = vmatpush.bf16.msra.mxu0 %v3652_v39  ;;  %2234 = vmatpush.bf16.msra.mxu1 %v3780_v40  ;;  %v4726_v39 = vld [vmem:[#allocation5 + $0x44] sm:$0xf0] }
 0x15e   :  { %2243 = vmatpush.bf16.msra.mxu2 %v3972_v46  ;;  %2256 = vmatpush.bf16.msra.mxu3 %v4100_v47  ;;  %v4742_v40 = vld [vmem:[#allocation5 + $0xc4] sm:$0xf0]  ;;  %v4654_v46 = vld [vmem:[#allocation2 + $0x60c] sm:$0xf]  ;;  %v3889_v47 = vld [vmem:[#allocation2 + $0x618] sm:$0xf0]  ;;  %v4168_v48 = vor.u32 %v4726_v39, %v4167_v38 }
 0x15f   :  { %v3892_v55 = vor.u32 %v4654_v46, %v3889_v47  ;;  %v4745_v38 = vld [vmem:[#allocation5 + $0xe4] sm:$0xf]  ;;  %v4249_v39 = vld [vmem:[#allocation5 + $0xe8] sm:$0xf0]  ;;  %v4727_v46 = vld [vmem:[#allocation5 + $0x54] sm:$0xf] }
 0x161   :  { %2222 = vmatpush.bf16.msra.mxu0 %v3636_v56  ;;  %2235 = vmatpush.bf16.msra.mxu1 %v3764_v57  ;;  %v5099_v42 = vpop.f32.mrf.mxu1  ;;  %v4020_v56 = vor.u32 %v4686_v41, %v4017_v62  ;;  %v4160_v57 = vor.u32 %v4724_v52, %v4159_v51  ;;  %v4177_v41 = vld [vmem:[#allocation5 + $0x58] sm:$0xf0]  ;;  %v4743_v62 = vld [vmem:[#allocation5 + $0xd4] sm:$0xf]  ;;  %v4725_v51 = vld [vmem:[#allocation5 + $0x44] sm:$0xf] }
 0x162   :  { %2244 = vmatpush.bf16.msra.mxu2 %v3956_v60  ;;  %2257 = vmatpush.bf16.msra.mxu3 %v4084_v61  ;;  %v1992_v6 = vpop.f32.mrf.mxu2  ;;  %v2005_v45 = vpop.f32.mrf.mxu3  ;;  %v4224_v60 = vor.u32 %v4740_v54, %v4223_v53  ;;  %v4151_v61 = vld [vmem:[#allocation5 + $0x20] sm:$0xf] }
 0x163   :  { %v4152_v7 = vor.u32 %v4722_v0, %v4151_v61  ;;  %v4252_v45 = vor.u32 %v4745_v38, %v4249_v39  ;;  %v4201_v38 = vld [vmem:[#allocation5 + $0x88] sm:$0xf0] }
 0x164   :  { %2223 = vmatmul.bf16.vlgmr.msra.gmra.mxu0 %v5036_v58  ;;  %2236 = vmatmul.bf16.vlgmr.msra.gmra.mxu1 %v5038_v59  ;;  %v4231_v58 = vld [vmem:[#allocation5 + $0xc0] sm:$0xf]  ;;  %v5097_v59 = vpop.f32.mrf.mxu0 }
 0x165   :  { %2698 = vmatpush.bf16.msrb.mxu0 %v4192_v3  ;;  %2711 = vmatpush.bf16.msrb.mxu1 %v4256_v4  ;;  %v4232_v63 = vor.u32 %v4742_v40, %v4231_v58  ;;  %v1978_v4 = vadd.f32 %v5083_v50, %v5081_v49  ;;  %v4718_v49 = vld [vmem:[#allocation5 + $0x4] sm:$0xf0]  ;;  %v4199_v50 = vld [vmem:[#allocation5 + $0x80] sm:$0xf] }
 0x166   :  { %2245 = vmatpush.bf16.msra.mxu2 %v3940_v16  ;;  %2258 = vmatpush.bf16.msra.mxu3 %v4068_v17  ;;  %v4207_v16 = vld [vmem:[#allocation5 + $0x90] sm:$0xf]  ;;  %v4736_v17 = vld [vmem:[#allocation5 + $0x94] sm:$0xf0] }
 0x167   :  { %v1991_v20 = vadd.f32 %v5091_v18, %v1978_v4  ;;  %v4208_v23 = vor.u32 %v4736_v17, %v4207_v16  ;;  %v4257_v18 = vld [vmem:[#allocation5 + $0xf8] sm:$0xf0]  ;;  %v4739_v16 = vld [vmem:[#allocation5 + $0xb4] sm:$0xf] }
 0x168   :  { %v4260_v35 = vor.u32 %v4747_v26, %v4257_v18  ;;  %v4225_v17 = vld [vmem:[#allocation5 + $0xb8] sm:$0xf0]  ;;  %v4217_v26 = vld [vmem:[#allocation5 + $0xa8] sm:$0xf0] }
 0x169   :  { %2699 = vmatpush.bf16.msrb.mxu0 %v4184_v24  ;;  %2712 = vmatpush.bf16.msrb.mxu1 %v4248_v43  ;;  %v2031_v3 = vpop.f32.mrf.mxu1  ;;  %v4734_v24 = vld [vmem:[#allocation5 + $0x84] sm:$0xf0]  ;;  %v4731_v43 = vld [vmem:[#allocation5 + $0x74] sm:$0xf]  ;;  %v2004_v27 = vadd.f32 %v5093_v19, %v1991_v20  ;;  %v1939_v19 = vadd.f32 %v5085_v13, %v5079_v33  ;;  %v4180_v13 = vor.u32 %v4727_v46, %v4177_v41 }
 0x16a   :  { %2246 = vmatpush.bf16.msra.mxu2 %v3924_v29  ;;  %2259 = vmatpush.bf16.msra.mxu3 %v4052_v30  ;;  %v2273_v29 = vld [vmem:[#allocation1 + $0x9] sm:$0xff]  ;;  %v4200_v30 = vor.u32 %v4734_v24, %v4199_v50  ;;  %v4196_v34 = vor.u32 %v4731_v43, %v4193_v25  ;;  %v4153_v43 = vld [vmem:[#allocation5 + $0x28] sm:$0xf0] }
 0x16b   :  { %v2279_v32 = vpack.i.b16 %v2273_v29, %v2273_v29  ;;  %v4737_v25 = vld [vmem:[#allocation5 + $0xa4] sm:$0xf] }
 0x16c   :  { %v2018_v8 = vpop.f32.mrf.mxu0  ;;  %v4220_v18 = vor.u32 %v4737_v25, %v4217_v26  ;;  %v4772_v25 = vld [vmem:[#allocation5 + $0x1b4] sm:$0xf0]  ;;  %v4279_v26 = vld [vmem:[#allocation5 + $0x120] sm:$0xf] }
 0x16d   :  { %2700 = vmatpush.bf16.msrb.mxu0 %v4176_v36  ;;  %2713 = vmatpush.bf16.msrb.mxu1 %v4240_v37  ;;  %v4729_v36 = vld [vmem:[#allocation5 + $0x64] sm:$0xf]  ;;  %v4185_v37 = vld [vmem:[#allocation5 + $0x68] sm:$0xf0] }
 0x16e   :  { %2247 = vmatpush.bf16.msra.mxu2 %v3908_v5  ;;  %2260 = vmatpush.bf16.msra.mxu3 %v4036_v44  ;;  %v2278_v5 = vperm.slane %v2276_v31, 0  ;;  %v2281_v44 = vperm.slane %v2279_v32, 0  ;;  %v4188_v6 = vor.u32 %v4729_v36, %v4185_v37  ;;  %v4209_v31 = vld [vmem:[#allocation5 + $0x98] sm:$0xf0]  ;;  %v4137_v36 = vld [vmem:[#allocation5 + $0x8] sm:$0xf0] }
 0x16f   :  { %v4733_v37 = vld [vmem:[#allocation5 + $0x84] sm:$0xf] }
 0x170   :  { %v2292_v53 = vunpack.c.l.bf16 %v2278_v5  ;;  %v2293_v54 = vunpack.c.l.bf16 %v2281_v44 }
 0x171   :  { %2701 = vmatpush.bf16.msrb.mxu0 %v4168_v48  ;;  %2714 = vmatpush.bf16.msrb.mxu1 %v4232_v63  ;;  %v4241_v48 = vld [vmem:[#allocation5 + $0xd8] sm:$0xf0]  ;;  %v1952_v63 = vadd.f32 %v5087_v14, %v1939_v19  ;;  %v4204_v19 = vor.u32 %v4733_v37, %v4201_v38 }
 0x172   :  { %2248 = vmatpush.bf16.msra.mxu2 %v3892_v55  ;;  %2261 = vmatpush.bf16.msra.mxu3 %v4020_v56  ;;  %v4169_v55 = vld [vmem:[#allocation5 + $0x48] sm:$0xf0]  ;;  %v4741_v56 = vld [vmem:[#allocation5 + $0xc4] sm:$0xf] }
 0x173   :  { %v4172_v14 = vor.u32 %v4725_v51, %v4169_v55  ;;  %v4780_v51 = vld [vmem:[#allocation5 + $0x1f4] sm:$0xf0]  ;;  %v4311_v55 = vld [vmem:[#allocation5 + $0x160] sm:$0xf] }
 0x175   :  { %2702 = vmatpush.bf16.msrb.mxu0 %v4160_v57  ;;  %2715 = vmatpush.bf16.msrb.mxu1 %v4224_v60  ;;  %v4233_v57 = vld [vmem:[#allocation5 + $0xc8] sm:$0xf0] }
 0x176   :  { %2249 = vmatmul.bf16.vlgmr.msra.gmra.mxu2 %v5052_v15  ;;  %2262 = vmatmul.bf16.vlgmr.msra.gmra.mxu3 %v5054_v10  ;;  %v2017_v15 = vadd.f32 %v5097_v59, %v2004_v27  ;;  %v4136_v10 = vor.u32 %v4718_v49, %v4135_v21  ;;  %v4236_v4 = vor.u32 %v4741_v56, %v4233_v57  ;;  %v4721_v49 = vld [vmem:[#allocation5 + $0x24] sm:$0xf]  ;;  %v4762_v56 = vld [vmem:[#allocation5 + $0x164] sm:$0xf0]  ;;  %v4375_v57 = vld [vmem:[#allocation5 + $0x1e0] sm:$0xf] }
 0x177   :  { %v4156_v29 = vor.u32 %v4721_v49, %v4153_v43  ;;  %v4287_v49 = vld [vmem:[#allocation5 + $0x130] sm:$0xf] }
 0x178   :  { %v2030_v58 = vadd.f32 %v5099_v42, %v2017_v15  ;;  %v4244_v42 = vor.u32 %v4743_v62, %v4241_v48  ;;  %v4719_v15 = vld [vmem:[#allocation5 + $0x14] sm:$0xf] }
 0x179   :  { %2703 = vmatpush.bf16.msrb.mxu0 %v4152_v7  ;;  %2716 = vmatpush.bf16.msrb.mxu1 %v4216_v9  ;;  %v4723_v7 = vld [vmem:[#allocation5 + $0x34] sm:$0xf] }
 0x17a   :  { %v2042_v40 = vpop.f32.mrf.mxu2  ;;  %v2055_v59 = vpop.f32.mrf.mxu3 }
 0x17b   :  { %v2043_v47 = vadd.f32 %v2042_v40, %v2030_v58 }
 0x17d   :  { %2704 = vmatpush.bf16.msrb.mxu0 %v4144_v22  ;;  %2717 = vmatpush.bf16.msrb.mxu1 %v4208_v23  ;;  %v2056_v33 = vadd.f32 %v2055_v59, %v2043_v47  ;;  %v4164_v22 = vor.u32 %v4723_v7, %v4161_v11  ;;  %v4228_v23 = vor.u32 %v4739_v16, %v4225_v17  ;;  %v4295_v16 = vld [vmem:[#allocation5 + $0x140] sm:$0xf]  ;;  %v4758_v17 = vld [vmem:[#allocation5 + $0x144] sm:$0xf0] }
 0x17f   :  { %v2267_v52 = vpack.c.bf16 %v2056_v33, %v1952_v63  ;;  %v4319_v63 = vld [vmem:[#allocation5 + $0x170] sm:$0xf]  ;;  %v4764_v33 = vld [vmem:[#allocation5 + $0x174] sm:$0xf0] }
 0x181   :  { %2705 = vmatpush.bf16.msrb.mxu0 %v4136_v10  ;;  %2718 = vmatpush.bf16.msrb.mxu1 %v4200_v30  ;;  %v2288_v60 = vunpack.c.l.bf16 %v2267_v52  ;;  %v2289_v61 = vunpack.c.h.bf16 %v2267_v52  ;;  %v2068_v0 = vpop.f32.mrf.mxu0  ;;  %v2081_v1 = vpop.f32.mrf.mxu1  ;;  %v4145_v10 = vld [vmem:[#allocation5 + $0x18] sm:$0xf0]  ;;  %v4735_v30 = vld [vmem:[#allocation5 + $0x94] sm:$0xf] }
 0x182   :  { %v2082_v2 = vadd.f32 %v2081_v1, %v2068_v0  ;;  %v2044_v8 = vpop.f32.mrf.mxu2  ;;  %v2057_v3 = vpop.f32.mrf.mxu3  ;;  %v4148_v32 = vor.u32 %v4719_v15, %v4145_v10  ;;  %v4303_v1 = vld [vmem:[#allocation5 + $0x150] sm:$0xf] }
 0x183   :  { %v2296_v9 = vadd.f32 %v2292_v53, %v2288_v60  ;;  %v2297_v12 = vadd.f32 %v2293_v54, %v2289_v61  ;;  %v4312_v60 = vor.u32 %v4762_v56, %v4311_v55  ;;  %v4778_v61 = vld [vmem:[#allocation5 + $0x1e4] sm:$0xf0]  ;;  %v4367_v8 = vld [vmem:[#allocation5 + $0x1d0] sm:$0xf]  ;;  %v4759_v56 = vld [vmem:[#allocation5 + $0x154] sm:$0xf] }
 0x184   :  { %v4376_v0 = vor.u32 %v4778_v61, %v4375_v57  ;;  %v4305_v57 = vld [vmem:[#allocation5 + $0x158] sm:$0xf0]  ;;  %v4775_v61 = vld [vmem:[#allocation5 + $0x1d4] sm:$0xf] }
 0x185   :  { %2750 = vmatpush.bf16.msra.mxu0 %v4196_v34  ;;  %2763 = vmatpush.bf16.msra.mxu1 %v4260_v35  ;;  %v2306_v20 = vmax.f32 %v2296_v9, 0.0  ;;  %v2307_v21 = vmax.f32 %v2297_v12, 0.0  ;;  %v4212_v34 = vor.u32 %v4735_v30, %v4209_v31  ;;  %v4717_v35 = vld [vmem:[#allocation5 + $0x4] sm:$0xf] }
 0x186   :  { %v4140_v39 = vor.u32 %v4717_v35, %v4137_v36  ;;  %v4335_v35 = vld [vmem:[#allocation5 + $0x190] sm:$0xf]  ;;  %v4768_v36 = vld [vmem:[#allocation5 + $0x194] sm:$0xf0] }
 0x187   :  { %v2310_v50 = vpack.c.bf16 %v2306_v20, %v2306_v20  ;;  %v2311_v24 = vpack.c.bf16 %v2307_v21, %v2307_v21  ;;  %v4359_v20 = vld [vmem:[#allocation5 + $0x1c0] sm:$0xf]  ;;  %v4296_v21 = vor.u32 %v4758_v17, %v4295_v16  ;;  %v4336_v38 = vor.u32 %v4768_v36, %v4335_v35  ;;  %v4361_v17 = vld [vmem:[#allocation5 + $0x1c8] sm:$0xf0]  ;;  %v4337_v36 = vld [vmem:[#allocation5 + $0x198] sm:$0xf0] }
 0x189   :  { %2751 = vmatpush.bf16.msra.mxu0 %v4188_v6  ;;  %2764 = vmatpush.bf16.msra.mxu1 %v4252_v45  ;;  %v2070_v27 = vpop.f32.mrf.mxu0  ;;  %v2083_v28 = vpop.f32.mrf.mxu1 }
 0x18a   :  { %2706 = vmatmul.bf16.vlgmr.msrb.gmra.mxu0 %v2310_v50  ;;  %2719 = vmatmul.bf16.vlgmr.msrb.gmra.mxu1 %v2311_v24  ;;  %v4754_v27 = vld [vmem:[#allocation5 + $0x124] sm:$0xf0] }
 0x18b   :  { %v4280_v30 = vor.u32 %v4754_v27, %v4279_v26  ;;  %v4769_v26 = vld [vmem:[#allocation5 + $0x1a4] sm:$0xf] }
 0x18d   :  { %2752 = vmatpush.bf16.msra.mxu0 %v4180_v13  ;;  %2765 = vmatpush.bf16.msra.mxu1 %v4244_v42  ;;  %v4383_v13 = vld [vmem:[#allocation5 + $0x1f0] sm:$0xf]  ;;  %v4320_v42 = vor.u32 %v4764_v33, %v4319_v63  ;;  %v4313_v63 = vld [vmem:[#allocation5 + $0x168] sm:$0xf0]  ;;  %v4777_v33 = vld [vmem:[#allocation5 + $0x1e4] sm:$0xf] }
 0x18e   :  { %v4384_v52 = vor.u32 %v4780_v51, %v4383_v13 }
 0x18f   :  { %2724 = vmatpush.bf16.msrb.mxu2 %v4320_v42 }
 0x190   :  { %2737 = vmatpush.bf16.msrb.mxu3 %v4384_v52  ;;  %v4377_v52 = vld [vmem:[#allocation5 + $0x1e8] sm:$0xf0] }
 0x191   :  { %2753 = vmatpush.bf16.msra.mxu0 %v4172_v14  ;;  %2766 = vmatpush.bf16.msra.mxu1 %v4236_v4  ;;  %v4776_v14 = vld [vmem:[#allocation5 + $0x1d4] sm:$0xf0]  ;;  %v4380_v55 = vor.u32 %v4777_v33, %v4377_v52 }
 0x192   :  { %v4368_v4 = vor.u32 %v4776_v14, %v4367_v8  ;;  %v4297_v14 = vld [vmem:[#allocation5 + $0x148] sm:$0xf0] }
 0x193   :  { %2725 = vmatpush.bf16.msrb.mxu2 %v4312_v60  ;;  %v4308_v60 = vor.u32 %v4759_v56, %v4305_v57 }
 0x194   :  { %2738 = vmatpush.bf16.msrb.mxu3 %v4376_v0  ;;  %v4369_v0 = vld [vmem:[#allocation5 + $0x1d8] sm:$0xf0] }
 0x195   :  { %2754 = vmatpush.bf16.msra.mxu0 %v4164_v22  ;;  %2767 = vmatpush.bf16.msra.mxu1 %v4228_v23  ;;  %v4774_v22 = vld [vmem:[#allocation5 + $0x1c4] sm:$0xf0] }
 0x196   :  { %v4360_v23 = vor.u32 %v4774_v22, %v4359_v20  ;;  %v4289_v22 = vld [vmem:[#allocation5 + $0x138] sm:$0xf0] }
 0x198   :  { %2739 = vmatpush.bf16.msrb.mxu3 %v4368_v4  ;;  %v4773_v4 = vld [vmem:[#allocation5 + $0x1c4] sm:$0xf] }
 0x199   :  { %2755 = vmatpush.bf16.msra.mxu0 %v4156_v29  ;;  %2768 = vmatpush.bf16.msra.mxu1 %v4220_v18  ;;  %v4343_v29 = vld [vmem:[#allocation5 + $0x1a0] sm:$0xf]  ;;  %v4770_v18 = vld [vmem:[#allocation5 + $0x1a4] sm:$0xf0]  ;;  %v4364_v20 = vor.u32 %v4773_v4, %v4361_v17 }
 0x19a   :  { %v2094_v58 = vpop.f32.mrf.mxu2  ;;  %v2107_v40 = vpop.f32.mrf.mxu3  ;;  %v4344_v31 = vor.u32 %v4770_v18, %v4343_v29 }
 0x19b   :  { %v2095_v59 = vadd.f32 %v2094_v58, %v2082_v2  ;;  %v4760_v2 = vld [vmem:[#allocation5 + $0x154] sm:$0xf0]  ;;  %v4327_v58 = vld [vmem:[#allocation5 + $0x180] sm:$0xf] }
 0x19c   :  { %v4304_v3 = vor.u32 %v4760_v2, %v4303_v1  ;;  %2740 = vmatpush.bf16.msrb.mxu3 %v4360_v23  ;;  %v4372_v1 = vor.u32 %v4775_v61, %v4369_v0  ;;  %v4771_v23 = vld [vmem:[#allocation5 + $0x1b4] sm:$0xf] }
 0x19d   :  { %2756 = vmatpush.bf16.msra.mxu0 %v4148_v32  ;;  %2769 = vmatpush.bf16.msra.mxu1 %v4212_v34  ;;  %v2108_v5 = vadd.f32 %v2107_v40, %v2095_v59  ;;  %v4271_v32 = vld [vmem:[#allocation5 + $0x110] sm:$0xf]  ;;  %v4752_v34 = vld [vmem:[#allocation5 + $0x114] sm:$0xf0]  ;;  %v4766_v40 = vld [vmem:[#allocation5 + $0x184] sm:$0xf0] }
 0x19e   :  { %2726 = vmatpush.bf16.msrb.mxu2 %v4304_v3  ;;  %v4272_v37 = vor.u32 %v4752_v34, %v4271_v32  ;;  %v4757_v3 = vld [vmem:[#allocation5 + $0x144] sm:$0xf]  ;;  %v4273_v32 = vld [vmem:[#allocation5 + $0x118] sm:$0xf0]  ;;  %v4767_v34 = vld [vmem:[#allocation5 + $0x194] sm:$0xf] }
 0x19f   :  { %v4300_v16 = vor.u32 %v4757_v3, %v4297_v14 }
 0x1a1   :  { %2757 = vmatpush.bf16.msra.mxu0 %v4140_v39  ;;  %2770 = vmatpush.bf16.msra.mxu1 %v4204_v19  ;;  %v2120_v44 = vpop.f32.mrf.mxu0  ;;  %v2133_v6 = vpop.f32.mrf.mxu1  ;;  %v4263_v39 = vld [vmem:[#allocation5 + $0x100] sm:$0xf]  ;;  %v4750_v19 = vld [vmem:[#allocation5 + $0x104] sm:$0xf0] }
 0x1a2   :  { %v2121_v45 = vadd.f32 %v2120_v44, %v2108_v5  ;;  %v2096_v46 = vpop.f32.mrf.mxu2  ;;  %v2109_v47 = vpop.f32.mrf.mxu3  ;;  %2727 = vmatpush.bf16.msrb.mxu2 %v4296_v21  ;;  %v4264_v59 = vor.u32 %v4750_v19, %v4263_v39  ;;  %v4328_v5 = vor.u32 %v4766_v40, %v4327_v58  ;;  %v4763_v44 = vld [vmem:[#allocation5 + $0x174] sm:$0xf]  ;;  %v4340_v39 = vor.u32 %v4767_v34, %v4337_v36  ;;  %v4765_v19 = vld [vmem:[#allocation5 + $0x184] sm:$0xf]  ;;  %v4329_v58 = vld [vmem:[#allocation5 + $0x188] sm:$0xf0] }
 0x1a3   :  { %v4385_v47 = vld [vmem:[#allocation5 + $0x1f8] sm:$0xf0]  ;;  %v4755_v21 = vld [vmem:[#allocation5 + $0x134] sm:$0xf] }
 0x1a4   :  { %2758 = vmatmul.bf16.vlgmr.msra.gmra.mxu0 %v2310_v50  ;;  %2771 = vmatmul.bf16.vlgmr.msra.gmra.mxu1 %v2311_v24  ;;  %v5112_v41 = vadd.f32 %v2133_v6, %v2121_v45  ;;  %v4756_v50 = vld [vmem:[#allocation5 + $0x134] sm:$0xf0]  ;;  %v4351_v24 = vld [vmem:[#allocation5 + $0x1b0] sm:$0xf]  ;;  %v4321_v6 = vld [vmem:[#allocation5 + $0x178] sm:$0xf0] }
 0x1a5   :  { %v4288_v43 = vor.u32 %v4756_v50, %v4287_v49  ;;  %v4352_v28 = vor.u32 %v4772_v25, %v4351_v24  ;;  %v4779_v45 = vld [vmem:[#allocation5 + $0x1f4] sm:$0xf]  ;;  %v4324_v46 = vor.u32 %v4763_v44, %v4321_v6  ;;  %v4292_v49 = vor.u32 %v4755_v21, %v4289_v22  ;;  %v4353_v50 = vld [vmem:[#allocation5 + $0x1b8] sm:$0xf0]  ;;  %v4281_v25 = vld [vmem:[#allocation5 + $0x128] sm:$0xf0] }
 0x1a6   :  { %v4356_v24 = vor.u32 %v4771_v23, %v4353_v50  ;;  %v2274_v44 = vld [vmem:[#allocation1 + $0x12] sm:$0xff]  ;;  %v4789_v34 = vld [vmem:[%s5194_s7 + $0x40] sm:$0xff] }
 0x1a7   :  { %2728 = vmatpush.bf16.msrb.mxu2 %v4288_v43  ;;  %2741 = vmatpush.bf16.msrb.mxu3 %v4352_v28  ;;  %v4753_v43 = vld [vmem:[#allocation5 + $0x124] sm:$0xf]  ;;  %v4345_v28 = vld [vmem:[#allocation5 + $0x1a8] sm:$0xf0]  ;;  %v2282_v6 = vpack.i.b16 %v2274_v44, %v2274_v44  ;;  %v4788_v23 = vld [vmem:[%s5194_s7 + $0x38] sm:$0xff] }
 0x1a8   :  { %v4284_v27 = vor.u32 %v4753_v43, %v4281_v25  ;;  %2959 = vmatpush.bf16.msrb.mxu0 %v4788_v23  ;;  %v4787_v50 = vld [vmem:[%s5194_s7 + $0x30] sm:$0xff]  ;;  %v4786_v43 = vld [vmem:[%s5194_s7 + $0x28] sm:$0xff] }
 0x1a9   :  { %v2122_v62 = vpop.f32.mrf.mxu0  ;;  %v2135_v48 = vpop.f32.mrf.mxu1  ;;  %v2284_v33 = vperm.slane %v2282_v6, 0  ;;  %v4794_v25 = vld [vmem:[%s5194_s7 + $0x68] sm:$0xff] }
 0x1aa   :  { %v4388_v62 = vor.u32 %v4779_v45, %v4385_v47  ;;  %v4761_v48 = vld [vmem:[#allocation5 + $0x164] sm:$0xf] }
 0x1ab   :  { %2729 = vmatpush.bf16.msrb.mxu2 %v4280_v30  ;;  %2742 = vmatpush.bf16.msrb.mxu3 %v4344_v31  ;;  %v4316_v51 = vor.u32 %v4761_v48, %v4313_v63  ;;  %v4751_v31 = vld [vmem:[#allocation5 + $0x114] sm:$0xf] }
 0x1ac   :  { %v4276_v35 = vor.u32 %v4751_v31, %v4273_v32  ;;  %2960 = vmatpush.bf16.msrb.mxu0 %v4787_v50  ;;  %v4790_v31 = vld [vmem:[%s5194_s7 + $0x48] sm:$0xff]  ;;  %v4781_v32 = vld [vmem:[%s5194_s7] sm:$0xff] }
 0x1af   :  { %2730 = vmatpush.bf16.msrb.mxu2 %v4272_v37  ;;  %2743 = vmatpush.bf16.msrb.mxu3 %v4336_v38  ;;  %v4749_v37 = vld [vmem:[#allocation5 + $0x104] sm:$0xf]  ;;  %v4265_v38 = vld [vmem:[#allocation5 + $0x108] sm:$0xf0] }
 0x1b0   :  { %v4268_v40 = vor.u32 %v4749_v37, %v4265_v38  ;;  %2961 = vmatpush.bf16.msrb.mxu0 %v4786_v43 }
 0x1b3   :  { %2731 = vmatpush.bf16.msrb.mxu2 %v4264_v59  ;;  %2744 = vmatpush.bf16.msrb.mxu3 %v4328_v5  ;;  %v4332_v5 = vor.u32 %v4765_v19, %v4329_v58 }
 0x1b7   :  { %2776 = vmatpush.bf16.msra.mxu2 %v4324_v46  ;;  %2789 = vmatpush.bf16.msra.mxu3 %v4388_v62 }
 0x1ba   :  { %v5114_v53 = vpop.f32.mrf.mxu2  ;;  %v5116_v54 = vpop.f32.mrf.mxu3 }
 0x1bb   :  { %2777 = vmatpush.bf16.msra.mxu2 %v4316_v51  ;;  %2790 = vmatpush.bf16.msra.mxu3 %v4380_v55  ;;  %v2147_v46 = vadd.f32 %v5114_v53, %v5112_v41  ;;  %v2294_v55 = vunpack.c.l.bf16 %v2284_v33 }
 0x1bf   :  { %2778 = vmatpush.bf16.msra.mxu2 %v4308_v60  ;;  %2791 = vmatpush.bf16.msra.mxu3 %v4372_v1 }
 0x1c1   :  { %v5118_v7 = vpop.f32.mrf.mxu0  ;;  %v5120_v9 = vpop.f32.mrf.mxu1 }
 0x1c2   :  { %v2148_v12 = vpop.f32.mrf.mxu2  ;;  %v2161_v11 = vpop.f32.mrf.mxu3 }
 0x1c3   :  { %2779 = vmatpush.bf16.msra.mxu2 %v4300_v16  ;;  %2792 = vmatpush.bf16.msra.mxu3 %v4364_v20 }
 0x1c7   :  { %2780 = vmatpush.bf16.msra.mxu2 %v4292_v49  ;;  %2793 = vmatpush.bf16.msra.mxu3 %v4356_v24  ;;  %v4796_v49 = vld [vmem:[%s5194_s7 + $0x78] sm:$0xff]  ;;  %v4795_v24 = vld [vmem:[%s5194_s7 + $0x70] sm:$0xff] }
 0x1c8   :  { %2972 = vmatpush.bf16.msrb.mxu1 %v4796_v49 }
 0x1c9   :  { %v2174_v15 = vpop.f32.mrf.mxu0  ;;  %v2187_v10 = vpop.f32.mrf.mxu1 }
 0x1ca   :  { %v4348_v15 = vor.u32 %v4769_v26, %v4345_v28  ;;  %v2186_v10 = vadd.f32 %v5120_v9, %v5118_v7  ;;  %v2275_v7 = vld [vmem:[#allocation1 + $0x1b] sm:$0xff] }
 0x1cb   :  { %2781 = vmatpush.bf16.msra.mxu2 %v4284_v27  ;;  %v2285_v45 = vpack.i.b16 %v2275_v7, %v2275_v7  ;;  %v4785_v26 = vld [vmem:[%s5194_s7 + $0x20] sm:$0xff] }
 0x1cc   :  { %2794 = vmatpush.bf16.msra.mxu3 %v4348_v15  ;;  %2973 = vmatpush.bf16.msrb.mxu1 %v4795_v24  ;;  %v4793_v27 = vld [vmem:[%s5194_s7 + $0x60] sm:$0xff]  ;;  %v4783_v15 = vld [vmem:[%s5194_s7 + $0x10] sm:$0xff] }
 0x1cd   :  { %v2803_v28 = vld [vmem:[%s5193_s6] sm:$0x3]  ;;  %2962 = vmatpush.bf16.msrb.mxu0 %v4785_v26 }
 0x1ce   :  { %2805 = vst [vmem:[#allocation1] ss:$9 sm:$0xff] %v2803_v28 }
 0x1cf   :  { %2782 = vmatpush.bf16.msra.mxu2 %v4276_v35 }
 0x1d0   :  { %2795 = vmatpush.bf16.msra.mxu3 %v4340_v39  ;;  %2974 = vmatpush.bf16.msrb.mxu1 %v4794_v25 }
 0x1d3   :  { %2783 = vmatpush.bf16.msra.mxu2 %v4268_v40 }
 0x1d4   :  { %2796 = vmatpush.bf16.msra.mxu3 %v4332_v5  ;;  %2975 = vmatpush.bf16.msrb.mxu1 %v4793_v27 }
 0x1d5   :  { %v2806_v39 = vld [vmem:[#allocation1] sm:$0xff]  ;;  %v2807_v19 = vld [vmem:[#allocation1 + $0x9] sm:$0xff] }
 0x1d6   :  { %v2808_v58 = vpack.i.b16 %v2806_v39, %v2806_v39  ;;  %v2811_v40 = vpack.i.b16 %v2807_v19, %v2807_v19 }
 0x1d8   :  { %v2813_v6 = vperm.slane %v2811_v40, 0 }
 0x1da   :  { %v2198_v13 = vpop.f32.mrf.mxu2  ;;  %v2211_v42 = vpop.f32.mrf.mxu3 }
 0x1db   :  { %v2199_v30 = vadd.f32 %v2198_v13, %v2186_v10  ;;  %v2287_v13 = vperm.slane %v2285_v45, 0  ;;  %v4791_v10 = vld [vmem:[%s5194_s7 + $0x50] sm:$0xff] }
 0x1dd   :  { %v2212_v59 = vadd.f32 %v2211_v42, %v2199_v30  ;;  %v2160_v42 = vadd.f32 %v5116_v54, %v2147_v46  ;;  %v2295_v56 = vunpack.c.l.bf16 %v2287_v13  ;;  %v4782_v30 = vld [vmem:[%s5194_s7 + $0x8] sm:$0xff] }
 0x1e1   :  { %v2224_v2 = vpop.f32.mrf.mxu0  ;;  %v2237_v8 = vpop.f32.mrf.mxu1 }
 0x1e2   :  { %v2200_v12 = vpop.f32.mrf.mxu2  ;;  %v2213_v11 = vpop.f32.mrf.mxu3  ;;  %v2225_v9 = vadd.f32 %v2224_v2, %v2212_v59 }
 0x1e4   :  { %v2238_v47 = vadd.f32 %v2237_v8, %v2225_v9  ;;  %v2810_v9 = vperm.slane %v2808_v58, 0 }
 0x1e9   :  { %v2226_v29 = vpop.f32.mrf.mxu0  ;;  %v2239_v18 = vpop.f32.mrf.mxu1 }
 0x1ea   :  { %v4784_v29 = vld [vmem:[%s5194_s7 + $0x18] sm:$0xff] }
 0x1eb   :  { %v4792_v18 = vld [vmem:[%s5194_s7 + $0x58] sm:$0xff]  ;;  %2963 = vmatpush.bf16.msrb.mxu0 %v4784_v29 }
 0x1ec   :  { %2976 = vmatpush.bf16.msrb.mxu1 %v4792_v18 }
 0x1ef   :  { %2964 = vmatpush.bf16.msrb.mxu0 %v4783_v15 }
 0x1f0   :  { %2977 = vmatpush.bf16.msrb.mxu1 %v4791_v10 }
 0x1f3   :  { %2965 = vmatpush.bf16.msrb.mxu0 %v4782_v30 }
 0x1f4   :  { %2978 = vmatpush.bf16.msrb.mxu1 %v4790_v31 }
 0x1f7   :  { %2966 = vmatpush.bf16.msrb.mxu0 %v4781_v32 }
 0x1f8   :  { %2979 = vmatpush.bf16.msrb.mxu1 %v4789_v34 }
 0x1f9   :  { %v2250_v62 = vpop.f32.mrf.mxu2  ;;  %v2263_v48 = vpop.f32.mrf.mxu3 }
 0x1fa   :  { %v2251_v63 = vadd.f32 %v2250_v62, %v2238_v47  ;;  %v2816_v62 = vunpack.c.l.bf16 %v2810_v9 }
 0x1fc   :  { %v2264_v51 = vadd.f32 %v2263_v48, %v2251_v63  ;;  %v2817_v48 = vunpack.c.l.bf16 %v2813_v6 }
 0x1fe   :  { %v2268_v52 = vpack.c.bf16 %v2264_v51, %v2160_v42 }
 0x200   :  { %v2290_v57 = vunpack.c.l.bf16 %v2268_v52  ;;  %v2291_v60 = vunpack.c.h.bf16 %v2268_v52 }
 0x201   :  { %v2252_v61 = vpop.f32.mrf.mxu2  ;;  %v2265_v0 = vpop.f32.mrf.mxu3 }
 0x202   :  { %v2298_v1 = vadd.f32 %v2294_v55, %v2290_v57  ;;  %v2299_v2 = vadd.f32 %v2295_v56, %v2291_v60  ;;  %v4805_v61 = vld [vmem:[%s5195_s8] ss:$0 sm:$0xff]  ;;  %s4894_s8 = smov [#allocation7]  }
 0x203   :  { %s3056_s0 = sshll.u32 %s4894_s8, 4  ;;  %s3057_s0 = int_to_ptr.vmem [resolvable:$true] %s3056_s0 }
 0x204   :  { %v2308_v3 = vmax.f32 %v2298_v1, 0.0  ;;  %v2309_v41 = vmax.f32 %v2299_v2, 0.0 }
 0x206   :  { %v2312_v53 = vpack.c.bf16 %v2308_v3, %v2308_v3  ;;  %v2313_v8 = vpack.c.bf16 %v2309_v41, %v2309_v41 }
 0x207   :  { %v2707_v14 = vpop.f32.mrf.mxu0  ;;  %v2720_v4 = vpop.f32.mrf.mxu1 }
 0x208   :  { %2732 = vmatmul.bf16.vlgmr.msrb.gmra.mxu2 %v2312_v53  ;;  %2745 = vmatmul.bf16.vlgmr.msrb.gmra.mxu3 %v2313_v8  ;;  %v2721_v12 = vadd.f32 %v2720_v4, %v2707_v14 }
 0x20f   :  { %v2709_v54 = vpop.f32.mrf.mxu0  ;;  %v2722_v11 = vpop.f32.mrf.mxu1 }
 0x218   :  { %2784 = vmatmul.bf16.vlgmr.msra.gmra.mxu2 %v2312_v53  ;;  %2797 = vmatmul.bf16.vlgmr.msra.gmra.mxu3 %v2313_v8 }
 0x221   :  { %v2759_v16 = vpop.f32.mrf.mxu0  ;;  %v2772_v17 = vpop.f32.mrf.mxu1 }
 0x222   :  { %v2773_v20 = vadd.f32 %v2772_v17, %v2759_v16 }
 0x229   :  { %v2761_v21 = vpop.f32.mrf.mxu0  ;;  %v2774_v22 = vpop.f32.mrf.mxu1 }
 0x28b   :  { %v2733_v35 = vpop.f32.mrf.mxu2  ;;  %v2746_v36 = vpop.f32.mrf.mxu3 }
 0x28c   :  { %v2734_v59 = vadd.f32 %v2733_v35, %v2721_v12 }
 0x28e   :  { %v2747_v45 = vadd.f32 %v2746_v36, %v2734_v59 }
 0x293   :  { %v2735_v37 = vpop.f32.mrf.mxu2  ;;  %v2748_v38 = vpop.f32.mrf.mxu3 }
 0x29b   :  { %v2785_v5 = vpop.f32.mrf.mxu2  ;;  %v2798_v44 = vpop.f32.mrf.mxu3 }
 0x29c   :  { %v2786_v7 = vadd.f32 %v2785_v5, %v2773_v20 }
 0x29e   :  { %v2799_v46 = vadd.f32 %v2798_v44, %v2786_v7 }
 0x2a0   :  { %v2802_v47 = vpack.c.bf16 %v2799_v46, %v2747_v45 }
 0x2a2   :  { %v2814_v63 = vunpack.c.l.bf16 %v2802_v47  ;;  %v2815_v33 = vunpack.c.h.bf16 %v2802_v47 }
 0x2a3   :  { %v2787_v13 = vpop.f32.mrf.mxu2  ;;  %v2800_v42 = vpop.f32.mrf.mxu3 }
 0x2a4   :  { %v2818_v51 = vadd.f32 %v2816_v62, %v2814_v63  ;;  %v2819_v52 = vadd.f32 %v2817_v48, %v2815_v33 }
 0x2a6   :  { %v2823_v55 = vmax.f32 %v2818_v51, 0.0  ;;  %v2824_v56 = vmax.f32 %v2819_v52, 0.0 }
 0x2a8   :  { %v2825_v57 = vpack.c.bf16 %v2823_v55, %v2823_v55  ;;  %v2826_v60 = vpack.c.bf16 %v2824_v56, %v2824_v56 }
 0x2aa   :  { %2967 = vmatmul.bf16.vlgmr.msrb.gmra.mxu0 %v2825_v57  ;;  %2980 = vmatmul.bf16.vlgmr.msrb.gmra.mxu1 %v2826_v60 }
 0x327   :  { %v2968_v0 = vpop.f32.mrf.mxu0  ;;  %v2981_v1 = vpop.f32.mrf.mxu1 }
 0x328   :  { %v2969_v2 = vadd.f32 %v4805_v61, %v2968_v0 }
 0x32a   :  { %v2982_v3 = vadd.f32 %v2981_v1, %v2969_v2 }
 0x32c   :  { %2985 = vxpose.xlu0.b32.start.end [1/1] (short) (narrow) %v2982_v3, 8 }
 0x32f   :  { %v2970_v41 = vpop.f32.mrf.mxu0  ;;  %v2983_v53 = vpop.f32.mrf.mxu1 }
 0x3d0   :  { %v3001_v8 = vpop.trf.xlu0 }
 0x3d1   :  { %v3018_v14 = vsel %vm3017_vm1, %v3001_v8, -inf }
 0x3d2   :  { %v3019_v4 = vrot.slane %v3018_v14, 4 }
 0x3d4   :  { %v3020_v12 = vmax.f32 %v3018_v14, %v3019_v4 }
 0x3d6   :  { %v3021_v54 = vrot.slane %v3020_v12, 2 }
 0x3d8   :  { %v3022_v11 = vmax.f32 %v3020_v12, %v3021_v54 }
 0x3da   :  { %v3023_v16 = vrot.slane %v3022_v11, 1 }
 0x3dc   :  { %v3024_v17 = vmax.f32 %v3022_v11, %v3023_v16 }
 0x3de   :  { %v3025_v20 = vsub.f32 %v3001_v8, %v3024_v17 }
 0x3e0   :  { %v3026_v21 = vmul.f32 1.442695, %v3025_v20 }
 0x3e2   :  { %4806 = vpow2.f32 %v3026_v21 }
 0x3e8   :  { %v4807_v22 = vpop.eup %4806 }
 0x3e9   :  { %v3028_v23 = vsel %vm3017_vm1, %v4807_v22, 0.0 }
 0x3ea   :  { %v3029_v49 = vrot.slane %v3028_v23, 4 }
 0x3ec   :  { %v3030_v50 = vadd.f32 %v3029_v49, %v3028_v23 }
 0x3ee   :  { %v3031_v24 = vrot.slane %v3030_v50, 2 }
 0x3f0   :  { %v3032_v43 = vadd.f32 %v3031_v24, %v3030_v50 }
 0x3f2   :  { %v3033_v25 = vrot.slane %v3032_v43, 1 }
 0x3f4   :  { %v3034_v26 = vadd.f32 %v3033_v25, %v3032_v43 }
 0x3f6   :  { %4808 = vrcp.f32 %v3034_v26  ;;  %v3046_v18 = vand.u32 2147483648, %v3034_v26  ;;  %v3044_v10 = vand.u32 2147483647, %v3034_v26  ;;  %vm3040_vm3 = vweird.f32 %v3034_v26 }
 0x3f8   :  { %v3047_v31 = vor.u32 1.1754944e-38, %v3046_v18  ;;  %vm3045_vm5 = vcmp.eq.f32.partialorder %v3044_v10, 8.507059e+37 }
 0x3fc   :  { %v4809_v27 = vpop.eup %4808 }
 0x3fd   :  { %v3036_v28 = vmul.f32 %v4809_v27, %v3034_v26  ;;  %vm3041_vm2 = vweird.f32 %v4809_v27 }
 0x3fe   :  { %vm3042_vm4 = vmor %vm3040_vm3, %vm3041_vm2 }
 0x3ff   :  { %v3037_v29 = vsub.f32 1.0, %v3036_v28 }
 0x401   :  { %v3038_v15 = vmul.f32 %v4809_v27, %v3037_v29 }
 0x403   :  { %v3039_v30 = vadd.f32 %v4809_v27, %v3038_v15 }
 0x405   :  { %v3043_v32 = vsel %vm3042_vm4, %v4809_v27, %v3039_v30 }
 0x406   :  { %v3048_v34 = vsel %vm3045_vm5, %v3047_v31, %v3043_v32 }
 0x407   :  { %v3049_v35 = vmul.f32 %v4807_v22, %v3048_v34 }
 0x409   :  { %3050 = vst.msk [vmem:[#allocation7] sm:$0xf] %vm3017_vm1, %v3049_v35 }
 0x40a   :  { %3061 = dma.vmem_to_hbm [thread:$0]  %s3057_s0, 64, %s3059_s20, [#allocation4]  }
 0x40b   :  { %4886 = dma.done.wait [#allocation4], 64  }
 0x40c   :  { %4887 = vsyncadd [#allocation4], 4294967232 }
 0x40d   :  { %3066 = vsyncpa [#allocation3], 1 }
 0x40e   :  { %3067 = vsyncpa [#allocation6], 1 }
 0x40f   :  { %3068 = vsyncpa [#allocation4], 1 }

</bundles_post_ra>
